<compile_context>
chip_gen: v5e
topology: v5e:2x2
jax: 0.10.0
libtpu: 0.0.40
codegen_flags: <defaults>
</compile_context>

<pallas_src>
import jax
import jax.numpy as jnp
from jax.experimental import pallas as pl
from jax.experimental.pallas import tpu as pltpu

LANE = 128
_BN_EPS = 1e-5


def _round_up(x, m):
    return (x + m - 1) // m * m


# ----------------------------- init-time prep ------------------------------
def _fold_bn(bn):
    gamma, beta, mean, var = (jnp.asarray(t, jnp.float32) for t in bn)
    scale = gamma / jnp.sqrt(var + _BN_EPS)
    bias = beta - mean * scale
    return scale, bias


def prepare_basic_block_params(w1, bn1, w2, bn2, wsc=None, bnsc=None):
    """One-time prep: fold BN scale into conv weights, convert to (9, Cin, Cout)
    matmul layout, cast weights to bf16, pad only the final output channel dim
    to a multiple of 128.

    w1: (planes, in_planes, 3, 3), w2: (planes, planes, 3, 3)   [PyTorch OIHW]
    bn*: (gamma, beta, running_mean, running_var), each of shape (planes,)
    wsc: optional (planes, in_planes, 1, 1) projection-shortcut weight.
    """
    w1 = jnp.asarray(w1, jnp.float32)
    w2 = jnp.asarray(w2, jnp.float32)
    planes, in_planes = int(w1.shape[0]), int(w1.shape[1])
    cout_p = _round_up(planes, LANE)
    has_proj = wsc is not None
    if not has_proj:
        assert in_planes == planes, "identity shortcut needs in_planes == planes"

    s1, b1 = _fold_bn(bn1)
    s2, b2 = _fold_bn(bn2)

    def prep3x3(w, scale, cout_pad):
        w = w * scale[:, None, None, None]                     # scale out-channels
        cout, cin = int(w.shape[0]), int(w.shape[1])
        w = jnp.transpose(w, (2, 3, 1, 0)).reshape(9, cin, cout)   # (ky*3+kx, I, O)
        if cout_pad > cout:
            w = jnp.pad(w, ((0, 0), (0, 0), (0, cout_pad - cout)))
        return w.astype(jnp.bfloat16)

    p = dict(in_planes=in_planes, planes=planes, cout_p=cout_p, has_proj=has_proj)
    # conv1: natural Cin and natural Cout (no zero-padded K on the MXU).
    p["w1"] = prep3x3(w1, s1, planes)                           # (9, cin, cout) bf16
    p["b1"] = b1.reshape(1, planes)                             # f32
    # conv2: natural K (= planes); output padded to cout_p for dense stores.
    p["w2"] = prep3x3(w2, s2, cout_p)                           # (9, cout, cout_p) bf16
    b2_full = jnp.pad(b2, (0, cout_p - planes)) if cout_p > planes else b2
    if has_proj:
        ssc, bsc = _fold_bn(bnsc)
        wm = jnp.asarray(wsc, jnp.float32).reshape(planes, in_planes)
        wm = (wm * ssc[:, None]).T                              # (cin, cout)
        if cout_p > planes:
            wm = jnp.pad(wm, ((0, 0), (0, cout_p - planes)))
            bsc = jnp.pad(bsc, (0, cout_p - planes))
        p["wsc"] = wm.astype(jnp.bfloat16)                      # (cin, cout_p)
        b2_full = b2_full + bsc           # shortcut BN bias folded into final bias
    p["b2"] = b2_full.reshape(1, cout_p)                        # f32
    return p


# --------------------------------- kernel ----------------------------------
def _make_kernel(H, W, cin, cout, cout_p, has_proj):
    HW = H * W
    I0 = _round_up(W + 1, 8)        # sublane-aligned start of the interior
    R = I0 + HW + W + 1             # rows of the flat halo scratch

    def conv3x3(src_ref, w_ref, b_ref, n_out, keep_l, keep_r):
        # 9 MXU matmuls; every tap operand is a *contiguous* flat window of the
        # halo scratch (no strided slice + reshape materialisation).
        acc = jnp.broadcast_to(b_ref[...], (HW, n_out))          # bias seeds acc (f32)
        for ky in range(3):
            for kx in range(3):
                off = (ky - 1) * W + (kx - 1)
                op = src_ref[pl.ds(I0 + off, HW), :]
                if kx == 0:
                    op = op * keep_l        # zero the wrapped w == 0 column
                elif kx == 2:
                    op = op * keep_r        # zero the wrapped w == W-1 column
                acc = acc + jnp.dot(op.astype(jnp.bfloat16), w_ref[ky * 3 + kx],
                                    preferred_element_type=jnp.float32)
        return acc

    def kernel(*refs):
        if has_proj:
            (x_ref, w1_ref, b1_ref, w2_ref, b2_ref, wsc_ref,
             o_ref, xpad_ref, hpad_ref) = refs
        else:
            (x_ref, w1_ref, b1_ref, w2_ref, b2_ref,
             o_ref, xpad_ref, hpad_ref) = refs

        # Per-row keep masks for the horizontal (kx) edge taps.
        wpos = jax.lax.broadcasted_iota(jnp.int32, (HW, 1), 0) % W
        keep_l = (wpos > 0).astype(jnp.float32)
        keep_r = (wpos < W - 1).astype(jnp.float32)

        # In-kernel halo padding (input arrives un-padded from HBM).  Only the
        # small halo bands (I0 + W + 1 rows) are re-zeroed per step; the
        # interior store is sublane-aligned (I0, HW multiples of 8).  Each grid
        # step is self-contained, so the batch axis can be "parallel".
        x = x_ref[...]                                           # (HW, cin) f32
        xpad_ref[pl.ds(0, I0), :] = jnp.zeros((I0, cin), jnp.float32)
        xpad_ref[pl.ds(I0, HW), :] = x
        xpad_ref[pl.ds(I0 + HW, W + 1), :] = jnp.zeros((W + 1, cin), jnp.float32)

        # conv1 -> (folded) bn1 -> relu
        h = jnp.maximum(conv3x3(xpad_ref, w1_ref, b1_ref, cout, keep_l, keep_r), 0.0)
        hpad_ref[pl.ds(0, I0), :] = jnp.zeros((I0, cout), jnp.float32)
        hpad_ref[pl.ds(I0, HW), :] = h
        hpad_ref[pl.ds(I0 + HW, W + 1), :] = jnp.zeros((W + 1, cout), jnp.float32)

        # conv2 -> (folded) bn2   (bias already contains the shortcut-BN bias)
        y = conv3x3(hpad_ref, w2_ref, b2_ref, cout_p, keep_l, keep_r)

        # shortcut: reuse the already-loaded natural x tile (conv1 centre patch)
        if has_proj:
            sc = jnp.dot(x.astype(jnp.bfloat16), wsc_ref[...],
                         preferred_element_type=jnp.float32)
        else:
            sc = x
            if cout_p > cout:
                sc = jnp.concatenate(
                    [sc, jnp.zeros((HW, cout_p - cout), jnp.float32)], axis=-1)

        o_ref[...] = jnp.maximum(y + sc, 0.0)

    return kernel


# -------------------------------- wrapper ----------------------------------
def basic_block_forward(x_nhwc, params, stride=1):
    """x_nhwc: (N, H, W, in_planes) float32.

    Returns (N, H, W, cout_p) with cout_p = round_up(planes, 128); channels
    [planes:] are zero.  The padded-lane layout is kept on purpose (dense
    stores; chained blocks can consume it directly) -- slice off the padding
    only at the network head if needed.
    """
    if stride != 1:
        # TODO(synk): strided (downsampling) BasicBlock path not implemented.
        raise NotImplementedError("stride != 1 is not supported by this kernel")

    N, H, W, cin = x_nhwc.shape
    assert cin == params["in_planes"]
    cout, cout_p = params["planes"], params["cout_p"]
    has_proj = params["has_proj"]
    HW = H * W
    I0 = _round_up(W + 1, 8)
    R = I0 + HW + W + 1

    # Free (metadata-only) reshape: the kernel works on flat (HW, C) tiles.
    x_flat = x_nhwc.astype(jnp.float32).reshape(N, HW, cin)

    inputs = [x_flat, params["w1"], params["b1"], params["w2"], params["b2"]]
    if has_proj:
        inputs.append(params["wsc"])

    # x is pipelined over the batch grid; weights / biases are whole-array,
    # single-copy VMEM residents (no double buffering).
    in_specs = [pl.BlockSpec((None, HW, cin), lambda n: (n, 0, 0))]
    in_specs += [pl.BlockSpec(memory_space=pltpu.MemorySpace.VMEM)
                 for _ in range(len(inputs) - 1)]

    weight_bytes = sum(int(a.size) * a.dtype.itemsize for a in inputs[1:])
    block_bytes = 2 * (HW * cin + HW * cout_p) * 4            # double-buffered x / out
    scratch_bytes = R * (_round_up(cin, LANE) + _round_up(cout, LANE)) * 4
    vmem_limit = int(min(64 * 2**20,
                         max(32 * 2**20,
                             2 * (weight_bytes + block_bytes + scratch_bytes))))

    flops = N * (2 * HW * 9 * cin * cout + 2 * HW * 9 * cout * cout_p)
    if has_proj:
        flops += N * 2 * HW * cin * cout_p
    bytes_accessed = int(x_flat.size) * 4 + N * HW * cout_p * 4 + weight_bytes

    out = pl.pallas_call(
        _make_kernel(H, W, cin, cout, cout_p, has_proj),
        out_shape=jax.ShapeDtypeStruct((N, HW, cout_p), jnp.float32),
        grid_spec=pltpu.PrefetchScalarGridSpec(
            num_scalar_prefetch=0,
            grid=(N,),
            in_specs=in_specs,
            out_specs=pl.BlockSpec((None, HW, cout_p), lambda n: (n, 0, 0)),
            scratch_shapes=[pltpu.VMEM((R, cin), jnp.float32),
                            pltpu.VMEM((R, cout), jnp.float32)],
        ),
        compiler_params=pltpu.CompilerParams(
            # TODO(synk): add a second "parallel" axis (H-bands / Cout tiles)
            # so v7x's two TensorCores stay busy when N is 1 or odd.
            dimension_semantics=("parallel",),
            vmem_limit_bytes=vmem_limit),
        cost_estimate=pl.CostEstimate(flops=int(flops), transcendentals=0,
                                      bytes_accessed=int(bytes_accessed)),
    )(*inputs)
    return out.reshape(N, H, W, cout_p)


# ------------------------------- reference ---------------------------------
def _conv_ref(x, w_oihw, stride, pad):
    w = jnp.transpose(jnp.asarray(w_oihw, jnp.float32), (2, 3, 1, 0))
    return jax.lax.conv_general_dilated(
        x, w, window_strides=(stride, stride), padding=pad,
        dimension_numbers=("NHWC", "HWIO", "NHWC"))


def _bn_ref(x, bn):
    gamma, beta, mean, var = bn
    return (x - mean) * (gamma / jnp.sqrt(var + _BN_EPS)) + beta


def basic_block_reference(x_nhwc, w1, bn1, w2, bn2, wsc=None, bnsc=None):
    x = x_nhwc.astype(jnp.float32)
    out = jax.nn.relu(_bn_ref(_conv_ref(x, w1, 1, ((1, 1), (1, 1))), bn1))
    out = _bn_ref(_conv_ref(out, w2, 1, ((1, 1), (1, 1))), bn2)
    sc = _bn_ref(_conv_ref(x, wsc, 1, ((0, 0), (0, 0))), bnsc) if wsc is not None else x
    return jax.nn.relu(out + sc)


# ---------------------------------- test -----------------------------------
if __name__ == "__main__":
    key = jax.random.PRNGKey(0)
    N, H, W = 2, 16, 16

    def rand_bn(k, c):
        k1, k2, k3, k4 = jax.random.split(k, 4)
        return (jax.random.uniform(k1, (c,), jnp.float32, 0.8, 1.2),
                0.1 * jax.random.normal(k2, (c,), jnp.float32),
                0.1 * jax.random.normal(k3, (c,), jnp.float32),
                jax.random.uniform(k4, (c,), jnp.float32, 0.8, 1.2))

    def max_rel_err(a, b):
        return float(jnp.max(jnp.abs(a - b)) /
                     jnp.maximum(jnp.max(jnp.abs(b)), 1e-3))

    keys = jax.random.split(key, 12)

    # --- Case 1: identity shortcut (in_planes == planes, stride=1) ---
    cin, cout = 32, 32
    x = jax.random.normal(keys[0], (N, H, W, cin), jnp.float32)
    w1 = 0.05 * jax.random.normal(keys[1], (cout, cin, 3, 3), jnp.float32)
    w2 = 0.05 * jax.random.normal(keys[2], (cout, cout, 3, 3), jnp.float32)
    bn1, bn2 = rand_bn(keys[3], cout), rand_bn(keys[4], cout)

    params = prepare_basic_block_params(w1, bn1, w2, bn2)   # init-time prep
    y = jax.block_until_ready(basic_block_forward(x, params))
    y_ref = basic_block_reference(x, w1, bn1, w2, bn2)
    assert y.shape == (N, H, W, params["cout_p"])
    err1 = max_rel_err(y[..., :cout], y_ref)
    assert err1 < 2e-2, f"identity-shortcut mismatch vs reference: {err1}"

    # --- Case 2: projection shortcut (in_planes != planes, stride=1) ---
    cin2, cout2 = 16, 32
    xb = jax.random.normal(keys[5], (N, H, W, cin2), jnp.float32)
    w1b = 0.05 * jax.random.normal(keys[6], (cout2, cin2, 3, 3), jnp.float32)
    w2b = 0.05 * jax.random.normal(keys[7], (cout2, cout2, 3, 3), jnp.float32)
    wscb = 0.1 * jax.random.normal(keys[8], (cout2, cin2, 1, 1), jnp.float32)
    bn1b, bn2b, bnscb = (rand_bn(keys[9], cout2), rand_bn(keys[10], cout2),
                         rand_bn(keys[11], cout2))

    params2 = prepare_basic_block_params(w1b, bn1b, w2b, bn2b, wscb, bnscb)
    y2 = jax.block_until_ready(basic_block_forward(xb, params2))
    y2_ref = basic_block_reference(xb, w1b, bn1b, w2b, bn2b, wscb, bnscb)
    assert y2.shape == (N, H, W, params2["cout_p"])
    err2 = max_rel_err(y2[..., :cout2], y2_ref)
    assert err2 < 2e-2, f"projection-shortcut mismatch vs reference: {err2}"

    print("KERNEL_OK")
</pallas_src>

<mosaic_0001>
module attributes {stable_mosaic.version = 11 : i64} {
  func.func @kernel(%arg0: i32, %arg1: memref<1x256x32xf32, #tpu.memory_space<vmem>>, %arg2: memref<9x32x32xbf16, #tpu.memory_space<vmem>>, %arg3: memref<1x32xf32, #tpu.memory_space<vmem>>, %arg4: memref<9x32x128xbf16, #tpu.memory_space<vmem>>, %arg5: memref<1x128xf32, #tpu.memory_space<vmem>>, %arg6: memref<1x256x128xf32, #tpu.memory_space<vmem>>, %arg7: memref<297x32xf32, #tpu.memory_space<vmem>>, %arg8: memref<297x32xf32, #tpu.memory_space<vmem>>) attributes {dimension_semantics = [#tpu.dimension_semantics<parallel>], iteration_bounds = array<i64: 2>, scalar_prefetch = 0 : i64, scratch_operands = 2 : i64, tpu.core_type = #tpu.core_type<tc>, window_params = [{transform_indices = @transform_0, window_bounds = array<i64: 1, 256, 32>}, {pipeline_mode = #tpu.pipeline_mode<synchronous>, transform_indices = @transform_1, window_bounds = array<i64: 9, 32, 32>}, {pipeline_mode = #tpu.pipeline_mode<synchronous>, transform_indices = @transform_2, window_bounds = array<i64: 1, 32>}, {pipeline_mode = #tpu.pipeline_mode<synchronous>, transform_indices = @transform_3, window_bounds = array<i64: 9, 32, 128>}, {pipeline_mode = #tpu.pipeline_mode<synchronous>, transform_indices = @transform_4, window_bounds = array<i64: 1, 128>}, {transform_indices = @transform_5, window_bounds = array<i64: 1, 256, 128>}]} {
    %0 = tpu.iota {dimensions = array<i32: 0>} : vector<256x1xi32>
    %c16_i32 = arith.constant 16 : i32
    %c0_i32 = arith.constant 0 : i32
    %1 = arith.cmpi eq, %c16_i32, %c0_i32 : i32
    %c1_i32 = arith.constant 1 : i32
    %2 = arith.select %1, %c1_i32, %c16_i32 : i32
    %3 = vector.broadcast %2 : i32 to vector<256x1xi32>
    %4 = arith.remsi %0, %3 : vector<256x1xi32>
    %c0_i32_0 = arith.constant 0 : i32
    %5 = vector.broadcast %c0_i32_0 : i32 to vector<256x1xi32>
    %6 = arith.cmpi ne, %4, %5 : vector<256x1xi32>
    %c0_i32_1 = arith.constant 0 : i32
    %7 = vector.broadcast %c0_i32_1 : i32 to vector<256x1xi32>
    %8 = arith.cmpi slt, %4, %7 : vector<256x1xi32>
    %c0_i32_2 = arith.constant 0 : i32
    %9 = arith.cmpi slt, %2, %c0_i32_2 : i32
    %10 = vector.broadcast %9 : i1 to vector<256x1xi1>
    %11 = vector.broadcast %10 : vector<256x1xi1> to vector<256x1xi1>
    %12 = arith.xori %8, %11 : vector<256x1xi1>
    %13 = arith.andi %12, %6 : vector<256x1xi1>
    %14 = vector.broadcast %2 : i32 to vector<256x1xi32>
    %15 = arith.addi %4, %14 : vector<256x1xi32>
    %16 = arith.select %13, %15, %4 : vector<256x1xi1>, vector<256x1xi32>
    %c0_i32_3 = arith.constant 0 : i32
    %17 = vector.broadcast %c0_i32_3 : i32 to vector<256x1xi32>
    %18 = arith.cmpi sgt, %16, %17 : vector<256x1xi32>
    %19 = arith.extui %18 : vector<256x1xi1> to vector<256x1xi32>
    %20 = arith.sitofp %19 : vector<256x1xi32> to vector<256x1xf32>
    %c15_i32 = arith.constant 15 : i32
    %21 = vector.broadcast %c15_i32 : i32 to vector<256x1xi32>
    %22 = arith.cmpi slt, %16, %21 : vector<256x1xi32>
    %23 = arith.extui %22 : vector<256x1xi1> to vector<256x1xi32>
    %24 = arith.sitofp %23 : vector<256x1xi32> to vector<256x1xf32>
    %c0 = arith.constant 0 : index
    %c0_4 = arith.constant 0 : index
    %c0_5 = arith.constant 0 : index
    %25 = vector.load %arg1[%c0, %c0_4, %c0_5] : memref<1x256x32xf32, #tpu.memory_space<vmem>>, vector<1x256x32xf32>
    %26 = vector.shape_cast %25 : vector<1x256x32xf32> to vector<256x32xf32>
    %cst = arith.constant 0.000000e+00 : f32
    %27 = vector.broadcast %cst : f32 to vector<24x32xf32>
    %c0_6 = arith.constant 0 : index
    %c0_7 = arith.constant 0 : index
    %28 = vector.load %arg7[%c0_6, %c0_7] : memref<297x32xf32, #tpu.memory_space<vmem>>, vector<24x32xf32>
    tpu.vector_store %arg7[%c0_6, %c0_7], %27 {strides = array<i32>} : memref<297x32xf32, #tpu.memory_space<vmem>>, vector<24x32xf32>,
    %c24 = arith.constant 24 : index
    %c0_8 = arith.constant 0 : index
    %29 = vector.load %arg7[%c24, %c0_8] : memref<297x32xf32, #tpu.memory_space<vmem>>, vector<256x32xf32>
    tpu.vector_store %arg7[%c24, %c0_8], %26 {strides = array<i32>} : memref<297x32xf32, #tpu.memory_space<vmem>>, vector<256x32xf32>,
    %cst_9 = arith.constant 0.000000e+00 : f32
    %30 = vector.broadcast %cst_9 : f32 to vector<17x32xf32>
    %c280 = arith.constant 280 : index
    %c0_10 = arith.constant 0 : index
    %31 = vector.load %arg7[%c280, %c0_10] : memref<297x32xf32, #tpu.memory_space<vmem>>, vector<17x32xf32>
    tpu.vector_store %arg7[%c280, %c0_10], %30 {strides = array<i32>} : memref<297x32xf32, #tpu.memory_space<vmem>>, vector<17x32xf32>,
    %c0_11 = arith.constant 0 : index
    %c0_12 = arith.constant 0 : index
    %32 = vector.load %arg3[%c0_11, %c0_12] : memref<1x32xf32, #tpu.memory_space<vmem>>, vector<1x32xf32>
    %33 = vector.shape_cast %32 : vector<1x32xf32> to vector<1x32xf32>
    %34 = vector.broadcast %33 : vector<1x32xf32> to vector<256x32xf32>
    %c7 = arith.constant 7 : index
    %c0_13 = arith.constant 0 : index
    %35 = vector.load %arg7[%c7, %c0_13] : memref<297x32xf32, #tpu.memory_space<vmem>>, vector<256x32xf32>
    %36 = vector.broadcast %20 : vector<256x1xf32> to vector<256x32xf32>
    %37 = arith.mulf %35, %36 : vector<256x32xf32>
    %38 = arith.truncf %37 : vector<256x32xf32> to vector<256x32xbf16>
    %c0_14 = arith.constant 0 : index
    %c0_15 = arith.constant 0 : index
    %c0_16 = arith.constant 0 : index
    %39 = vector.load %arg2[%c0_14, %c0_15, %c0_16] : memref<9x32x32xbf16, #tpu.memory_space<vmem>>, vector<1x32x32xbf16>
    %40 = vector.shape_cast %39 : vector<1x32x32xbf16> to vector<32x32xbf16>
    %cst_17 = arith.constant dense<0.000000e+00> : vector<256x32xf32>
    %41 = tpu.matmul %38, %40, %cst_17 {dimension_numbers = #tpu.dot_dimension_numbers<[1], [0], [0], [1], [0, 0, 1, 1], [], []>} : vector<256x32xbf16>, vector<32x32xbf16>, vector<256x32xf32> -> vector<256x32xf32>
    %42 = arith.addf %34, %41 : vector<256x32xf32>
    %c8 = arith.constant 8 : index
    %c0_18 = arith.constant 0 : index
    %43 = vector.load %arg7[%c8, %c0_18] : memref<297x32xf32, #tpu.memory_space<vmem>>, vector<256x32xf32>
    %44 = arith.truncf %43 : vector<256x32xf32> to vector<256x32xbf16>
    %c1 = arith.constant 1 : index
    %c0_19 = arith.constant 0 : index
    %c0_20 = arith.constant 0 : index
    %45 = vector.load %arg2[%c1, %c0_19, %c0_20] : memref<9x32x32xbf16, #tpu.memory_space<vmem>>, vector<1x32x32xbf16>
    %46 = vector.shape_cast %45 : vector<1x32x32xbf16> to vector<32x32xbf16>
    %cst_21 = arith.constant dense<0.000000e+00> : vector<256x32xf32>
    %47 = tpu.matmul %44, %46, %cst_21 {dimension_numbers = #tpu.dot_dimension_numbers<[1], [0], [0], [1], [0, 0, 1, 1], [], []>} : vector<256x32xbf16>, vector<32x32xbf16>, vector<256x32xf32> -> vector<256x32xf32>
    %48 = arith.addf %42, %47 : vector<256x32xf32>
    %c9 = arith.constant 9 : index
    %c0_22 = arith.constant 0 : index
    %49 = vector.load %arg7[%c9, %c0_22] : memref<297x32xf32, #tpu.memory_space<vmem>>, vector<256x32xf32>
    %50 = vector.broadcast %24 : vector<256x1xf32> to vector<256x32xf32>
    %51 = arith.mulf %49, %50 : vector<256x32xf32>
    %52 = arith.truncf %51 : vector<256x32xf32> to vector<256x32xbf16>
    %c2 = arith.constant 2 : index
    %c0_23 = arith.constant 0 : index
    %c0_24 = arith.constant 0 : index
    %53 = vector.load %arg2[%c2, %c0_23, %c0_24] : memref<9x32x32xbf16, #tpu.memory_space<vmem>>, vector<1x32x32xbf16>
    %54 = vector.shape_cast %53 : vector<1x32x32xbf16> to vector<32x32xbf16>
    %cst_25 = arith.constant dense<0.000000e+00> : vector<256x32xf32>
    %55 = tpu.matmul %52, %54, %cst_25 {dimension_numbers = #tpu.dot_dimension_numbers<[1], [0], [0], [1], [0, 0, 1, 1], [], []>} : vector<256x32xbf16>, vector<32x32xbf16>, vector<256x32xf32> -> vector<256x32xf32>
    %56 = arith.addf %48, %55 : vector<256x32xf32>
    %c23 = arith.constant 23 : index
    %c0_26 = arith.constant 0 : index
    %57 = vector.load %arg7[%c23, %c0_26] : memref<297x32xf32, #tpu.memory_space<vmem>>, vector<256x32xf32>
    %58 = vector.broadcast %20 : vector<256x1xf32> to vector<256x32xf32>
    %59 = arith.mulf %57, %58 : vector<256x32xf32>
    %60 = arith.truncf %59 : vector<256x32xf32> to vector<256x32xbf16>
    %c3 = arith.constant 3 : index
    %c0_27 = arith.constant 0 : index
    %c0_28 = arith.constant 0 : index
    %61 = vector.load %arg2[%c3, %c0_27, %c0_28] : memref<9x32x32xbf16, #tpu.memory_space<vmem>>, vector<1x32x32xbf16>
    %62 = vector.shape_cast %61 : vector<1x32x32xbf16> to vector<32x32xbf16>
    %cst_29 = arith.constant dense<0.000000e+00> : vector<256x32xf32>
    %63 = tpu.matmul %60, %62, %cst_29 {dimension_numbers = #tpu.dot_dimension_numbers<[1], [0], [0], [1], [0, 0, 1, 1], [], []>} : vector<256x32xbf16>, vector<32x32xbf16>, vector<256x32xf32> -> vector<256x32xf32>
    %64 = arith.addf %56, %63 : vector<256x32xf32>
    %c24_30 = arith.constant 24 : index
    %c0_31 = arith.constant 0 : index
    %65 = vector.load %arg7[%c24_30, %c0_31] : memref<297x32xf32, #tpu.memory_space<vmem>>, vector<256x32xf32>
    %66 = arith.truncf %65 : vector<256x32xf32> to vector<256x32xbf16>
    %c4 = arith.constant 4 : index
    %c0_32 = arith.constant 0 : index
    %c0_33 = arith.constant 0 : index
    %67 = vector.load %arg2[%c4, %c0_32, %c0_33] : memref<9x32x32xbf16, #tpu.memory_space<vmem>>, vector<1x32x32xbf16>
    %68 = vector.shape_cast %67 : vector<1x32x32xbf16> to vector<32x32xbf16>
    %cst_34 = arith.constant dense<0.000000e+00> : vector<256x32xf32>
    %69 = tpu.matmul %66, %68, %cst_34 {dimension_numbers = #tpu.dot_dimension_numbers<[1], [0], [0], [1], [0, 0, 1, 1], [], []>} : vector<256x32xbf16>, vector<32x32xbf16>, vector<256x32xf32> -> vector<256x32xf32>
    %70 = arith.addf %64, %69 : vector<256x32xf32>
    %c25 = arith.constant 25 : index
    %c0_35 = arith.constant 0 : index
    %71 = vector.load %arg7[%c25, %c0_35] : memref<297x32xf32, #tpu.memory_space<vmem>>, vector<256x32xf32>
    %72 = vector.broadcast %24 : vector<256x1xf32> to vector<256x32xf32>
    %73 = arith.mulf %71, %72 : vector<256x32xf32>
    %74 = arith.truncf %73 : vector<256x32xf32> to vector<256x32xbf16>
    %c5 = arith.constant 5 : index
    %c0_36 = arith.constant 0 : index
    %c0_37 = arith.constant 0 : index
    %75 = vector.load %arg2[%c5, %c0_36, %c0_37] : memref<9x32x32xbf16, #tpu.memory_space<vmem>>, vector<1x32x32xbf16>
    %76 = vector.shape_cast %75 : vector<1x32x32xbf16> to vector<32x32xbf16>
    %cst_38 = arith.constant dense<0.000000e+00> : vector<256x32xf32>
    %77 = tpu.matmul %74, %76, %cst_38 {dimension_numbers = #tpu.dot_dimension_numbers<[1], [0], [0], [1], [0, 0, 1, 1], [], []>} : vector<256x32xbf16>, vector<32x32xbf16>, vector<256x32xf32> -> vector<256x32xf32>
    %78 = arith.addf %70, %77 : vector<256x32xf32>
    %c39 = arith.constant 39 : index
    %c0_39 = arith.constant 0 : index
    %79 = vector.load %arg7[%c39, %c0_39] : memref<297x32xf32, #tpu.memory_space<vmem>>, vector<256x32xf32>
    %80 = vector.broadcast %20 : vector<256x1xf32> to vector<256x32xf32>
    %81 = arith.mulf %79, %80 : vector<256x32xf32>
    %82 = arith.truncf %81 : vector<256x32xf32> to vector<256x32xbf16>
    %c6 = arith.constant 6 : index
    %c0_40 = arith.constant 0 : index
    %c0_41 = arith.constant 0 : index
    %83 = vector.load %arg2[%c6, %c0_40, %c0_41] : memref<9x32x32xbf16, #tpu.memory_space<vmem>>, vector<1x32x32xbf16>
    %84 = vector.shape_cast %83 : vector<1x32x32xbf16> to vector<32x32xbf16>
    %cst_42 = arith.constant dense<0.000000e+00> : vector<256x32xf32>
    %85 = tpu.matmul %82, %84, %cst_42 {dimension_numbers = #tpu.dot_dimension_numbers<[1], [0], [0], [1], [0, 0, 1, 1], [], []>} : vector<256x32xbf16>, vector<32x32xbf16>, vector<256x32xf32> -> vector<256x32xf32>
    %86 = arith.addf %78, %85 : vector<256x32xf32>
    %c40 = arith.constant 40 : index
    %c0_43 = arith.constant 0 : index
    %87 = vector.load %arg7[%c40, %c0_43] : memref<297x32xf32, #tpu.memory_space<vmem>>, vector<256x32xf32>
    %88 = arith.truncf %87 : vector<256x32xf32> to vector<256x32xbf16>
    %c7_44 = arith.constant 7 : index
    %c0_45 = arith.constant 0 : index
    %c0_46 = arith.constant 0 : index
    %89 = vector.load %arg2[%c7_44, %c0_45, %c0_46] : memref<9x32x32xbf16, #tpu.memory_space<vmem>>, vector<1x32x32xbf16>
    %90 = vector.shape_cast %89 : vector<1x32x32xbf16> to vector<32x32xbf16>
    %cst_47 = arith.constant dense<0.000000e+00> : vector<256x32xf32>
    %91 = tpu.matmul %88, %90, %cst_47 {dimension_numbers = #tpu.dot_dimension_numbers<[1], [0], [0], [1], [0, 0, 1, 1], [], []>} : vector<256x32xbf16>, vector<32x32xbf16>, vector<256x32xf32> -> vector<256x32xf32>
    %92 = arith.addf %86, %91 : vector<256x32xf32>
    %c41 = arith.constant 41 : index
    %c0_48 = arith.constant 0 : index
    %93 = vector.load %arg7[%c41, %c0_48] : memref<297x32xf32, #tpu.memory_space<vmem>>, vector<256x32xf32>
    %94 = vector.broadcast %24 : vector<256x1xf32> to vector<256x32xf32>
    %95 = arith.mulf %93, %94 : vector<256x32xf32>
    %96 = arith.truncf %95 : vector<256x32xf32> to vector<256x32xbf16>
    %c8_49 = arith.constant 8 : index
    %c0_50 = arith.constant 0 : index
    %c0_51 = arith.constant 0 : index
    %97 = vector.load %arg2[%c8_49, %c0_50, %c0_51] : memref<9x32x32xbf16, #tpu.memory_space<vmem>>, vector<1x32x32xbf16>
    %98 = vector.shape_cast %97 : vector<1x32x32xbf16> to vector<32x32xbf16>
    %cst_52 = arith.constant dense<0.000000e+00> : vector<256x32xf32>
    %99 = tpu.matmul %96, %98, %cst_52 {dimension_numbers = #tpu.dot_dimension_numbers<[1], [0], [0], [1], [0, 0, 1, 1], [], []>} : vector<256x32xbf16>, vector<32x32xbf16>, vector<256x32xf32> -> vector<256x32xf32>
    %100 = arith.addf %92, %99 : vector<256x32xf32>
    %cst_53 = arith.constant 0.000000e+00 : f32
    %101 = vector.broadcast %cst_53 : f32 to vector<256x32xf32>
    %102 = arith.maximumf %100, %101 : vector<256x32xf32>
    %cst_54 = arith.constant 0.000000e+00 : f32
    %103 = vector.broadcast %cst_54 : f32 to vector<24x32xf32>
    %c0_55 = arith.constant 0 : index
    %c0_56 = arith.constant 0 : index
    %104 = vector.load %arg8[%c0_55, %c0_56] : memref<297x32xf32, #tpu.memory_space<vmem>>, vector<24x32xf32>
    tpu.vector_store %arg8[%c0_55, %c0_56], %103 {strides = array<i32>} : memref<297x32xf32, #tpu.memory_space<vmem>>, vector<24x32xf32>,
    %c24_57 = arith.constant 24 : index
    %c0_58 = arith.constant 0 : index
    %105 = vector.load %arg8[%c24_57, %c0_58] : memref<297x32xf32, #tpu.memory_space<vmem>>, vector<256x32xf32>
    tpu.vector_store %arg8[%c24_57, %c0_58], %102 {strides = array<i32>} : memref<297x32xf32, #tpu.memory_space<vmem>>, vector<256x32xf32>,
    %cst_59 = arith.constant 0.000000e+00 : f32
    %106 = vector.broadcast %cst_59 : f32 to vector<17x32xf32>
    %c280_60 = arith.constant 280 : index
    %c0_61 = arith.constant 0 : index
    %107 = vector.load %arg8[%c280_60, %c0_61] : memref<297x32xf32, #tpu.memory_space<vmem>>, vector<17x32xf32>
    tpu.vector_store %arg8[%c280_60, %c0_61], %106 {strides = array<i32>} : memref<297x32xf32, #tpu.memory_space<vmem>>, vector<17x32xf32>,
    %c0_62 = arith.constant 0 : index
    %c0_63 = arith.constant 0 : index
    %108 = vector.load %arg5[%c0_62, %c0_63] : memref<1x128xf32, #tpu.memory_space<vmem>>, vector<1x128xf32>
    %109 = vector.shape_cast %108 : vector<1x128xf32> to vector<1x128xf32>
    %110 = vector.broadcast %109 : vector<1x128xf32> to vector<256x128xf32>
    %c7_64 = arith.constant 7 : index
    %c0_65 = arith.constant 0 : index
    %111 = vector.load %arg8[%c7_64, %c0_65] : memref<297x32xf32, #tpu.memory_space<vmem>>, vector<256x32xf32>
    %112 = vector.broadcast %20 : vector<256x1xf32> to vector<256x32xf32>
    %113 = arith.mulf %111, %112 : vector<256x32xf32>
    %114 = arith.truncf %113 : vector<256x32xf32> to vector<256x32xbf16>
    %c0_66 = arith.constant 0 : index
    %c0_67 = arith.constant 0 : index
    %c0_68 = arith.constant 0 : index
    %115 = vector.load %arg4[%c0_66, %c0_67, %c0_68] : memref<9x32x128xbf16, #tpu.memory_space<vmem>>, vector<1x32x128xbf16>
    %116 = vector.shape_cast %115 : vector<1x32x128xbf16> to vector<32x128xbf16>
    %cst_69 = arith.constant dense<0.000000e+00> : vector<256x128xf32>
    %117 = tpu.matmul %114, %116, %cst_69 {dimension_numbers = #tpu.dot_dimension_numbers<[1], [0], [0], [1], [0, 0, 1, 1], [], []>} : vector<256x32xbf16>, vector<32x128xbf16>, vector<256x128xf32> -> vector<256x128xf32>
    %118 = arith.addf %110, %117 : vector<256x128xf32>
    %c8_70 = arith.constant 8 : index
    %c0_71 = arith.constant 0 : index
    %119 = vector.load %arg8[%c8_70, %c0_71] : memref<297x32xf32, #tpu.memory_space<vmem>>, vector<256x32xf32>
    %120 = arith.truncf %119 : vector<256x32xf32> to vector<256x32xbf16>
    %c1_72 = arith.constant 1 : index
    %c0_73 = arith.constant 0 : index
    %c0_74 = arith.constant 0 : index
    %121 = vector.load %arg4[%c1_72, %c0_73, %c0_74] : memref<9x32x128xbf16, #tpu.memory_space<vmem>>, vector<1x32x128xbf16>
    %122 = vector.shape_cast %121 : vector<1x32x128xbf16> to vector<32x128xbf16>
    %cst_75 = arith.constant dense<0.000000e+00> : vector<256x128xf32>
    %123 = tpu.matmul %120, %122, %cst_75 {dimension_numbers = #tpu.dot_dimension_numbers<[1], [0], [0], [1], [0, 0, 1, 1], [], []>} : vector<256x32xbf16>, vector<32x128xbf16>, vector<256x128xf32> -> vector<256x128xf32>
    %124 = arith.addf %118, %123 : vector<256x128xf32>
    %c9_76 = arith.constant 9 : index
    %c0_77 = arith.constant 0 : index
    %125 = vector.load %arg8[%c9_76, %c0_77] : memref<297x32xf32, #tpu.memory_space<vmem>>, vector<256x32xf32>
    %126 = vector.broadcast %24 : vector<256x1xf32> to vector<256x32xf32>
    %127 = arith.mulf %125, %126 : vector<256x32xf32>
    %128 = arith.truncf %127 : vector<256x32xf32> to vector<256x32xbf16>
    %c2_78 = arith.constant 2 : index
    %c0_79 = arith.constant 0 : index
    %c0_80 = arith.constant 0 : index
    %129 = vector.load %arg4[%c2_78, %c0_79, %c0_80] : memref<9x32x128xbf16, #tpu.memory_space<vmem>>, vector<1x32x128xbf16>
    %130 = vector.shape_cast %129 : vector<1x32x128xbf16> to vector<32x128xbf16>
    %cst_81 = arith.constant dense<0.000000e+00> : vector<256x128xf32>
    %131 = tpu.matmul %128, %130, %cst_81 {dimension_numbers = #tpu.dot_dimension_numbers<[1], [0], [0], [1], [0, 0, 1, 1], [], []>} : vector<256x32xbf16>, vector<32x128xbf16>, vector<256x128xf32> -> vector<256x128xf32>
    %132 = arith.addf %124, %131 : vector<256x128xf32>
    %c23_82 = arith.constant 23 : index
    %c0_83 = arith.constant 0 : index
    %133 = vector.load %arg8[%c23_82, %c0_83] : memref<297x32xf32, #tpu.memory_space<vmem>>, vector<256x32xf32>
    %134 = vector.broadcast %20 : vector<256x1xf32> to vector<256x32xf32>
    %135 = arith.mulf %133, %134 : vector<256x32xf32>
    %136 = arith.truncf %135 : vector<256x32xf32> to vector<256x32xbf16>
    %c3_84 = arith.constant 3 : index
    %c0_85 = arith.constant 0 : index
    %c0_86 = arith.constant 0 : index
    %137 = vector.load %arg4[%c3_84, %c0_85, %c0_86] : memref<9x32x128xbf16, #tpu.memory_space<vmem>>, vector<1x32x128xbf16>
    %138 = vector.shape_cast %137 : vector<1x32x128xbf16> to vector<32x128xbf16>
    %cst_87 = arith.constant dense<0.000000e+00> : vector<256x128xf32>
    %139 = tpu.matmul %136, %138, %cst_87 {dimension_numbers = #tpu.dot_dimension_numbers<[1], [0], [0], [1], [0, 0, 1, 1], [], []>} : vector<256x32xbf16>, vector<32x128xbf16>, vector<256x128xf32> -> vector<256x128xf32>
    %140 = arith.addf %132, %139 : vector<256x128xf32>
    %c24_88 = arith.constant 24 : index
    %c0_89 = arith.constant 0 : index
    %141 = vector.load %arg8[%c24_88, %c0_89] : memref<297x32xf32, #tpu.memory_space<vmem>>, vector<256x32xf32>
    %142 = arith.truncf %141 : vector<256x32xf32> to vector<256x32xbf16>
    %c4_90 = arith.constant 4 : index
    %c0_91 = arith.constant 0 : index
    %c0_92 = arith.constant 0 : index
    %143 = vector.load %arg4[%c4_90, %c0_91, %c0_92] : memref<9x32x128xbf16, #tpu.memory_space<vmem>>, vector<1x32x128xbf16>
    %144 = vector.shape_cast %143 : vector<1x32x128xbf16> to vector<32x128xbf16>
    %cst_93 = arith.constant dense<0.000000e+00> : vector<256x128xf32>
    %145 = tpu.matmul %142, %144, %cst_93 {dimension_numbers = #tpu.dot_dimension_numbers<[1], [0], [0], [1], [0, 0, 1, 1], [], []>} : vector<256x32xbf16>, vector<32x128xbf16>, vector<256x128xf32> -> vector<256x128xf32>
    %146 = arith.addf %140, %145 : vector<256x128xf32>
    %c25_94 = arith.constant 25 : index
    %c0_95 = arith.constant 0 : index
    %147 = vector.load %arg8[%c25_94, %c0_95] : memref<297x32xf32, #tpu.memory_space<vmem>>, vector<256x32xf32>
    %148 = vector.broadcast %24 : vector<256x1xf32> to vector<256x32xf32>
    %149 = arith.mulf %147, %148 : vector<256x32xf32>
    %150 = arith.truncf %149 : vector<256x32xf32> to vector<256x32xbf16>
    %c5_96 = arith.constant 5 : index
    %c0_97 = arith.constant 0 : index
    %c0_98 = arith.constant 0 : index
    %151 = vector.load %arg4[%c5_96, %c0_97, %c0_98] : memref<9x32x128xbf16, #tpu.memory_space<vmem>>, vector<1x32x128xbf16>
    %152 = vector.shape_cast %151 : vector<1x32x128xbf16> to vector<32x128xbf16>
    %cst_99 = arith.constant dense<0.000000e+00> : vector<256x128xf32>
    %153 = tpu.matmul %150, %152, %cst_99 {dimension_numbers = #tpu.dot_dimension_numbers<[1], [0], [0], [1], [0, 0, 1, 1], [], []>} : vector<256x32xbf16>, vector<32x128xbf16>, vector<256x128xf32> -> vector<256x128xf32>
    %154 = arith.addf %146, %153 : vector<256x128xf32>
    %c39_100 = arith.constant 39 : index
    %c0_101 = arith.constant 0 : index
    %155 = vector.load %arg8[%c39_100, %c0_101] : memref<297x32xf32, #tpu.memory_space<vmem>>, vector<256x32xf32>
    %156 = vector.broadcast %20 : vector<256x1xf32> to vector<256x32xf32>
    %157 = arith.mulf %155, %156 : vector<256x32xf32>
    %158 = arith.truncf %157 : vector<256x32xf32> to vector<256x32xbf16>
    %c6_102 = arith.constant 6 : index
    %c0_103 = arith.constant 0 : index
    %c0_104 = arith.constant 0 : index
    %159 = vector.load %arg4[%c6_102, %c0_103, %c0_104] : memref<9x32x128xbf16, #tpu.memory_space<vmem>>, vector<1x32x128xbf16>
    %160 = vector.shape_cast %159 : vector<1x32x128xbf16> to vector<32x128xbf16>
    %cst_105 = arith.constant dense<0.000000e+00> : vector<256x128xf32>
    %161 = tpu.matmul %158, %160, %cst_105 {dimension_numbers = #tpu.dot_dimension_numbers<[1], [0], [0], [1], [0, 0, 1, 1], [], []>} : vector<256x32xbf16>, vector<32x128xbf16>, vector<256x128xf32> -> vector<256x128xf32>
    %162 = arith.addf %154, %161 : vector<256x128xf32>
    %c40_106 = arith.constant 40 : index
    %c0_107 = arith.constant 0 : index
    %163 = vector.load %arg8[%c40_106, %c0_107] : memref<297x32xf32, #tpu.memory_space<vmem>>, vector<256x32xf32>
    %164 = arith.truncf %163 : vector<256x32xf32> to vector<256x32xbf16>
    %c7_108 = arith.constant 7 : index
    %c0_109 = arith.constant 0 : index
    %c0_110 = arith.constant 0 : index
    %165 = vector.load %arg4[%c7_108, %c0_109, %c0_110] : memref<9x32x128xbf16, #tpu.memory_space<vmem>>, vector<1x32x128xbf16>
    %166 = vector.shape_cast %165 : vector<1x32x128xbf16> to vector<32x128xbf16>
    %cst_111 = arith.constant dense<0.000000e+00> : vector<256x128xf32>
    %167 = tpu.matmul %164, %166, %cst_111 {dimension_numbers = #tpu.dot_dimension_numbers<[1], [0], [0], [1], [0, 0, 1, 1], [], []>} : vector<256x32xbf16>, vector<32x128xbf16>, vector<256x128xf32> -> vector<256x128xf32>
    %168 = arith.addf %162, %167 : vector<256x128xf32>
    %c41_112 = arith.constant 41 : index
    %c0_113 = arith.constant 0 : index
    %169 = vector.load %arg8[%c41_112, %c0_113] : memref<297x32xf32, #tpu.memory_space<vmem>>, vector<256x32xf32>
    %170 = vector.broadcast %24 : vector<256x1xf32> to vector<256x32xf32>
    %171 = arith.mulf %169, %170 : vector<256x32xf32>
    %172 = arith.truncf %171 : vector<256x32xf32> to vector<256x32xbf16>
    %c8_114 = arith.constant 8 : index
    %c0_115 = arith.constant 0 : index
    %c0_116 = arith.constant 0 : index
    %173 = vector.load %arg4[%c8_114, %c0_115, %c0_116] : memref<9x32x128xbf16, #tpu.memory_space<vmem>>, vector<1x32x128xbf16>
    %174 = vector.shape_cast %173 : vector<1x32x128xbf16> to vector<32x128xbf16>
    %cst_117 = arith.constant dense<0.000000e+00> : vector<256x128xf32>
    %175 = tpu.matmul %172, %174, %cst_117 {dimension_numbers = #tpu.dot_dimension_numbers<[1], [0], [0], [1], [0, 0, 1, 1], [], []>} : vector<256x32xbf16>, vector<32x128xbf16>, vector<256x128xf32> -> vector<256x128xf32>
    %176 = arith.addf %168, %175 : vector<256x128xf32>
    %cst_118 = arith.constant 0.000000e+00 : f32
    %177 = vector.broadcast %cst_118 : f32 to vector<256x96xf32>
    %178 = tpu.concatenate %26, %177 in 1 : vector<256x32xf32>, vector<256x96xf32> -> vector<256x128xf32>
    %179 = arith.addf %176, %178 : vector<256x128xf32>
    %cst_119 = arith.constant 0.000000e+00 : f32
    %180 = vector.broadcast %cst_119 : f32 to vector<256x128xf32>
    %181 = arith.maximumf %179, %180 : vector<256x128xf32>
    %c0_120 = arith.constant 0 : index
    %c0_121 = arith.constant 0 : index
    %c0_122 = arith.constant 0 : index
    %182 = vector.load %arg6[%c0_120, %c0_121, %c0_122] : memref<1x256x128xf32, #tpu.memory_space<vmem>>, vector<1x256x128xf32>
    %183 = vector.shape_cast %182 : vector<1x256x128xf32> to vector<256x128xf32>
    %184 = vector.shape_cast %181 : vector<256x128xf32> to vector<1x256x128xf32>
    tpu.vector_store %arg6[%c0_120, %c0_121, %c0_122], %184 {strides = array<i32>} : memref<1x256x128xf32, #tpu.memory_space<vmem>>, vector<1x256x128xf32>,
    return
  }
  func.func @transform_0(%arg0: i32) -> (i32, i32, i32) {
    %c0_i32 = arith.constant 0 : i32
    %c0_i32_0 = arith.constant 0 : i32
    %c0_i32_1 = arith.constant 0 : i32
    return %arg0, %c0_i32, %c0_i32_0 : i32, i32, i32
  }
  func.func @transform_1(%arg0: i32) -> (i32, i32, i32) {
    %c0_i32 = arith.constant 0 : i32
    %c0_i32_0 = arith.constant 0 : i32
    %c0_i32_1 = arith.constant 0 : i32
    %c0_i32_2 = arith.constant 0 : i32
    return %c0_i32, %c0_i32_0, %c0_i32_1 : i32, i32, i32
  }
  func.func @transform_2(%arg0: i32) -> (i32, i32) {
    %c0_i32 = arith.constant 0 : i32
    %c0_i32_0 = arith.constant 0 : i32
    %c0_i32_1 = arith.constant 0 : i32
    return %c0_i32, %c0_i32_0 : i32, i32
  }
  func.func @transform_3(%arg0: i32) -> (i32, i32, i32) {
    %c0_i32 = arith.constant 0 : i32
    %c0_i32_0 = arith.constant 0 : i32
    %c0_i32_1 = arith.constant 0 : i32
    %c0_i32_2 = arith.constant 0 : i32
    return %c0_i32, %c0_i32_0, %c0_i32_1 : i32, i32, i32
  }
  func.func @transform_4(%arg0: i32) -> (i32, i32) {
    %c0_i32 = arith.constant 0 : i32
    %c0_i32_0 = arith.constant 0 : i32
    %c0_i32_1 = arith.constant 0 : i32
    return %c0_i32, %c0_i32_0 : i32, i32
  }
  func.func @transform_5(%arg0: i32) -> (i32, i32, i32) {
    %c0_i32 = arith.constant 0 : i32
    %c0_i32_0 = arith.constant 0 : i32
    %c0_i32_1 = arith.constant 0 : i32
    return %arg0, %c0_i32, %c0_i32_0 : i32, i32, i32
  }
}

</mosaic_0001>

<bundles_post_ra>
// kernel: tpu_custom_call.1
= control target key start
LH: loop header
LB: loop body
LE: loop exit
PB: predicated region body
PF: predicated region fallthrough
CT: control target
= control target key end

     0   :  { %10 = vsyncpa [#allocation5], 0  ;;  %s8833_s0 = inlined_call_operand.vmem [shape: f32[2,256,32], index: 0, kind: input, shape index: {}]   ;;  %s8834_s1 = inlined_call_operand.vmem [shape: bf16[9,32,32], index: 1, kind: input, shape index: {}]   ;;  %s8835_s2 = inlined_call_operand.vmem [shape: f32[1,32], index: 2, kind: input, shape index: {}]   ;;  %s8836_s3 = inlined_call_operand.vmem [shape: bf16[9,32,128], index: 3, kind: input, shape index: {}]   ;;  %s8837_s4 = inlined_call_operand.vmem [shape: f32[1,128], index: 4, kind: input, shape index: {}]   ;;  %s8838_s5 = inlined_call_operand.hbm [shape: f32[2,256,128], index: 5, kind: output, shape index: {}]  }
   0x1   :  { %12 = vsyncpa [#allocation5 + $0x1], 0  ;;  %s6536_s18 = smov 0   ;;  %s6538_s19 = smov 0  }
   0x2   :  { %s6540_s20 = smov 0   ;;  %s6542_s21 = smov 0  }
   0x3 LB: > { %s6557_s22 = sadd.s32 4294967295, %s6501_s21   ;;  %s5783_s23 = sadd.s32 4294967294, %s6501_s21   ;;  %s6501_s21 = sphi %s6542_s21, %s9321_s21   ;;  %s6497_s20 = sphi %s6540_s20, %s9320_s20   ;;  %s6493_s19 = sphi %s6538_s19, %s9319_s19   ;;  %s6489_s18 = sphi %s6536_s18, %s9318_s18  }
   0x4   : > { %s6561_s24 = sadd.s32 1, %s6501_s21   ;;  %s135_s25 = sadd.s32 1, %s6497_s20 }
   0x5   : > { %s132_s26 = ssub.s32 %s6501_s21, %s6561_s24  ;;  %p145_p0 = scmp.ne.s32.totalorder %s6497_s20, %s6493_s19 }
   0x6   : > { %p133_p1 = scmp.eq.s32.totalorder %s132_s26, 0  ;;  %p146_p2 = scmp.eq.s32.totalorder %s6557_s22, 1 }
   0x7   : > { %p151_p3 = scmp.ne.s32.totalorder %s6493_s19, %s6489_s18  ;;  %p152_p4 = scmp.eq.s32.totalorder %s5783_s23, 1 }
   0x8   : > { %s6572_s27 = scalar_select %p133_p1, %s6497_s20, %s135_s25  }
   0x9   : > { %p6574_p5 = por %p146_p2, %p145_p0  ;;  %p6578_p6 = por %p152_p4, %p151_p3 }
   0xa   : > { %p5786_p7 = scmp.ge.s32.totalorder %s6501_s21, 1  ;;  %p190_p8 = scmp.lt.s32.totalorder %s6501_s21, 3 }
   0xc   : > { %p191_p9 = pnand %p5786_p7, %p190_p8 }
   0xe   : > { %194 = sbr.rel (%p191_p9) target bundleno = 1472 (0x5c0), region = 40 }
  0x13   : > { %v6325_v0 = vld [vmem:[%s8834_s1 + $0x8] sm:$0xff]  ;;  %v6327_v1 = vld [vmem:[%s8834_s1 + $0x18] sm:$0xff]  ;;  %v224_v2 = vlaneseq  ;;  %vm865_vm0 = vcmask 261120   ;;  %p218_p10 = scmp.lt.s32.totalorder %s6557_s22, 1  ;;  %v6324_v3 = vld [vmem:[%s8834_s1] sm:$0xff]  ;;  %v8839_v4 = vmov 0.0  }
  0x14   : > { %866 = vst.msk [vmem:[#allocation2] sm:$0xff] %vm865_vm0, %v8839_v4  ;;  %1059 = vmatpush.bf16.msra.mxu0 %v6325_v0  ;;  %6363 = vmatpush.bf16.msra.mxu3 %v6327_v1  ;;  %v6326_v6 = vld [vmem:[%s8834_s1 + $0x10] sm:$0xff]  ;;  %v6329_v8 = vld [vmem:[%s8834_s1 + $0x28] sm:$0xff]  ;;  %v6331_v9 = vld [vmem:[%s8834_s1 + $0x38] sm:$0xff]  ;;  %s215_s7 = sand.u32 1, %s6493_s19   ;;  %s6360_s10 = sshll.u32 %s6557_s22, 8 }
  0x15   : > { %v6596_v5 = vshrl.u32 %v224_v2, 7  ;;  %867 = vst.msk [vmem:[#allocation2 + $0x8] sm:$0xff] %vm865_vm0, %v8839_v4  ;;  %s219_s13 = scalar_select %p218_p10, %s6557_s22, 1  ;;  %6361 = vmatpush.bf16.msra.mxu2 %v6325_v0  ;;  %1293 = vmatpush.bf16.msra.mxu1 %v6327_v1  ;;  %v6333_v10 = vld [vmem:[%s8834_s1 + $0x48] sm:$0xff] }
  0x16   : > { %868 = vst.msk [vmem:[#allocation2 + $0x10] sm:$0xff] %vm865_vm0, %v8839_v4  ;;  %s5787_s8 = sshll.u32 %s215_s7, 8  ;;  %s5706_s22 = scalar_lea.sflag [#allocation5], %s215_s7 }
  0x17   : > { %v261_v7 = vand.u32 15, %v6596_v5  ;;  %901 = vst.msk [vmem:[#allocation2 + $0x118] sm:$0xff] %vm865_vm0, %v8839_v4  ;;  %s6323_s14 = sshll.u32 %s219_s13, 8  ;;  %v241_v12 = vadd.s32 128, %v6596_v5  ;;  %v227_v14 = vadd.s32 16, %v6596_v5  ;;  %v243_v38 = vadd.s32 144, %v6596_v5  ;;  %s5717_s13 = scalar_lea.hbm %s8838_s5, %s6360_s10 }
  0x18   : > { %902 = vst.msk [vmem:[#allocation2 + $0x120] sm:$0xff] %vm865_vm0, %v8839_v4  ;;  %s6620_s30 = scalar_lea.vmem %s8833_s0, %s6323_s14  ;;  %1060 = vmatpush.bf16.msra.mxu0 %v6324_v3  ;;  %6364 = vmatpush.bf16.msra.mxu3 %v6326_v6  ;;  %v229_v51 = vadd.s32 32, %v6596_v5  ;;  %s8646_s9 = scalar_lea.vmem [#allocation4], %s5787_s8 }
  0x19   : > { %vm641_vm1 = vcmp.gt.s32.totalorder %v261_v7, 0  ;;  %3238 = vst.msk [vmem:[#allocation3] sm:$0xff] %vm865_vm0, %v8839_v4  ;;  %6362 = vmatpush.bf16.msra.mxu2 %v6324_v3  ;;  %1294 = vmatpush.bf16.msra.mxu1 %v6326_v6  ;;  %v6636_v13 = vld [vmem:[%s6620_s30 + $0x70] sm:$0xff]  ;;  %v6642_v16 = vld [vmem:[%s6620_s30 + $0x78] sm:$0xff]  ;;  %v6648_v20 = vld [vmem:[%s6620_s30 + $0x68] sm:$0xff]  ;;  %v373_v22 = vand.u32 15, %v241_v12 }
  0x1a   : > { %v6628_v11 = vsel %vm641_vm1, 1.0, %v8839_v4  ;;  %3239 = vst.msk [vmem:[#allocation3 + $0x8] sm:$0xff] %vm865_vm0, %v8839_v4  ;;  %v6653_v24 = vld [vmem:[%s6620_s30] sm:$0xff]  ;;  %v275_v26 = vand.u32 15, %v227_v14  ;;  %v6658_v27 = vld [vmem:[%s6620_s30 + $0x8] sm:$0xff]  ;;  %v6675_v30 = vld [vmem:[%s6620_s30 + $0x10] sm:$0xff] }
  0x1b   : > { %8979 = vst [vmem:[#allocation7_spill] sm:$0xff] %v6628_v11  ;;  %v6664_v28 = vld [vmem:[%s6620_s30 + $0x80] sm:$0xff]  ;;  %v6670_v29 = vld [vmem:[%s6620_s30 + $0x88] sm:$0xff]  ;;  %vm657_vm2 = vcmp.gt.s32.totalorder %v373_v22, 0  ;;  %v6680_v31 = vld [vmem:[%s6620_s30 + $0x18] sm:$0xff]  ;;  %v387_v50 = vand.u32 15, %v243_v38 }
  0x1c   : > { %3240 = vst.msk [vmem:[#allocation3 + $0x10] sm:$0xff] %vm865_vm0, %v8839_v4  ;;  %1825 = vmatpush.bf16.msrb.mxu3 %v6331_v9  ;;  %v909_v15 = vld [vmem:[#allocation2 + $0x7] sm:$0xff]  ;;  %2059 = vmatpush.bf16.msrb.mxu0 %v6333_v10  ;;  %vm643_vm3 = vcmp.gt.s32.totalorder %v275_v26, 0  ;;  %v6685_v32 = vld [vmem:[%s6620_s30 + $0x90] sm:$0xff]  ;;  %v6688_v34 = vsel %vm657_vm2, 1.0, %v8839_v4  ;;  %v6693_v35 = vld [vmem:[%s6620_s30 + $0x98] sm:$0xff] }
  0x1d   : > { %8980 = vst [vmem:[#allocation8_spill] sm:$0xff] %v6636_v13  ;;  %1559 = vmatpush.bf16.msrb.mxu2 %v6329_v8  ;;  %v1174_v17 = vld [vmem:[#allocation2 + $0x8] sm:$0xff]  ;;  %v941_v19 = vmul.f32 %v6628_v11, %v909_v15  ;;  %v1175_v21 = vld [vmem:[#allocation2 + $0x10] sm:$0xff]  ;;  %v6696_v37 = vsel %vm643_vm3, 1.0, %v8839_v4  ;;  %v6712_v47 = vld [vmem:[%s6620_s30 + $0x20] sm:$0xff]  ;;  %vm659_vm4 = vcmp.gt.s32.totalorder %v387_v50, 0 }
  0x1e   : > { %3273 = vst.msk [vmem:[#allocation3 + $0x118] sm:$0xff] %vm865_vm0, %v8839_v4  ;;  %v910_v18 = vld [vmem:[#allocation2 + $0xf] sm:$0xff]  ;;  %v1206_v23 = vpack.c.bf16 %v1175_v21, %v1174_v17  ;;  %v289_v55 = vand.u32 15, %v229_v51  ;;  %v6729_v56 = vld [vmem:[%s6620_s30 + $0xa0] sm:$0xff]  ;;  %v6740_v58 = vsel %vm659_vm4, 1.0, %v8839_v4  ;;  %v245_v3 = vadd.s32 160, %v6596_v5 }
  0x1f   : > { %8981 = vst [vmem:[#allocation9_spill] sm:$0xff] %v6642_v16  ;;  %v973_v25 = vpack.c.bf16 %v910_v18, %v941_v19  ;;  %v6720_v52 = vld [vmem:[%s6620_s30 + $0x28] sm:$0xff]  ;;  %v6755_v10 = vld [vmem:[%s6620_s30 + $0x30] sm:$0xff]  ;;  %v231_v15 = vadd.s32 48, %v6596_v5  ;;  %v6763_v17 = vld [vmem:[%s6620_s30 + $0x38] sm:$0xff]  ;;  %s5718_s14 = sshll.u32 %s8646_s9, 4  ;;  %s5719_s14 = int_to_ptr.vmem [resolvable:$true] %s5718_s14 }
  0x20   : > { %3274 = vst.msk [vmem:[#allocation3 + $0x120] sm:$0xff] %vm865_vm0, %v8839_v4  ;;  %5858 = vmatmul.msk.bf16.vlgmr.msra.gmra.mxu1 %vm865_vm0, %v1206_v23  ;;  %v6734_v57 = vld [vmem:[%s6620_s30 + $0xa8] sm:$0xff]  ;;  %vm645_vm5 = vcmp.gt.s32.totalorder %v289_v55, 0  ;;  %v401_v14 = vand.u32 15, %v245_v3  ;;  %v6772_v22 = vld [vmem:[%s6620_s30 + $0xb0] sm:$0xff]  ;;  %v6775_v23 = vld [vmem:[%s6620_s30 + $0xb8] sm:$0xff] }
  0x21   : > { %8982 = vst [vmem:[#allocation10_spill] sm:$0xff] %v6648_v20  ;;  %5830 = vmatmul.msk.bf16.vlgmr.msra.gmra.mxu0 %vm865_vm0, %v973_v25  ;;  %v6746_v1 = vsel %vm645_vm5, 1.0, %v8839_v4  ;;  %v303_v21 = vand.u32 15, %v231_v15  ;;  %v6798_v51 = vld [vmem:[%s6620_s30 + $0x40] sm:$0xff]  ;;  %s5720_s15 = sshll.u32 %s5717_s13, 4  ;;  %s6459_s25 = scalar_lea.hbm %s8838_s5, 512  ;;  %s5721_s15 = int_to_ptr.hbm [resolvable:$true] %s5720_s15 }
  0x22   : > { %883 = vst.msk [vmem:[#allocation2 + $0x88] sm:$0xff] %vm865_vm0, %v6636_v13  ;;  %vm661_vm6 = vcmp.gt.s32.totalorder %v401_v14, 0  ;;  %v6332_v14 = vld [vmem:[%s8834_s1 + $0x40] sm:$0xff]  ;;  %s6453_s16 = sshra.s32 %s5721_s15, 4  ;;  %s6454_s16 = int_to_ptr.hbm [resolvable:$true] %s6453_s16 }
  0x23   : > { %8983 = vst [vmem:[#allocation11_spill] sm:$0xff] %v6653_v24  ;;  %v6783_v25 = vsel %vm661_vm6, 1.0, %v8839_v4  ;;  %vm647_vm7 = vcmp.gt.s32.totalorder %v303_v21, 0  ;;  %2060 = vmatpush.bf16.msrb.mxu0 %v6332_v14  ;;  %v6870_v14 = vld [vmem:[%s6620_s30 + $0xd8] sm:$0xff]  ;;  %s6455_s17 = scalar_lea.hbm %s6454_s16, 256  ;;  %p6460_p0 = scmp.lt.s32.totalorder %s6454_s16, %s8838_s5 }
  0x24   : > { %884 = vst.msk [vmem:[#allocation2 + $0x90] sm:$0xff] %vm865_vm0, %v6642_v16  ;;  %p6456_p11 = scmp.ne.s32.totalorder %s6454_s16, %s6455_s17  ;;  %p6461_p1 = scmp.lt.s32.totalorder %s6459_s25, %s6455_s17 }
  0x25   : > { %8984 = vst [vmem:[#allocation12_spill] sm:$0xff] %v6658_v27 }
  0x26   : > { %882 = vst.msk [vmem:[#allocation2 + $0x80] sm:$0xff] %vm865_vm0, %v6648_v20  ;;  %p6457_p12 = pnand %p6456_p11, %p6574_p5  ;;  %p6462_p2 = por %p6461_p1, %p6460_p0 }
  0x27   : > { %8985 = vst [vmem:[#allocation13_spill] sm:$0xff] %v6664_v28 }
  0x28   : > { %869 = vst.msk [vmem:[#allocation2 + $0x18] sm:$0xff] %vm865_vm0, %v6653_v24  ;;  %p6458_p13 = pneg %p6457_p12 }
  0x29   : > { %8986 = vst [vmem:[#allocation14_spill] sm:$0xff] %v6670_v29  ;;  %v1190_v33 = vld [vmem:[#allocation2 + $0x88] sm:$0xff] }
  0x2a   : > { %870 = vst.msk [vmem:[#allocation2 + $0x20] sm:$0xff] %vm865_vm0, %v6658_v27  ;;  %p6463_p3 = pnand %p6462_p2, %p6458_p13 }
  0x2b   : > { %8987 = vst [vmem:[#allocation15_spill] sm:$0xff] %v6675_v30  ;;  %v1191_v36 = vld [vmem:[#allocation2 + $0x90] sm:$0xff] }
  0x2c   : > { %885 = vst.msk [vmem:[#allocation2 + $0x98] sm:$0xff] %vm865_vm0, %v6664_v28  ;;  %v1214_v39 = vpack.c.bf16 %v1191_v36, %v1190_v33  ;;  %v926_v41 = vld [vmem:[#allocation2 + $0x8f] sm:$0xff] }
  0x2d   : > { %8988 = vst [vmem:[#allocation16_spill] sm:$0xff] %v6680_v31  ;;  %v925_v40 = vld [vmem:[#allocation2 + $0x87] sm:$0xff] }
  0x2e   : > { %886 = vst.msk [vmem:[#allocation2 + $0xa0] sm:$0xff] %vm865_vm0, %v6670_v29  ;;  %v957_v42 = vmul.f32 %v6688_v34, %v925_v40  ;;  %5866 = vmatmul.msk.bf16.vlgmr.msra.gmra.mxu3 %vm865_vm0, %v1214_v39  ;;  %v1189_v28 = vld [vmem:[#allocation2 + $0x80] sm:$0xff] }
  0x2f   : > { %8989 = vst [vmem:[#allocation17_spill] sm:$0xff] %v6685_v32  ;;  %v6704_v43 = vld [vmem:[#allocation2 + $0x17] sm:$0xff] }
  0x30   : > { %8990 = vst [vmem:[#allocation18_spill] sm:$0xff] %v6688_v34  ;;  %v943_v44 = vmul.f32 %v6696_v37, %v6704_v43  ;;  %v1176_v45 = vld [vmem:[#allocation2 + $0x18] sm:$0xff]  ;;  %v981_v48 = vpack.c.bf16 %v926_v41, %v957_v42  ;;  %v6789_v41 = vsel %vm647_vm7, 1.0, %v8839_v4 }
  0x31   : > { %871 = vst.msk [vmem:[#allocation2 + $0x28] sm:$0xff] %vm865_vm0, %v6675_v30  ;;  %v1177_v46 = vld [vmem:[#allocation2 + $0x20] sm:$0xff] }
  0x32   : > { %8991 = vst [vmem:[#allocation19_spill] sm:$0xff] %v6693_v35  ;;  %v6714_v49 = vld [vmem:[#allocation2 + $0x1f] sm:$0xff]  ;;  %5838 = vmatmul.msk.bf16.vlgmr.msra.gmra.mxu2 %vm865_vm0, %v981_v48  ;;  %v6723_v53 = vpack.c.bf16 %v1177_v46, %v1176_v45 }
  0x33   : > { %8992 = vst [vmem:[#allocation20_spill] sm:$0xff] %v6696_v37  ;;  %v974_v54 = vpack.c.bf16 %v6714_v49, %v943_v44  ;;  %v927_v59 = vld [vmem:[#allocation2 + $0x97] sm:$0xff]  ;;  %v247_v44 = vadd.s32 176, %v6596_v5 }
  0x34   : > { %872 = vst.msk [vmem:[#allocation2 + $0x30] sm:$0xff] %vm865_vm0, %v6680_v31  ;;  %5859 = vmatmul.msk.bf16.gmra.mxu1 %vm865_vm0, %v6723_v53  ;;  %v1192_v60 = vld [vmem:[#allocation2 + $0x98] sm:$0xff]  ;;  %v959_v62 = vmul.f32 %v6740_v58, %v927_v59  ;;  %v233_v59 = vadd.s32 64, %v6596_v5 }
  0x35   : > { %887 = vst.msk [vmem:[#allocation2 + $0xa8] sm:$0xff] %vm865_vm0, %v6685_v32  ;;  %5831 = vmatmul.msk.bf16.gmra.mxu0 %vm865_vm0, %v974_v54  ;;  %v1193_v61 = vld [vmem:[#allocation2 + $0xa0] sm:$0xff]  ;;  %v415_v55 = vand.u32 15, %v247_v44 }
  0x36   : > { %888 = vst.msk [vmem:[#allocation2 + $0xb0] sm:$0xff] %vm865_vm0, %v6693_v35  ;;  %v1215_v63 = vpack.c.bf16 %v1193_v61, %v1192_v60  ;;  %v928_v0 = vld [vmem:[#allocation2 + $0x9f] sm:$0xff]  ;;  %v6806_v60 = vld [vmem:[%s6620_s30 + $0x48] sm:$0xff]  ;;  %v317_v3 = vand.u32 15, %v233_v59  ;;  %v235_v59 = vadd.s32 80, %v6596_v5 }
  0x37   : > { %8993 = vst [vmem:[#allocation21_spill] sm:$0xff] %v6712_v47  ;;  %v982_v6 = vpack.c.bf16 %v928_v0, %v959_v62  ;;  %v6328_v62 = vld [vmem:[%s8834_s1 + $0x20] sm:$0xff]  ;;  %vm663_vm8 = vcmp.gt.s32.totalorder %v415_v55, 0 }
  0x38   : > { %873 = vst.msk [vmem:[#allocation2 + $0x38] sm:$0xff] %vm865_vm0, %v6712_v47  ;;  %v6748_v2 = vld [vmem:[#allocation2 + $0x27] sm:$0xff]  ;;  %1560 = vmatpush.bf16.msrb.mxu2 %v6328_v62  ;;  %vm649_vm9 = vcmp.gt.s32.totalorder %v317_v3, 0  ;;  %v6858_v62 = vld [vmem:[%s6620_s30 + $0x58] sm:$0xff]  ;;  %v331_v3 = vand.u32 15, %v235_v59 }
  0x39   : > { %8994 = vst [vmem:[#allocation22_spill] sm:$0xff] %v6720_v52  ;;  %v945_v7 = vmul.f32 %v6746_v1, %v6748_v2  ;;  %v1178_v8 = vld [vmem:[#allocation2 + $0x28] sm:$0xff] }
  0x3a   : > { %874 = vst.msk [vmem:[#allocation2 + $0x40] sm:$0xff] %vm865_vm0, %v6720_v52  ;;  %vm651_vm11 = vcmp.gt.s32.totalorder %v331_v3, 0  ;;  %v2175_v13 = vld [vmem:[#allocation2 + $0x21] sm:$0xff] }
  0x3b   : > { %8995 = vst [vmem:[#allocation23_spill] sm:$0xff] %v6729_v56  ;;  %v1179_v9 = vld [vmem:[#allocation2 + $0x30] sm:$0xff] }
  0x3c   : > { %8996 = vst [vmem:[#allocation24_spill] sm:$0xff] %v6734_v57  ;;  %v6757_v12 = vld [vmem:[#allocation2 + $0x2f] sm:$0xff]  ;;  %v6766_v18 = vpack.c.bf16 %v1179_v9, %v1178_v8  ;;  %v929_v26 = vld [vmem:[#allocation2 + $0xa7] sm:$0xff]  ;;  %v6832_v8 = vsel %vm663_vm8, 1.0, %v8839_v4 }
  0x3d   : > { %889 = vst.msk [vmem:[#allocation2 + $0xb8] sm:$0xff] %vm865_vm0, %v6729_v56  ;;  %v975_v19 = vpack.c.bf16 %v6757_v12, %v945_v7  ;;  %v1194_v33 = vld [vmem:[#allocation2 + $0xa8] sm:$0xff]  ;;  %v1195_v36 = vld [vmem:[#allocation2 + $0xb0] sm:$0xff]  ;;  %v961_v38 = vmul.f32 %v6783_v25, %v929_v26 }
  0x3e   : > { %8997 = vst [vmem:[#allocation25_spill] sm:$0xff] %v6740_v58  ;;  %5867 = vmatmul.msk.bf16.gmra.mxu3 %vm865_vm0, %v1215_v63  ;;  %v1216_v39 = vpack.c.bf16 %v1195_v36, %v1194_v33  ;;  %v930_v40 = vld [vmem:[#allocation2 + $0xaf] sm:$0xff]  ;;  %v6841_v36 = vsel %vm649_vm9, 1.0, %v8839_v4 }
  0x3f   : > { %890 = vst.msk [vmem:[#allocation2 + $0xc0] sm:$0xff] %vm865_vm0, %v6734_v57  ;;  %v6791_v42 = vld [vmem:[#allocation2 + $0x37] sm:$0xff]  ;;  %v983_v45 = vpack.c.bf16 %v930_v40, %v961_v38  ;;  %v6824_v7 = vld [vmem:[%s6620_s30 + $0xc8] sm:$0xff] }
  0x40   : > { %8998 = vst [vmem:[#allocation26_spill] sm:$0xff] %v6746_v1  ;;  %v947_v46 = vmul.f32 %v6789_v41, %v6791_v42  ;;  %v1180_v48 = vld [vmem:[#allocation2 + $0x38] sm:$0xff]  ;;  %v6330_v63 = vld [vmem:[%s8834_s1 + $0x30] sm:$0xff] }
  0x41   : > { %8999 = vst [vmem:[#allocation27_spill] sm:$0xff] %v6755_v10  ;;  %v1181_v50 = vld [vmem:[#allocation2 + $0x40] sm:$0xff]  ;;  %1826 = vmatpush.bf16.msrb.mxu3 %v6330_v63 }
  0x42   : > { %875 = vst.msk [vmem:[#allocation2 + $0x48] sm:$0xff] %vm865_vm0, %v6755_v10  ;;  %5839 = vmatmul.msk.bf16.gmra.mxu2 %vm865_vm0, %v982_v6  ;;  %v6800_v54 = vld [vmem:[#allocation2 + $0x3f] sm:$0xff]  ;;  %v6809_v61 = vpack.c.bf16 %v1181_v50, %v1180_v48  ;;  %v6850_v48 = vld [vmem:[%s6620_s30 + $0x50] sm:$0xff] }
  0x43   : > { %9000 = vst [vmem:[#allocation28_spill] sm:$0xff] %v6763_v17  ;;  %v976_v0 = vpack.c.bf16 %v6800_v54, %v947_v46  ;;  %v6821_v6 = vld [vmem:[%s6620_s30 + $0xc0] sm:$0xff] }
  0x44   : > { %876 = vst.msk [vmem:[#allocation2 + $0x50] sm:$0xff] %vm865_vm0, %v6763_v17  ;;  %5860 = vmatmul.msk.bf16.gmra.mxu1 %vm865_vm0, %v6766_v18  ;;  %v931_v9 = vld [vmem:[#allocation2 + $0xb7] sm:$0xff] }
  0x45   : > { %9001 = vst [vmem:[#allocation29_spill] sm:$0xff] %v6772_v22  ;;  %5832 = vmatmul.msk.bf16.gmra.mxu0 %vm865_vm0, %v975_v19  ;;  %v1196_v15 = vld [vmem:[#allocation2 + $0xb8] sm:$0xff]  ;;  %v963_v21 = vmul.f32 %v6832_v8, %v931_v9  ;;  %v6867_v9 = vld [vmem:[%s6620_s30 + $0xd0] sm:$0xff] }
  0x46   : > { %9002 = vst [vmem:[#allocation30_spill] sm:$0xff] %v6775_v23  ;;  %v1197_v19 = vld [vmem:[#allocation2 + $0xc0] sm:$0xff] }
  0x47   : > { %891 = vst.msk [vmem:[#allocation2 + $0xc8] sm:$0xff] %vm865_vm0, %v6772_v22  ;;  %v1217_v26 = vpack.c.bf16 %v1197_v19, %v1196_v15  ;;  %v932_v33 = vld [vmem:[#allocation2 + $0xbf] sm:$0xff] }
  0x48   : > { %9003 = vst [vmem:[#allocation31_spill] sm:$0xff] %v6783_v25  ;;  %v984_v40 = vpack.c.bf16 %v932_v33, %v963_v21 }
  0x49   : > { %892 = vst.msk [vmem:[#allocation2 + $0xd0] sm:$0xff] %vm865_vm0, %v6775_v23  ;;  %v6843_v38 = vld [vmem:[#allocation2 + $0x47] sm:$0xff] }
  0x4a   : > { %9004 = vst [vmem:[#allocation32_spill] sm:$0xff] %v6789_v41  ;;  %v949_v44 = vmul.f32 %v6841_v36, %v6843_v38  ;;  %v2179_v47 = vld [vmem:[#allocation2 + $0x41] sm:$0xff] }
  0x4b   : > { %9005 = vst [vmem:[#allocation33_spill] sm:$0xff] %v6798_v51  ;;  %v1183_v46 = vld [vmem:[#allocation2 + $0x50] sm:$0xff] }
  0x4c   : > { %877 = vst.msk [vmem:[#allocation2 + $0x58] sm:$0xff] %vm865_vm0, %v6798_v51  ;;  %v6852_v50 = vld [vmem:[#allocation2 + $0x4f] sm:$0xff] }
  0x4d   : > { %9006 = vst [vmem:[#allocation34_spill] sm:$0xff] %v6806_v60 }
  0x4e   : > { %5868 = vmatmul.msk.bf16.gmra.mxu3 %vm865_vm0, %v1216_v39  ;;  %878 = vst.msk [vmem:[#allocation2 + $0x60] sm:$0xff] %vm865_vm0, %v6806_v60  ;;  %v249_v39 = vadd.s32 192, %v6596_v5  ;;  %v933_v19 = vld [vmem:[#allocation2 + $0xc7] sm:$0xff] }
  0x4f   : > { %9007 = vst [vmem:[#allocation35_spill] sm:$0xff] %v6821_v6  ;;  %v1198_v21 = vld [vmem:[#allocation2 + $0xc8] sm:$0xff] }
  0x50   : > { %9008 = vst [vmem:[#allocation36_spill] sm:$0xff] %v6824_v7  ;;  %v429_v55 = vand.u32 15, %v249_v39  ;;  %v1408_v60 = vld [vmem:[#allocation2 + $0x9] sm:$0xff] }
  0x51   : > { %893 = vst.msk [vmem:[#allocation2 + $0xd8] sm:$0xff] %vm865_vm0, %v6821_v6 }
  0x52   : > { %5840 = vmatmul.msk.bf16.gmra.mxu2 %vm865_vm0, %v983_v45  ;;  %9009 = vst [vmem:[#allocation37_spill] sm:$0xff] %v6832_v8  ;;  %v1182_v45 = vld [vmem:[#allocation2 + $0x48] sm:$0xff]  ;;  %vm665_vm10 = vcmp.gt.s32.totalorder %v429_v55, 0 }
  0x53   : > { %894 = vst.msk [vmem:[#allocation2 + $0xe0] sm:$0xff] %vm865_vm0, %v6824_v7  ;;  %v6861_v63 = vpack.c.bf16 %v1183_v46, %v1182_v45  ;;  %v6878_v15 = vsel %vm665_vm10, 1.0, %v8839_v4  ;;  %v6886_v45 = vld [vmem:[#allocation2 + $0x57] sm:$0xff]  ;;  %v251_v46 = vadd.s32 208, %v6596_v5 }
  0x54   : > { %5861 = vmatmul.msk.bf16.gmra.mxu1 %vm865_vm0, %v6809_v61  ;;  %9010 = vst [vmem:[#allocation38_spill] sm:$0xff] %v6841_v36  ;;  %v965_v33 = vmul.f32 %v6878_v15, %v933_v19  ;;  %v6893_v19 = vld [vmem:[%s6620_s30 + $0x60] sm:$0xff]  ;;  %v2181_v30 = vld [vmem:[#allocation2 + $0x51] sm:$0xff] }
  0x55   : > { %5833 = vmatmul.msk.bf16.gmra.mxu0 %vm865_vm0, %v976_v0  ;;  %9011 = vst [vmem:[#allocation39_spill] sm:$0xff] %v6850_v48  ;;  %v977_v0 = vpack.c.bf16 %v6852_v50, %v949_v44  ;;  %v6884_v44 = vsel %vm651_vm11, 1.0, %v8839_v4  ;;  %v1185_v3 = vld [vmem:[#allocation2 + $0x60] sm:$0xff]  ;;  %v237_v4 = vadd.s32 96, %v6596_v5 }
  0x56   : > { %879 = vst.msk [vmem:[#allocation2 + $0x68] sm:$0xff] %vm865_vm0, %v6850_v48  ;;  %v951_v59 = vmul.f32 %v6884_v44, %v6886_v45 }
  0x57   : > { %9012 = vst [vmem:[#allocation40_spill] sm:$0xff] %v6858_v62 }
  0x58   : > { %880 = vst.msk [vmem:[#allocation2 + $0x70] sm:$0xff] %vm865_vm0, %v6858_v62  ;;  %v2174_v62 = vld [vmem:[#allocation2 + $0x19] sm:$0xff] }
  0x59   : > { %9013 = vst [vmem:[#allocation41_spill] sm:$0xff] %v6867_v9 }
  0x5a   : > { %9014 = vst [vmem:[#allocation42_spill] sm:$0xff] %v6870_v14  ;;  %v936_v7 = vld [vmem:[#allocation2 + $0xdf] sm:$0xff] }
  0x5b   : > { %895 = vst.msk [vmem:[#allocation2 + $0xe8] sm:$0xff] %vm865_vm0, %v6867_v9  ;;  %v6908_v9 = vld [vmem:[%s6620_s30 + $0xe8] sm:$0xff] }
  0x5c   : > { %9015 = vst [vmem:[#allocation43_spill] sm:$0xff] %v6878_v15 }
  0x5d   : > { %896 = vst.msk [vmem:[#allocation2 + $0xf0] sm:$0xff] %vm865_vm0, %v6870_v14  ;;  %v6905_v14 = vld [vmem:[%s6620_s30 + $0xe0] sm:$0xff]  ;;  %v1186_v22 = vld [vmem:[#allocation2 + $0x68] sm:$0xff] }
  0x5e   : > { %5869 = vmatmul.msk.bf16.gmra.mxu3 %vm865_vm0, %v1217_v26  ;;  %v1199_v26 = vld [vmem:[#allocation2 + $0xd0] sm:$0xff]  ;;  %9016 = vst [vmem:[#allocation44_spill] sm:$0xff] %v6884_v44  ;;  %v2183_v24 = vld [vmem:[#allocation2 + $0x61] sm:$0xff] }
  0x5f   : > { %v1218_v39 = vpack.c.bf16 %v1199_v26, %v1198_v21  ;;  %9017 = vst [vmem:[#allocation45_spill] sm:$0xff] %v6893_v19  ;;  %v6895_v21 = vld [vmem:[#allocation2 + $0x5f] sm:$0xff]  ;;  %v443_v26 = vand.u32 15, %v251_v46  ;;  %v9020_v46 = vmov 0.0   ;;  %v1187_v57 = vld [vmem:[#allocation2 + $0x70] sm:$0xff] }
  0x60   : > { %881 = vst.msk [vmem:[#allocation2 + $0x78] sm:$0xff] %vm865_vm0, %v6893_v19 }
  0x61   : > { %vm667_vm12 = vcmp.gt.s32.totalorder %v443_v26, 0  ;;  %9018 = vst [vmem:[#allocation46_spill] sm:$0xff] %v6905_v14 }
  0x62   : > { %5841 = vmatmul.msk.bf16.gmra.mxu2 %vm865_vm0, %v984_v40  ;;  %v934_v40 = vld [vmem:[#allocation2 + $0xcf] sm:$0xff]  ;;  %9019 = vst [vmem:[#allocation47_spill] sm:$0xff] %v6908_v9 }
  0x63   : > { %v985_v55 = vpack.c.bf16 %v934_v40, %v965_v33  ;;  %v345_v40 = vand.u32 15, %v237_v4  ;;  %897 = vst.msk [vmem:[#allocation2 + $0xf8] sm:$0xff] %vm865_vm0, %v6905_v14  ;;  %v1200_v4 = vld [vmem:[#allocation2 + $0xd8] sm:$0xff]  ;;  %v6924_v14 = vld [vmem:[#allocation2 + $0x67] sm:$0xff] }
  0x64   : > { %5862 = vmatmul.msk.bf16.gmra.mxu1 %vm865_vm0, %v6861_v63  ;;  %898 = vst.msk [vmem:[#allocation2 + $0x100] sm:$0xff] %vm865_vm0, %v6908_v9  ;;  %v1203_v35 = vld [vmem:[#allocation2 + $0xf0] sm:$0xff] }
  0x65   : > { %5834 = vmatmul.msk.bf16.gmra.mxu0 %vm865_vm0, %v977_v0  ;;  %v1184_v0 = vld [vmem:[#allocation2 + $0x58] sm:$0xff]  ;;  %vm653_vm13 = vcmp.gt.s32.totalorder %v345_v40, 0  ;;  %v6930_v40 = vld [vmem:[#allocation2 + $0x6f] sm:$0xff] }
  0x66   : > { %v6901_v33 = vpack.c.bf16 %v1185_v3, %v1184_v0  ;;  %v935_v0 = vld [vmem:[#allocation2 + $0xd7] sm:$0xff]  ;;  %v6922_v6 = vsel %vm653_vm13, 1.0, %v9020_v46 }
  0x67   : > { %9022 = vst [vmem:[#allocation49_spill] sm:$0xff] %v6922_v6  ;;  %v953_v9 = vmul.f32 %v6922_v6, %v6924_v14  ;;  %v1188_v29 = vld [vmem:[#allocation2 + $0x78] sm:$0xff] }
  0x69   : > { %v979_v56 = vpack.c.bf16 %v6930_v40, %v953_v9 }
  0x6a   : > { %v1204_v16 = vld [vmem:[#allocation2 + $0xf8] sm:$0xff] }
  0x6e   : > { %5870 = vmatmul.msk.bf16.gmra.mxu3 %vm865_vm0, %v1218_v39  ;;  %v978_v39 = vpack.c.bf16 %v6895_v21, %v951_v59  ;;  %v1201_v59 = vld [vmem:[#allocation2 + $0xe0] sm:$0xff] }
  0x6f   : > { %v1219_v26 = vpack.c.bf16 %v1201_v59, %v1200_v4  ;;  %v239_v4 = vadd.s32 112, %v6596_v5  ;;  %v6934_v59 = vpack.c.bf16 %v1187_v57, %v1186_v22  ;;  %v938_v22 = vld [vmem:[#allocation2 + $0xef] sm:$0xff] }
  0x72   : > { %5842 = vmatmul.msk.bf16.gmra.mxu2 %vm865_vm0, %v985_v55  ;;  %v6916_v55 = vsel %vm667_vm12, 1.0, %v9020_v46 }
  0x73   : > { %9021 = vst [vmem:[#allocation48_spill] sm:$0xff] %v6916_v55  ;;  %v967_v3 = vmul.f32 %v6916_v55, %v935_v0 }
  0x74   : > { %5863 = vmatmul.msk.bf16.gmra.mxu1 %vm865_vm0, %v6901_v33 }
  0x75   : > { %5835 = vmatmul.msk.bf16.gmra.mxu0 %vm865_vm0, %v978_v39  ;;  %v253_v39 = vadd.s32 224, %v6596_v5  ;;  %v986_v23 = vpack.c.bf16 %v936_v7, %v967_v3  ;;  %v359_v7 = vand.u32 15, %v239_v4  ;;  %v255_v4 = vadd.s32 240, %v6596_v5 }
  0x77   : > { %v457_v0 = vand.u32 15, %v253_v39  ;;  %v1202_v39 = vld [vmem:[#allocation2 + $0xe8] sm:$0xff]  ;;  %vm655_vm15 = vcmp.gt.s32.totalorder %v359_v7, 0  ;;  %v6953_v7 = vld [vmem:[#allocation2 + $0x7f] sm:$0xff] }
  0x78   : > { %v1220_v57 = vpack.c.bf16 %v1203_v35, %v1202_v39  ;;  %v6945_v9 = vsel %vm655_vm15, 1.0, %v9020_v46  ;;  %v6956_v35 = vpack.c.bf16 %v1189_v28, %v1188_v29  ;;  %v226_v39 = vadd.s32 8, %v6596_v5  ;;  %v6335_v28 = vld [vmem:[%s8834_s1 + $0x58] sm:$0xff] }
  0x79   : > { %vm669_vm14 = vcmp.gt.s32.totalorder %v457_v0, 0  ;;  %9024 = vst [vmem:[#allocation51_spill] sm:$0xff] %v6945_v9  ;;  %v6947_v0 = vld [vmem:[#allocation2 + $0x77] sm:$0xff]  ;;  %2325 = vmatpush.bf16.msrb.mxu1 %v6335_v28 }
  0x7a   : > { %v6941_v3 = vsel %vm669_vm14, 1.0, %v9020_v46  ;;  %v268_v29 = vand.u32 15, %v226_v39  ;;  %v6341_v39 = vld [vmem:[%s8834_s1 + $0x88] sm:$0xff] }
  0x7b   : > { %9023 = vst [vmem:[#allocation50_spill] sm:$0xff] %v6941_v3  ;;  %3091 = vmatpush.bf16.msra.mxu0 %v6341_v39 }
  0x7c   : > { %vm738_vm2 = vcmp.lt.s32.totalorder %v268_v29, 15 }
  0x7d   : > { %v6983_v28 = vsel %vm738_vm2, 1.0, %v9020_v46 }
  0x7e   : > { %5871 = vmatmul.msk.bf16.gmra.mxu3 %vm865_vm0, %v1219_v26  ;;  %v937_v26 = vld [vmem:[#allocation2 + $0xe7] sm:$0xff]  ;;  %9026 = vst [vmem:[#allocation53_spill] sm:$0xff] %v6983_v28  ;;  %v2207_v19 = vmul.f32 %v6983_v28, %v2175_v13 }
  0x80   : > { %v2238_v29 = vpack.c.bf16 %v2207_v19, %v2174_v62  ;;  %v1409_v19 = vld [vmem:[#allocation2 + $0x11] sm:$0xff] }
  0x82   : > { %5843 = vmatmul.msk.bf16.gmra.mxu2 %vm865_vm0, %v986_v23  ;;  %v969_v23 = vmul.f32 %v6941_v3, %v937_v26  ;;  %v471_v26 = vand.u32 15, %v255_v4  ;;  %v939_v4 = vld [vmem:[#allocation2 + $0xf7] sm:$0xff] }
  0x84   : > { %5864 = vmatmul.msk.bf16.gmra.mxu1 %vm865_vm0, %v6934_v59  ;;  %v987_v32 = vpack.c.bf16 %v938_v22, %v969_v23  ;;  %v6337_v23 = vld [vmem:[%s8834_s1 + $0x68] sm:$0xff]  ;;  %vm671_vm1 = vcmp.gt.s32.totalorder %v471_v26, 0  ;;  %v6334_v26 = vld [vmem:[%s8834_s1 + $0x50] sm:$0xff] }
  0x85   : > { %5836 = vmatmul.msk.bf16.gmra.mxu0 %vm865_vm0, %v979_v56  ;;  %v955_v56 = vmul.f32 %v6945_v9, %v6947_v0  ;;  %2591 = vmatpush.bf16.msra.mxu2 %v6337_v23 }
  0x86   : > { %2326 = vmatpush.bf16.msrb.mxu1 %v6334_v26 }
  0x87   : > { %v980_v22 = vpack.c.bf16 %v6953_v7, %v955_v56  ;;  %v1205_v56 = vld [vmem:[#allocation2 + $0x100] sm:$0xff] }
  0x8e   : > { %5872 = vmatmul.msk.bf16.gmra.mxu3 %vm865_vm0, %v1220_v57  ;;  %v6339_v57 = vld [vmem:[%s8834_s1 + $0x78] sm:$0xff] }
  0x8f   : > { %2825 = vmatpush.bf16.msra.mxu3 %v6339_v57  ;;  %v1221_v57 = vpack.c.bf16 %v1205_v56, %v1204_v16  ;;  %v6992_v16 = vld [vmem:[%s8835_s2] ss:$0 sm:$0xff] }
  0x92   : > { %5844 = vmatmul.msk.bf16.gmra.mxu2 %vm865_vm0, %v987_v32  ;;  %v6973_v32 = vsel %vm671_vm1, 1.0, %v9020_v46 }
  0x93   : > { %9025 = vst [vmem:[#allocation52_spill] sm:$0xff] %v6973_v32  ;;  %v971_v23 = vmul.f32 %v6973_v32, %v939_v4  ;;  %v228_v4 = vadd.s32 24, %v6596_v5 }
  0x94   : > { %5865 = vmatmul.msk.bf16.gmra.mxu1 %vm865_vm0, %v6956_v35 }
  0x95   : > { %5837 = vmatmul.msk.bf16.gmra.mxu0 %vm865_vm0, %v980_v22  ;;  %v940_v22 = vld [vmem:[#allocation2 + $0xff] sm:$0xff] }
  0x96   : > { %v988_v20 = vpack.c.bf16 %v940_v22, %v971_v23  ;;  %v282_v23 = vand.u32 15, %v228_v4  ;;  %v1441_v22 = vmul.f32 %v6983_v28, %v1409_v19 }
  0x98   : > { %vm740_vm3 = vcmp.lt.s32.totalorder %v282_v23, 15 }
  0x99   : > { %v7006_v4 = vsel %vm740_vm3, 1.0, %v9020_v46  ;;  %vm903_vm3 = vcmask 253952  }
  0x9a   : > { %9027 = vst [vmem:[#allocation54_spill] sm:$0xff] %v7006_v4  ;;  %v1443_v52 = vmul.f32 %v7006_v4, %v2175_v13 }
  0x9b   : > { %904 = vst.msk [vmem:[#allocation2 + $0x128] sm:$0x1] %vm903_vm3, %v9020_v46 }
  0x9c   : > { %3275 = vst.msk [vmem:[#allocation3 + $0x128] sm:$0x1] %vm903_vm3, %v9020_v46 }
  0x9d   : > { %v1296_v56 = vpop.f32.mrf.mxu1 }
  0x9e   : > { %5873 = vmatmul.msk.bf16.gmra.mxu3 %vm865_vm0, %v1221_v57  ;;  %v1062_v26 = vpop.f32.mrf.mxu0 }
  0x9f   : > { %v1142_v39 = vadd.f32 %v6992_v16, %v1062_v26  ;;  %v2177_v26 = vld [vmem:[#allocation2 + $0x31] sm:$0xff] }
  0xa1   : > { %v7000_v57 = vadd.f32 %v1296_v56, %v1142_v39  ;;  %v7012_v39 = vld [vmem:[#allocation2 + $0x29] sm:$0xff] }
  0xa2   : > { %5845 = vmatmul.msk.bf16.gmra.mxu2 %vm865_vm0, %v988_v20  ;;  %v1706_v20 = vmul.f32 %v6628_v11, %v6704_v43  ;;  %v2209_v43 = vmul.f32 %v7006_v4, %v2177_v26 }
  0xa4   : > { %5970 = vmatmul.msk.bf16.vlgmr.msrb.gmra.mxu1 %vm865_vm0, %v2238_v29  ;;  %v1738_v48 = vpack.c.bf16 %v6714_v49, %v1706_v20  ;;  %v2239_v23 = vpack.c.bf16 %v2209_v43, %v7012_v39  ;;  %v230_v20 = vadd.s32 40, %v6596_v5 }
  0xa5   : > { %5942 = vmatmul.msk.bf16.vlgmr.msrb.gmra.mxu0 %vm865_vm0, %v6723_v53  ;;  %v1298_v51 = vpop.f32.mrf.mxu1  ;;  %v1472_v53 = vpack.c.bf16 %v1441_v22, %v1408_v60 }
  0xa6   : > { %v1064_v17 = vpop.f32.mrf.mxu0 }
  0xa7   : > { %v1143_v29 = vadd.f32 %v6992_v16, %v1064_v17 }
  0xa9   : > { %v7010_v56 = vadd.f32 %v1298_v51, %v1143_v29  ;;  %v296_v51 = vand.u32 15, %v230_v20 }
  0xab   : > { %vm742_vm4 = vcmp.lt.s32.totalorder %v296_v51, 15 }
  0xae   : > { %5914 = vmatmul.msk.bf16.vlgmr.msrb.gmra.mxu3 %vm865_vm0, %v1738_v48  ;;  %v1708_v48 = vmul.f32 %v6696_v37, %v6748_v2 }
  0xb1   : > { %v1336_v49 = vpop.f32.mrf.mxu3  ;;  %v1301_v17 = vpop.f32.mrf.mxu1 }
  0xb2   : > { %5886 = vmatmul.msk.bf16.vlgmr.msrb.gmra.mxu2 %vm865_vm0, %v1472_v53  ;;  %v1067_v19 = vpop.f32.mrf.mxu0 }
  0xb3   : > { %v1144_v60 = vadd.f32 %v6992_v16, %v1067_v19  ;;  %v1739_v19 = vpack.c.bf16 %v6757_v12, %v1708_v48  ;;  %v232_v48 = vadd.s32 56, %v6596_v5 }
  0xb4   : > { %5971 = vmatmul.msk.bf16.gmra.mxu1 %vm865_vm0, %v2239_v23 }
  0xb5   : > { %v1102_v10 = vpop.f32.mrf.mxu2  ;;  %5943 = vmatmul.msk.bf16.gmra.mxu0 %vm865_vm0, %v6766_v18  ;;  %v7024_v29 = vadd.f32 %v1301_v17, %v1144_v60  ;;  %v7032_v18 = vsel %vm742_vm4, 1.0, %v9020_v46  ;;  %v1473_v17 = vpack.c.bf16 %v1443_v52, %v2174_v62  ;;  %v7039_v60 = vld [vmem:[#allocation2 + $0x39] sm:$0xff] }
  0xb6   : > { %v1158_v22 = vadd.f32 %v6992_v16, %v1102_v10  ;;  %9028 = vst [vmem:[#allocation55_spill] sm:$0xff] %v7032_v18 }
  0xb8   : > { %v7026_v53 = vadd.f32 %v1336_v49, %v1158_v22  ;;  %v2211_v49 = vmul.f32 %v7032_v18, %v2179_v47 }
  0xb9   : > { %v1338_v43 = vpop.f32.mrf.mxu3  ;;  %v1303_v10 = vpop.f32.mrf.mxu1 }
  0xba   : > { %v1069_v23 = vpop.f32.mrf.mxu0  ;;  %v2240_v51 = vpack.c.bf16 %v2211_v49, %v7039_v60  ;;  %v1445_v49 = vmul.f32 %v7032_v18, %v2177_v26 }
  0xbb   : > { %v1145_v31 = vadd.f32 %v6992_v16, %v1069_v23 }
  0xbd   : > { %v1104_v20 = vpop.f32.mrf.mxu2  ;;  %v7037_v13 = vadd.f32 %v1303_v10, %v1145_v31  ;;  %v310_v31 = vand.u32 15, %v232_v48 }
  0xbe   : > { %v1159_v2 = vadd.f32 %v6992_v16, %v1104_v20  ;;  %5915 = vmatmul.msk.bf16.gmra.mxu3 %vm865_vm0, %v1739_v19 }
  0xbf   : > { %vm744_vm5 = vcmp.lt.s32.totalorder %v310_v31, 15 }
  0xc0   : > { %v7041_v12 = vadd.f32 %v1338_v43, %v1159_v2  ;;  %v1710_v43 = vmul.f32 %v6746_v1, %v6791_v42 }
  0xc1   : > { %v1341_v22 = vpop.f32.mrf.mxu3  ;;  %v1306_v23 = vpop.f32.mrf.mxu1 }
  0xc2   : > { %5887 = vmatmul.msk.bf16.gmra.mxu2 %vm865_vm0, %v1473_v17  ;;  %v1072_v20 = vpop.f32.mrf.mxu0 }
  0xc3   : > { %v1146_v62 = vadd.f32 %v6992_v16, %v1072_v20  ;;  %v1740_v20 = vpack.c.bf16 %v6800_v54, %v1710_v43  ;;  %v7069_v54 = vld [vmem:[#allocation2 + $0x49] sm:$0xff]  ;;  %v234_v43 = vadd.s32 72, %v6596_v5 }
  0xc4   : > { %5972 = vmatmul.msk.bf16.gmra.mxu1 %vm865_vm0, %v2240_v51 }
  0xc5   : > { %v1107_v52 = vpop.f32.mrf.mxu2  ;;  %5944 = vmatmul.msk.bf16.gmra.mxu0 %vm865_vm0, %v6809_v61  ;;  %v7053_v10 = vadd.f32 %v1306_v23, %v1146_v62  ;;  %v7061_v61 = vsel %vm744_vm5, 1.0, %v9020_v46 }
  0xc6   : > { %v1160_v19 = vadd.f32 %v6992_v16, %v1107_v52  ;;  %9029 = vst [vmem:[#allocation56_spill] sm:$0xff] %v7061_v61  ;;  %v2213_v23 = vmul.f32 %v7061_v61, %v2181_v30 }
  0xc8   : > { %v7055_v2 = vadd.f32 %v1341_v22, %v1160_v19  ;;  %v1474_v22 = vpack.c.bf16 %v1445_v49, %v7012_v39  ;;  %v2241_v31 = vpack.c.bf16 %v2213_v23, %v7069_v54  ;;  %v1447_v23 = vmul.f32 %v7061_v61, %v2179_v47 }
  0xc9   : > { %v1343_v17 = vpop.f32.mrf.mxu3  ;;  %v1308_v52 = vpop.f32.mrf.mxu1 }
  0xca   : > { %v1074_v51 = vpop.f32.mrf.mxu0 }
  0xcb   : > { %v1147_v27 = vadd.f32 %v6992_v16, %v1074_v51 }
  0xcd   : > { %v1109_v48 = vpop.f32.mrf.mxu2  ;;  %v7067_v26 = vadd.f32 %v1308_v52, %v1147_v27  ;;  %v324_v27 = vand.u32 15, %v234_v43 }
  0xce   : > { %v1161_v42 = vadd.f32 %v6992_v16, %v1109_v48  ;;  %5916 = vmatmul.msk.bf16.gmra.mxu3 %vm865_vm0, %v1740_v20 }
  0xcf   : > { %vm746_vm6 = vcmp.lt.s32.totalorder %v324_v27, 15 }
  0xd0   : > { %v7071_v62 = vadd.f32 %v1343_v17, %v1161_v42  ;;  %v1712_v17 = vmul.f32 %v6789_v41, %v6843_v38 }
  0xd1   : > { %v1346_v19 = vpop.f32.mrf.mxu3  ;;  %v1311_v51 = vpop.f32.mrf.mxu1 }
  0xd2   : > { %9030 = vst [vmem:[#allocation57_spill] sm:$0xff] %v7071_v62  ;;  %5888 = vmatmul.msk.bf16.gmra.mxu2 %vm865_vm0, %v1474_v22  ;;  %v1077_v48 = vpop.f32.mrf.mxu0 }
  0xd3   : > { %v1148_v49 = vadd.f32 %v6992_v16, %v1077_v48  ;;  %v1741_v48 = vpack.c.bf16 %v6852_v50, %v1712_v17  ;;  %v7099_v50 = vld [vmem:[#allocation2 + $0x59] sm:$0xff]  ;;  %v236_v17 = vadd.s32 88, %v6596_v5 }
  0xd4   : > { %5973 = vmatmul.msk.bf16.gmra.mxu1 %vm865_vm0, %v2241_v31 }
  0xd5   : > { %v1112_v39 = vpop.f32.mrf.mxu2  ;;  %5945 = vmatmul.msk.bf16.gmra.mxu0 %vm865_vm0, %v6861_v63  ;;  %v7083_v52 = vadd.f32 %v1311_v51, %v1148_v49  ;;  %v7091_v63 = vsel %vm746_vm6, 1.0, %v9020_v46 }
  0xd6   : > { %v1162_v20 = vadd.f32 %v6992_v16, %v1112_v39  ;;  %9031 = vst [vmem:[#allocation58_spill] sm:$0xff] %v7091_v63  ;;  %v2215_v51 = vmul.f32 %v7091_v63, %v2183_v24 }
  0xd8   : > { %v7085_v42 = vadd.f32 %v1346_v19, %v1162_v20  ;;  %v1475_v19 = vpack.c.bf16 %v1447_v23, %v7039_v60  ;;  %v2242_v27 = vpack.c.bf16 %v2215_v51, %v7099_v50  ;;  %v1449_v51 = vmul.f32 %v7091_v63, %v2181_v30  ;;  %v7276_v63 = vld [vmem:[#allocation2 + $0xc1] sm:$0xff] }
  0xd9   : > { %v1348_v22 = vpop.f32.mrf.mxu3  ;;  %v1313_v39 = vpop.f32.mrf.mxu1 }
  0xda   : > { %v1079_v31 = vpop.f32.mrf.mxu0 }
  0xdb   : > { %v1149_v62 = vadd.f32 %v6992_v16, %v1079_v31 }
  0xdd   : > { %v1114_v43 = vpop.f32.mrf.mxu2  ;;  %v7097_v47 = vadd.f32 %v1313_v39, %v1149_v62  ;;  %v338_v62 = vand.u32 15, %v236_v17 }
  0xde   : > { %v1163_v38 = vadd.f32 %v6992_v16, %v1114_v43  ;;  %5917 = vmatmul.msk.bf16.gmra.mxu3 %vm865_vm0, %v1741_v48 }
  0xdf   : > { %vm748_vm7 = vcmp.lt.s32.totalorder %v338_v62, 15 }
  0xe0   : > { %v7101_v49 = vadd.f32 %v1348_v22, %v1163_v38  ;;  %v1714_v22 = vmul.f32 %v6841_v36, %v6886_v45 }
  0xe1   : > { %v1351_v20 = vpop.f32.mrf.mxu3  ;;  %v1316_v31 = vpop.f32.mrf.mxu1 }
  0xe2   : > { %9032 = vst [vmem:[#allocation59_spill] sm:$0xff] %v7101_v49  ;;  %5889 = vmatmul.msk.bf16.gmra.mxu2 %vm865_vm0, %v1475_v19  ;;  %v1082_v43 = vpop.f32.mrf.mxu0  ;;  %v2185_v49 = vld [vmem:[#allocation2 + $0x71] sm:$0xff] }
  0xe3   : > { %v1150_v23 = vadd.f32 %v6992_v16, %v1082_v43  ;;  %v1742_v43 = vpack.c.bf16 %v6895_v21, %v1714_v22  ;;  %v7129_v21 = vld [vmem:[#allocation2 + $0x69] sm:$0xff]  ;;  %v238_v22 = vadd.s32 104, %v6596_v5 }
  0xe4   : > { %5974 = vmatmul.msk.bf16.gmra.mxu1 %vm865_vm0, %v2242_v27 }
  0xe5   : > { %v1117_v60 = vpop.f32.mrf.mxu2  ;;  %5946 = vmatmul.msk.bf16.gmra.mxu0 %vm865_vm0, %v6901_v33  ;;  %v7113_v39 = vadd.f32 %v1316_v31, %v1150_v23  ;;  %v7121_v33 = vsel %vm748_vm7, 1.0, %v9020_v46 }
  0xe6   : > { %v1164_v48 = vadd.f32 %v6992_v16, %v1117_v60  ;;  %9034 = vst [vmem:[#allocation61_spill] sm:$0xff] %v7121_v33  ;;  %v2217_v31 = vmul.f32 %v7121_v33, %v2185_v49 }
  0xe8   : > { %v7115_v38 = vadd.f32 %v1351_v20, %v1164_v48  ;;  %v1476_v20 = vpack.c.bf16 %v1449_v51, %v7069_v54  ;;  %v2243_v62 = vpack.c.bf16 %v2217_v31, %v7129_v21  ;;  %v1451_v31 = vmul.f32 %v7121_v33, %v2183_v24 }
  0xe9   : > { %v1353_v19 = vpop.f32.mrf.mxu3  ;;  %v1318_v60 = vpop.f32.mrf.mxu1 }
  0xea   : > { %9033 = vst [vmem:[#allocation60_spill] sm:$0xff] %v7115_v38  ;;  %v1084_v27 = vpop.f32.mrf.mxu0 }
  0xeb   : > { %v1151_v41 = vadd.f32 %v6992_v16, %v1084_v27 }
  0xed   : > { %v1119_v17 = vpop.f32.mrf.mxu2  ;;  %v7127_v30 = vadd.f32 %v1318_v60, %v1151_v41  ;;  %v352_v41 = vand.u32 15, %v238_v22 }
  0xee   : > { %v1165_v45 = vadd.f32 %v6992_v16, %v1119_v17  ;;  %5918 = vmatmul.msk.bf16.gmra.mxu3 %vm865_vm0, %v1742_v43 }
  0xef   : > { %vm750_vm8 = vcmp.lt.s32.totalorder %v352_v41, 15 }
  0xf0   : > { %v7131_v23 = vadd.f32 %v1353_v19, %v1165_v45  ;;  %v1716_v19 = vmul.f32 %v6884_v44, %v6924_v14  ;;  %v7153_v36 = vsel %vm750_vm8, 1.0, %v9020_v46 }
  0xf1   : > { %v1356_v48 = vpop.f32.mrf.mxu3  ;;  %v1321_v27 = vpop.f32.mrf.mxu1  ;;  %9037 = vst [vmem:[#allocation64_spill] sm:$0xff] %v7153_v36 }
  0xf2   : > { %9035 = vst [vmem:[#allocation62_spill] sm:$0xff] %v7131_v23  ;;  %5890 = vmatmul.msk.bf16.gmra.mxu2 %vm865_vm0, %v1476_v20  ;;  %v1087_v17 = vpop.f32.mrf.mxu0  ;;  %v7149_v23 = vld [vmem:[#allocation2 + $0x81] sm:$0xff] }
  0xf3   : > { %v1152_v51 = vadd.f32 %v6992_v16, %v1087_v17  ;;  %v1743_v17 = vpack.c.bf16 %v6930_v40, %v1716_v19  ;;  %v2219_v24 = vmul.f32 %v7153_v36, %v7149_v23  ;;  %v240_v19 = vadd.s32 120, %v6596_v5 }
  0xf4   : > { %5975 = vmatmul.msk.bf16.gmra.mxu1 %vm865_vm0, %v2243_v62 }
  0xf5   : > { %v1122_v54 = vpop.f32.mrf.mxu2  ;;  %5947 = vmatmul.msk.bf16.gmra.mxu0 %vm865_vm0, %v6934_v59  ;;  %v7143_v60 = vadd.f32 %v1321_v27, %v1152_v51  ;;  %v7162_v27 = vld [vmem:[#allocation2 + $0x79] sm:$0xff] }
  0xf6   : > { %v1166_v43 = vadd.f32 %v6992_v16, %v1122_v54  ;;  %v2244_v41 = vpack.c.bf16 %v2219_v24, %v7162_v27  ;;  %v1453_v24 = vmul.f32 %v7153_v36, %v2185_v49 }
  0xf8   : > { %v7145_v45 = vadd.f32 %v1356_v48, %v1166_v43  ;;  %v1477_v48 = vpack.c.bf16 %v1451_v31, %v7099_v50 }
  0xf9   : > { %v1358_v20 = vpop.f32.mrf.mxu3  ;;  %v1323_v54 = vpop.f32.mrf.mxu1 }
  0xfa   : > { %9036 = vst [vmem:[#allocation63_spill] sm:$0xff] %v7145_v45  ;;  %v1089_v62 = vpop.f32.mrf.mxu0 }
  0xfb   : > { %v1153_v59 = vadd.f32 %v6992_v16, %v1089_v62 }
  0xfd   : > { %v1124_v22 = vpop.f32.mrf.mxu2  ;;  %v7160_v40 = vadd.f32 %v1323_v54, %v1153_v59  ;;  %v366_v54 = vand.u32 15, %v240_v19 }
  0xfe   : > { %v1167_v14 = vadd.f32 %v6992_v16, %v1124_v22  ;;  %5919 = vmatmul.msk.bf16.gmra.mxu3 %vm865_vm0, %v1743_v17 }
  0xff   : > { %vm752_vm9 = vcmp.lt.s32.totalorder %v366_v54, 15 }
 0x100   : > { %v7164_v51 = vadd.f32 %v1358_v20, %v1167_v14  ;;  %v1718_v20 = vmul.f32 %v6922_v6, %v6947_v0  ;;  %v7186_v44 = vsel %vm752_vm9, 1.0, %v9020_v46 }
 0x101   : > { %v1361_v43 = vpop.f32.mrf.mxu3  ;;  %v1326_v62 = vpop.f32.mrf.mxu1  ;;  %9040 = vst [vmem:[#allocation67_spill] sm:$0xff] %v7186_v44 }
 0x102   : > { %9038 = vst [vmem:[#allocation65_spill] sm:$0xff] %v7164_v51  ;;  %5891 = vmatmul.msk.bf16.gmra.mxu2 %vm865_vm0, %v1477_v48  ;;  %v1092_v50 = vpop.f32.mrf.mxu0  ;;  %v7182_v51 = vld [vmem:[#allocation2 + $0x91] sm:$0xff] }
 0x103   : > { %v1154_v22 = vadd.f32 %v6992_v16, %v1092_v50  ;;  %v1744_v50 = vpack.c.bf16 %v6953_v7, %v1718_v20  ;;  %v2221_v49 = vmul.f32 %v7186_v44, %v7182_v51 }
 0x104   : > { %5976 = vmatmul.msk.bf16.gmra.mxu1 %vm865_vm0, %v2244_v41 }
 0x105   : > { %v1127_v31 = vpop.f32.mrf.mxu2  ;;  %5948 = vmatmul.msk.bf16.gmra.mxu0 %vm865_vm0, %v6956_v35  ;;  %v7176_v59 = vadd.f32 %v1326_v62, %v1154_v22  ;;  %v7195_v62 = vld [vmem:[#allocation2 + $0x89] sm:$0xff] }
 0x106   : > { %v1168_v17 = vadd.f32 %v6992_v16, %v1127_v31  ;;  %v1954_v22 = vld [vmem:[#allocation2 + $0x88] sm:$0xff] }
 0x108   : > { %v7178_v14 = vadd.f32 %v1361_v43, %v1168_v17  ;;  %v1478_v43 = vpack.c.bf16 %v1453_v24, %v7129_v21  ;;  %v1955_v17 = vld [vmem:[#allocation2 + $0x90] sm:$0xff]  ;;  %v242_v21 = vadd.s32 136, %v6596_v5  ;;  %v6336_v24 = vld [vmem:[%s8834_s1 + $0x60] sm:$0xff] }
 0x109   : > { %v1363_v48 = vpop.f32.mrf.mxu3  ;;  %v1328_v31 = vpop.f32.mrf.mxu1  ;;  %2592 = vmatpush.bf16.msra.mxu2 %v6336_v24  ;;  %v1455_v24 = vmul.f32 %v7186_v44, %v7149_v23 }
 0x10a   : > { %9039 = vst [vmem:[#allocation66_spill] sm:$0xff] %v7178_v14  ;;  %v1094_v41 = vpop.f32.mrf.mxu0 }
 0x10b   : > { %v1155_v35 = vadd.f32 %v6992_v16, %v1094_v41  ;;  %v2245_v41 = vpack.c.bf16 %v2221_v49, %v7195_v62  ;;  %v1479_v23 = vpack.c.bf16 %v1455_v24, %v7162_v27 }
 0x10d   : > { %v1129_v19 = vpop.f32.mrf.mxu2  ;;  %v7193_v7 = vadd.f32 %v1328_v31, %v1155_v35  ;;  %v1979_v31 = vpack.c.bf16 %v1955_v17, %v1954_v22  ;;  %v1689_v22 = vld [vmem:[#allocation2 + $0x8f] sm:$0xff] }
 0x10e   : > { %v1169_v0 = vadd.f32 %v6992_v16, %v1129_v19  ;;  %5920 = vmatmul.msk.bf16.gmra.mxu3 %vm865_vm0, %v1744_v50  ;;  %v6338_v50 = vld [vmem:[%s8834_s1 + $0x70] sm:$0xff] }
 0x10f   : > { %2826 = vmatpush.bf16.msra.mxu3 %v6338_v50 }
 0x110   : > { %v7197_v54 = vadd.f32 %v1363_v48, %v1169_v0  ;;  %v1688_v48 = vld [vmem:[#allocation2 + $0x87] sm:$0xff] }
 0x111   : > { %v1366_v20 = vpop.f32.mrf.mxu3  ;;  %v1331_v19 = vpop.f32.mrf.mxu1  ;;  %v1720_v6 = vmul.f32 %v6945_v9, %v1688_v48 }
 0x112   : > { %9041 = vst [vmem:[#allocation68_spill] sm:$0xff] %v7197_v54  ;;  %5892 = vmatmul.msk.bf16.gmra.mxu2 %vm865_vm0, %v1478_v43  ;;  %v1097_v35 = vpop.f32.mrf.mxu0  ;;  %v380_v54 = vand.u32 15, %v242_v21  ;;  %v6340_v21 = vld [vmem:[%s8834_s1 + $0x80] sm:$0xff] }
 0x113   : > { %v1156_v43 = vadd.f32 %v6992_v16, %v1097_v35  ;;  %v1745_v50 = vpack.c.bf16 %v1689_v22, %v1720_v6  ;;  %3092 = vmatpush.bf16.msra.mxu0 %v6340_v21  ;;  %v1957_v22 = vld [vmem:[#allocation2 + $0xa0] sm:$0xff] }
 0x114   : > { %5977 = vmatmul.msk.bf16.gmra.mxu1 %vm865_vm0, %v2245_v41  ;;  %vm754_vm10 = vcmp.lt.s32.totalorder %v380_v54, 15 }
 0x115   : > { %v1132_v0 = vpop.f32.mrf.mxu2  ;;  %5949 = vmatmul.msk.bf16.gmra.mxu0 %vm865_vm0, %v1979_v31  ;;  %v7213_v14 = vadd.f32 %v1331_v19, %v1156_v43  ;;  %v7235_v43 = vld [vmem:[#allocation2 + $0x99] sm:$0xff] }
 0x116   : > { %v1170_v49 = vadd.f32 %v6992_v16, %v1132_v0  ;;  %v7219_v0 = vld [vmem:[#allocation2 + $0xa1] sm:$0xff] }
 0x118   : > { %v7215_v17 = vadd.f32 %v1366_v20, %v1170_v49  ;;  %v7226_v20 = vsel %vm754_vm10, 1.0, %v9020_v46  ;;  %v1956_v49 = vld [vmem:[#allocation2 + $0x98] sm:$0xff] }
 0x119   : > { %v1368_v36 = vpop.f32.mrf.mxu3  ;;  %v1333_v35 = vpop.f32.mrf.mxu1  ;;  %9043 = vst [vmem:[#allocation70_spill] sm:$0xff] %v7226_v20  ;;  %v2223_v6 = vmul.f32 %v7226_v20, %v7219_v0 }
 0x11a   : > { %9042 = vst [vmem:[#allocation69_spill] sm:$0xff] %v7215_v17  ;;  %v1099_v41 = vpop.f32.mrf.mxu0 }
 0x11b   : > { %v1157_v19 = vadd.f32 %v6992_v16, %v1099_v41  ;;  %v6343_v41 = vld [vmem:[%s8836_s3 + $0x8] sm:$0xff]  ;;  %v2246_v24 = vpack.c.bf16 %v2223_v6, %v7235_v43 }
 0x11c   : > { %3430 = vmatpush.bf16.msra.mxu1 %v6343_v41 }
 0x11d   : > { %v1134_v31 = vpop.f32.mrf.mxu2  ;;  %v7233_v54 = vadd.f32 %v1333_v35, %v1157_v19  ;;  %v1980_v35 = vpack.c.bf16 %v1957_v22, %v1956_v49  ;;  %v1690_v19 = vld [vmem:[#allocation2 + $0x97] sm:$0xff]  ;;  %v1457_v49 = vmul.f32 %v7226_v20, %v7182_v51  ;;  %v7263_v51 = vld [vmem:[#allocation2 + $0xa9] sm:$0xff] }
 0x11e   : > { %v1171_v48 = vadd.f32 %v6992_v16, %v1134_v31  ;;  %5921 = vmatmul.msk.bf16.gmra.mxu3 %vm865_vm0, %v1745_v50  ;;  %v244_v50 = vadd.s32 152, %v6596_v5 }
 0x120   : > { %v7240_v9 = vadd.f32 %v1368_v36, %v1171_v48  ;;  %v394_v45 = vand.u32 15, %v244_v50  ;;  %v1722_v36 = vmul.f32 %v6688_v34, %v1690_v19  ;;  %v1691_v48 = vld [vmem:[#allocation2 + $0x9f] sm:$0xff]  ;;  %v1692_v34 = vld [vmem:[#allocation2 + $0xa7] sm:$0xff] }
 0x121   : > { %v1371_v27 = vpop.f32.mrf.mxu3  ;;  %v2328_v21 = vpop.f32.mrf.mxu1 }
 0x122   : > { %9044 = vst [vmem:[#allocation71_spill] sm:$0xff] %v7240_v9  ;;  %5893 = vmatmul.msk.bf16.gmra.mxu2 %vm865_vm0, %v1479_v23  ;;  %v2062_v31 = vpop.f32.mrf.mxu0  ;;  %vm756_vm11 = vcmp.lt.s32.totalorder %v394_v45, 15  ;;  %v1746_v22 = vpack.c.bf16 %v1691_v48, %v1722_v36  ;;  %v7253_v9 = vld [vmem:[#allocation2 + $0xb1] sm:$0xff]  ;;  %v1958_v45 = vld [vmem:[#allocation2 + $0xa8] sm:$0xff] }
 0x124   : > { %5978 = vmatmul.msk.bf16.gmra.mxu1 %vm865_vm0, %v2246_v24  ;;  %v7256_v24 = vsel %vm756_vm11, 1.0, %v9020_v46 }
 0x125   : > { %v1137_v17 = vpop.f32.mrf.mxu2  ;;  %5950 = vmatmul.msk.bf16.gmra.mxu0 %vm865_vm0, %v1980_v35  ;;  %9046 = vst [vmem:[#allocation73_spill] sm:$0xff] %v7256_v24  ;;  %v1480_v35 = vpack.c.bf16 %v1457_v49, %v7195_v62 }
 0x126   : > { %v1172_v44 = vadd.f32 %v6992_v16, %v1137_v17 }
 0x128   : > { %v7249_v23 = vadd.f32 %v1371_v27, %v1172_v44  ;;  %v2225_v44 = vmul.f32 %v7256_v24, %v7253_v9  ;;  %v1959_v27 = vld [vmem:[#allocation2 + $0xb0] sm:$0xff] }
 0x129   : > { %v1373_v6 = vpop.f32.mrf.mxu3  ;;  %v2330_v41 = vpop.f32.mrf.mxu1 }
 0x12a   : > { %9045 = vst [vmem:[#allocation72_spill] sm:$0xff] %v7249_v23  ;;  %v2064_v17 = vpop.f32.mrf.mxu0  ;;  %v2247_v48 = vpack.c.bf16 %v2225_v44, %v7263_v51 }
 0x12d   : > { %v1139_v33 = vpop.f32.mrf.mxu2 }
 0x12e   : > { %v1173_v50 = vadd.f32 %v6992_v16, %v1139_v33  ;;  %5922 = vmatmul.msk.bf16.gmra.mxu3 %vm865_vm0, %v1746_v22  ;;  %v246_v16 = vadd.s32 168, %v6596_v5  ;;  %v1981_v33 = vpack.c.bf16 %v1959_v27, %v1958_v45  ;;  %v1459_v45 = vmul.f32 %v7256_v24, %v7219_v0 }
 0x130   : > { %v7265_v19 = vadd.f32 %v1373_v6, %v1173_v50  ;;  %v408_v20 = vand.u32 15, %v246_v16  ;;  %v1724_v6 = vmul.f32 %v6740_v58, %v1692_v34 }
 0x131   : > { %v1828_v36 = vpop.f32.mrf.mxu3  ;;  %v2333_v62 = vpop.f32.mrf.mxu1 }
 0x132   : > { %9047 = vst [vmem:[#allocation74_spill] sm:$0xff] %v7265_v19  ;;  %5894 = vmatmul.msk.bf16.gmra.mxu2 %vm865_vm0, %v1480_v35  ;;  %v2067_v49 = vpop.f32.mrf.mxu0  ;;  %v1693_v35 = vld [vmem:[#allocation2 + $0xaf] sm:$0xff]  ;;  %vm758_vm12 = vcmp.lt.s32.totalorder %v408_v20, 15  ;;  %v7288_v20 = vld [vmem:[#allocation2 + $0xb9] sm:$0xff] }
 0x133   : > { %v1747_v27 = vpack.c.bf16 %v1693_v35, %v1724_v6  ;;  %v7281_v16 = vsel %vm758_vm12, 1.0, %v9020_v46 }
 0x134   : > { %5979 = vmatmul.msk.bf16.gmra.mxu1 %vm865_vm0, %v2247_v48  ;;  %9049 = vst [vmem:[#allocation76_spill] sm:$0xff] %v7281_v16 }
 0x135   : > { %v1562_v23 = vpop.f32.mrf.mxu2  ;;  %5951 = vmatmul.msk.bf16.gmra.mxu0 %vm865_vm0, %v1981_v33 }
 0x136   : > { %v1642_v22 = vadd.f32 %v1562_v23, %v7000_v57 }
 0x138   : > { %v1908_v50 = vadd.f32 %v1828_v36, %v1642_v22  ;;  %v1481_v36 = vpack.c.bf16 %v1459_v45, %v7235_v43  ;;  %v1960_v22 = vld [vmem:[#allocation2 + $0xb8] sm:$0xff] }
 0x139   : > { %v1830_v19 = vpop.f32.mrf.mxu3  ;;  %v2335_v38 = vpop.f32.mrf.mxu1 }
 0x13a   : > { %v2142_v44 = vadd.f32 %v2062_v31, %v1908_v50  ;;  %v2069_v23 = vpop.f32.mrf.mxu0  ;;  %v2227_v31 = vmul.f32 %v7281_v16, %v7276_v63 }
 0x13c   : > { %v7278_v57 = vadd.f32 %v2328_v21, %v2142_v44  ;;  %v1961_v21 = vld [vmem:[#allocation2 + $0xc0] sm:$0xff]  ;;  %v2248_v35 = vpack.c.bf16 %v2227_v31, %v7288_v20 }
 0x13d   : > { %v1564_v48 = vpop.f32.mrf.mxu2  ;;  %v1982_v44 = vpack.c.bf16 %v1961_v21, %v1960_v22 }
 0x13e   : > { %9048 = vst [vmem:[#allocation75_spill] sm:$0xff] %v7278_v57  ;;  %v1643_v34 = vadd.f32 %v1564_v48, %v7010_v56  ;;  %5923 = vmatmul.msk.bf16.gmra.mxu3 %vm865_vm0, %v1747_v27  ;;  %v248_v56 = vadd.s32 184, %v6596_v5  ;;  %v1694_v57 = vld [vmem:[#allocation2 + $0xb7] sm:$0xff] }
 0x140   : > { %v1909_v33 = vadd.f32 %v1830_v19, %v1643_v34  ;;  %v422_v19 = vand.u32 15, %v248_v56 }
 0x141   : > { %v1833_v6 = vpop.f32.mrf.mxu3  ;;  %v2338_v45 = vpop.f32.mrf.mxu1 }
 0x142   : > { %5895 = vmatmul.msk.bf16.gmra.mxu2 %vm865_vm0, %v1481_v36  ;;  %v2143_v50 = vadd.f32 %v2064_v17, %v1909_v33  ;;  %v2072_v58 = vpop.f32.mrf.mxu0  ;;  %v1726_v17 = vmul.f32 %v6783_v25, %v1694_v57  ;;  %v1695_v36 = vld [vmem:[#allocation2 + $0xbf] sm:$0xff]  ;;  %vm760_vm13 = vcmp.lt.s32.totalorder %v422_v19, 15  ;;  %v1962_v19 = vld [vmem:[#allocation2 + $0xc8] sm:$0xff] }
 0x144   : > { %v7293_v48 = vadd.f32 %v2330_v41, %v2143_v50  ;;  %5980 = vmatmul.msk.bf16.gmra.mxu1 %vm865_vm0, %v2248_v35  ;;  %v1461_v41 = vmul.f32 %v7281_v16, %v7253_v9  ;;  %v1748_v22 = vpack.c.bf16 %v1695_v36, %v1726_v17  ;;  %v7301_v50 = vld [vmem:[#allocation2 + $0xd1] sm:$0xff] }
 0x145   : > { %v1567_v27 = vpop.f32.mrf.mxu2  ;;  %5952 = vmatmul.msk.bf16.gmra.mxu0 %vm865_vm0, %v1982_v44  ;;  %v7306_v44 = vsel %vm760_vm13, 1.0, %v9020_v46 }
 0x146   : > { %v1644_v24 = vadd.f32 %v1567_v27, %v7024_v29  ;;  %9051 = vst [vmem:[#allocation78_spill] sm:$0xff] %v7306_v44  ;;  %v1482_v57 = vpack.c.bf16 %v1461_v41, %v7263_v51 }
 0x148   : > { %v1910_v34 = vadd.f32 %v1833_v6, %v1644_v24  ;;  %v7313_v6 = vld [vmem:[#allocation2 + $0xc9] sm:$0xff] }
 0x149   : > { %v1835_v31 = vpop.f32.mrf.mxu3  ;;  %v2340_v21 = vpop.f32.mrf.mxu1 }
 0x14a   : > { %v2144_v33 = vadd.f32 %v2067_v49, %v1910_v34  ;;  %v2074_v35 = vpop.f32.mrf.mxu0  ;;  %v2229_v49 = vmul.f32 %v7306_v44, %v7301_v50 }
 0x14c   : > { %v7303_v29 = vadd.f32 %v2333_v62, %v2144_v33  ;;  %v1963_v62 = vld [vmem:[#allocation2 + $0xd0] sm:$0xff]  ;;  %v2249_v36 = vpack.c.bf16 %v2229_v49, %v7313_v6 }
 0x14d   : > { %v1569_v56 = vpop.f32.mrf.mxu2  ;;  %v1983_v33 = vpack.c.bf16 %v1963_v62, %v1962_v19 }
 0x14e   : > { %9050 = vst [vmem:[#allocation77_spill] sm:$0xff] %v7303_v29  ;;  %v1645_v24 = vadd.f32 %v1569_v56, %v7037_v13  ;;  %5924 = vmatmul.msk.bf16.gmra.mxu3 %vm865_vm0, %v1748_v22  ;;  %v250_v13 = vadd.s32 200, %v6596_v5  ;;  %v1696_v29 = vld [vmem:[#allocation2 + $0xc7] sm:$0xff] }
 0x150   : > { %v1911_v27 = vadd.f32 %v1835_v31, %v1645_v24  ;;  %v436_v31 = vand.u32 15, %v250_v13 }
 0x151   : > { %v1838_v17 = vpop.f32.mrf.mxu3  ;;  %v2343_v41 = vpop.f32.mrf.mxu1 }
 0x152   : > { %5896 = vmatmul.msk.bf16.gmra.mxu2 %vm865_vm0, %v1482_v57  ;;  %v2145_v34 = vadd.f32 %v2069_v23, %v1911_v27  ;;  %v2077_v25 = vpop.f32.mrf.mxu0  ;;  %v1728_v23 = vmul.f32 %v6832_v8, %v1696_v29  ;;  %v1697_v57 = vld [vmem:[#allocation2 + $0xcf] sm:$0xff]  ;;  %vm762_vm14 = vcmp.lt.s32.totalorder %v436_v31, 15  ;;  %v1964_v31 = vld [vmem:[#allocation2 + $0xd8] sm:$0xff] }
 0x154   : > { %v7318_v56 = vadd.f32 %v2335_v38, %v2145_v34  ;;  %5981 = vmatmul.msk.bf16.gmra.mxu1 %vm865_vm0, %v2249_v36  ;;  %v1463_v38 = vmul.f32 %v7306_v44, %v7276_v63  ;;  %v1749_v19 = vpack.c.bf16 %v1697_v57, %v1728_v23  ;;  %v7326_v34 = vld [vmem:[#allocation2 + $0xe1] sm:$0xff] }
 0x155   : > { %v1572_v22 = vpop.f32.mrf.mxu2  ;;  %5953 = vmatmul.msk.bf16.gmra.mxu0 %vm865_vm0, %v1983_v33  ;;  %v7331_v33 = vsel %vm762_vm14, 1.0, %v9020_v46 }
 0x156   : > { %v1646_v16 = vadd.f32 %v1572_v22, %v7053_v10  ;;  %9053 = vst [vmem:[#allocation80_spill] sm:$0xff] %v7331_v33  ;;  %v1483_v29 = vpack.c.bf16 %v1463_v38, %v7288_v20 }
 0x158   : > { %v1912_v24 = vadd.f32 %v1838_v17, %v1646_v16  ;;  %v7338_v17 = vld [vmem:[#allocation2 + $0xd9] sm:$0xff] }
 0x159   : > { %v1840_v49 = vpop.f32.mrf.mxu3  ;;  %v2345_v62 = vpop.f32.mrf.mxu1 }
 0x15a   : > { %v2146_v27 = vadd.f32 %v2072_v58, %v1912_v24  ;;  %v2079_v36 = vpop.f32.mrf.mxu0  ;;  %v2231_v58 = vmul.f32 %v7331_v33, %v7326_v34 }
 0x15c   : > { %v7328_v10 = vadd.f32 %v2338_v45, %v2146_v27  ;;  %v1965_v45 = vld [vmem:[#allocation2 + $0xe0] sm:$0xff]  ;;  %v2250_v57 = vpack.c.bf16 %v2231_v58, %v7338_v17 }
 0x15d   : > { %v1574_v13 = vpop.f32.mrf.mxu2  ;;  %v1984_v27 = vpack.c.bf16 %v1965_v45, %v1964_v31 }
 0x15e   : > { %9052 = vst [vmem:[#allocation79_spill] sm:$0xff] %v7328_v10  ;;  %v1647_v16 = vadd.f32 %v1574_v13, %v7067_v26  ;;  %5925 = vmatmul.msk.bf16.gmra.mxu3 %vm865_vm0, %v1749_v19  ;;  %v252_v26 = vadd.s32 216, %v6596_v5  ;;  %v1698_v10 = vld [vmem:[#allocation2 + $0xd7] sm:$0xff] }
 0x160   : > { %v1913_v22 = vadd.f32 %v1840_v49, %v1647_v16  ;;  %v450_v49 = vand.u32 15, %v252_v26 }
 0x161   : > { %v1843_v23 = vpop.f32.mrf.mxu3  ;;  %v2348_v38 = vpop.f32.mrf.mxu1 }
 0x162   : > { %5897 = vmatmul.msk.bf16.gmra.mxu2 %vm865_vm0, %v1483_v29  ;;  %v2147_v24 = vadd.f32 %v2074_v35, %v1913_v22  ;;  %v2082_v8 = vpop.f32.mrf.mxu0  ;;  %v1730_v35 = vmul.f32 %v6878_v15, %v1698_v10  ;;  %v1699_v29 = vld [vmem:[#allocation2 + $0xdf] sm:$0xff]  ;;  %vm764_vm15 = vcmp.lt.s32.totalorder %v450_v49, 15  ;;  %v1966_v49 = vld [vmem:[#allocation2 + $0xe8] sm:$0xff] }
 0x164   : > { %v7343_v13 = vadd.f32 %v2340_v21, %v2147_v24  ;;  %5982 = vmatmul.msk.bf16.gmra.mxu1 %vm865_vm0, %v2250_v57  ;;  %v1465_v21 = vmul.f32 %v7331_v33, %v7301_v50  ;;  %v1750_v31 = vpack.c.bf16 %v1699_v29, %v1730_v35  ;;  %v7368_v35 = vld [vmem:[%s6620_s30 + $0xf0] sm:$0xff] }
 0x165   : > { %v1577_v19 = vpop.f32.mrf.mxu2  ;;  %5954 = vmatmul.msk.bf16.gmra.mxu0 %vm865_vm0, %v1984_v27  ;;  %v7365_v27 = vld [vmem:[#allocation2 + $0xe9] sm:$0xff]  ;;  %9056 = vst [vmem:[#allocation83_spill] sm:$0xff] %v7368_v35 }
 0x166   : > { %v1648_v44 = vadd.f32 %v1577_v19, %v7083_v52  ;;  %v7353_v52 = vld [vmem:[#allocation2 + $0xf1] sm:$0xff]  ;;  %v1484_v10 = vpack.c.bf16 %v1465_v21, %v7313_v6  ;;  %v254_v21 = vadd.s32 232, %v6596_v5  ;;  %899 = vst.msk [vmem:[#allocation2 + $0x108] sm:$0xff] %vm865_vm0, %v7368_v35 }
 0x168   : > { %v1914_v16 = vadd.f32 %v1843_v23, %v1648_v44  ;;  %v7358_v44 = vsel %vm764_vm15, 1.0, %v9020_v46 }
 0x169   : > { %v1845_v58 = vpop.f32.mrf.mxu3  ;;  %v7351_v45 = vpop.f32.mrf.mxu1  ;;  %9055 = vst [vmem:[#allocation82_spill] sm:$0xff] %v7358_v44  ;;  %v2233_v23 = vmul.f32 %v7358_v44, %v7353_v52 }
 0x16a   : > { %v2148_v22 = vadd.f32 %v2077_v25, %v1914_v16  ;;  %9054 = vst [vmem:[#allocation81_spill] sm:$0xff] %v7351_v45  ;;  %v2084_v57 = vpop.f32.mrf.mxu0  ;;  %v7371_v16 = vld [vmem:[%s6620_s30 + $0xf8] sm:$0xff]  ;;  %v1700_v45 = vld [vmem:[#allocation2 + $0xe7] sm:$0xff] }
 0x16b   : > { %9057 = vst [vmem:[#allocation84_spill] sm:$0xff] %v7371_v16 }
 0x16c   : > { %v7355_v24 = vadd.f32 %v2343_v41, %v2148_v22  ;;  %v1967_v41 = vld [vmem:[#allocation2 + $0xf0] sm:$0xff]  ;;  %v2251_v22 = vpack.c.bf16 %v2233_v23, %v7365_v27  ;;  %900 = vst.msk [vmem:[#allocation2 + $0x110] sm:$0xff] %vm865_vm0, %v7371_v16  ;;  %v1732_v23 = vmul.f32 %v6916_v55, %v1700_v45 }
 0x16d   : > { %v1579_v26 = vpop.f32.mrf.mxu2 }
 0x16e   : > { %v1649_v25 = vadd.f32 %v1579_v26, %v7097_v47  ;;  %5926 = vmatmul.msk.bf16.gmra.mxu3 %vm865_vm0, %v1750_v31  ;;  %v1985_v31 = vpack.c.bf16 %v1967_v41, %v1966_v49  ;;  %v1701_v49 = vld [vmem:[#allocation2 + $0xef] sm:$0xff] }
 0x170   : > { %v1915_v19 = vadd.f32 %v1845_v58, %v1649_v25 }
 0x171   : > { %v1848_v29 = vpop.f32.mrf.mxu3  ;;  %v2353_v26 = vpop.f32.mrf.mxu1 }
 0x172   : > { %5898 = vmatmul.msk.bf16.gmra.mxu2 %vm865_vm0, %v1484_v10  ;;  %v2149_v47 = vadd.f32 %v2079_v36, %v1915_v19  ;;  %v2087_v25 = vpop.f32.mrf.mxu0  ;;  %v464_v36 = vand.u32 15, %v254_v21 }
 0x174   : > { %v7380_v58 = vadd.f32 %v2345_v62, %v2149_v47  ;;  %5983 = vmatmul.msk.bf16.gmra.mxu1 %vm865_vm0, %v2251_v22  ;;  %v1467_v62 = vmul.f32 %v7358_v44, %v7326_v34  ;;  %vm766_vm1 = vcmp.lt.s32.totalorder %v464_v36, 15  ;;  %v1751_v47 = vpack.c.bf16 %v1701_v49, %v1732_v23  ;;  %v1968_v36 = vld [vmem:[#allocation2 + $0xf8] sm:$0xff] }
 0x175   : > { %v1582_v15 = vpop.f32.mrf.mxu2  ;;  %5955 = vmatmul.msk.bf16.gmra.mxu0 %vm865_vm0, %v1985_v31  ;;  %v7395_v21 = vsel %vm766_vm1, 1.0, %v9020_v46  ;;  %v7402_v31 = vld [vmem:[#allocation2 + $0xf9] sm:$0xff] }
 0x176   : > { %9058 = vst [vmem:[#allocation85_spill] sm:$0xff] %v7380_v58  ;;  %v1650_v10 = vadd.f32 %v1582_v15, %v7113_v39  ;;  %v7390_v58 = vld [vmem:[#allocation2 + $0x101] sm:$0xff] }
 0x177   : > { %9060 = vst [vmem:[#allocation87_spill] sm:$0xff] %v7395_v21 }
 0x178   : > { %v1916_v19 = vadd.f32 %v1848_v29, %v1650_v10  ;;  %v2235_v29 = vmul.f32 %v7395_v21, %v7390_v58 }
 0x179   : > { %v1850_v41 = vpop.f32.mrf.mxu3  ;;  %v7388_v16 = vpop.f32.mrf.mxu1 }
 0x17a   : > { %v2150_v35 = vadd.f32 %v2082_v8, %v1916_v19  ;;  %9059 = vst [vmem:[#allocation86_spill] sm:$0xff] %v7388_v16  ;;  %v2089_v39 = vpop.f32.mrf.mxu0  ;;  %v1485_v8 = vpack.c.bf16 %v1467_v62, %v7338_v17  ;;  %v2252_v19 = vpack.c.bf16 %v2235_v29, %v7402_v31  ;;  %v1702_v16 = vld [vmem:[#allocation2 + $0xf7] sm:$0xff] }
 0x17c   : > { %v7392_v15 = vadd.f32 %v2348_v38, %v2150_v35  ;;  %v1969_v38 = vld [vmem:[#allocation2 + $0x100] sm:$0xff] }
 0x17d   : > { %v1584_v22 = vpop.f32.mrf.mxu2  ;;  %v1986_v49 = vpack.c.bf16 %v1969_v38, %v1968_v36 }
 0x17e   : > { %v1651_v45 = vadd.f32 %v1584_v22, %v7127_v30  ;;  %5927 = vmatmul.msk.bf16.gmra.mxu3 %vm865_vm0, %v1751_v47  ;;  %v256_v30 = vadd.s32 248, %v6596_v5  ;;  %v1469_v5 = vmul.f32 %v7395_v21, %v7353_v52 }
 0x180   : > { %v1917_v10 = vadd.f32 %v1850_v41, %v1651_v45  ;;  %v478_v41 = vand.u32 15, %v256_v30  ;;  %v1734_v45 = vmul.f32 %v6941_v3, %v1702_v16 }
 0x181   : > { %v1853_v35 = vpop.f32.mrf.mxu3  ;;  %v2358_v62 = vpop.f32.mrf.mxu1 }
 0x182   : > { %5899 = vmatmul.msk.bf16.gmra.mxu2 %vm865_vm0, %v1485_v8  ;;  %v7405_v23 = vadd.f32 %v2084_v57, %v1917_v10  ;;  %v2092_v22 = vpop.f32.mrf.mxu0  ;;  %v1703_v8 = vld [vmem:[#allocation2 + $0xff] sm:$0xff]  ;;  %vm768_vm2 = vcmp.lt.s32.totalorder %v478_v41, 15  ;;  %v1970_v41 = vld [vmem:[#allocation2 + $0x108] sm:$0xff] }
 0x183   : > { %v1752_v36 = vpack.c.bf16 %v1703_v8, %v1734_v45  ;;  %v7422_v30 = vsel %vm768_vm2, 1.0, %v9020_v46 }
 0x184   : > { %9061 = vst [vmem:[#allocation88_spill] sm:$0xff] %v7405_v23  ;;  %5984 = vmatmul.msk.bf16.gmra.mxu1 %vm865_vm0, %v2252_v19  ;;  %v7417_v23 = vld [vmem:[#allocation2 + $0x111] sm:$0xff] }
 0x185   : > { %v1587_v55 = vpop.f32.mrf.mxu2  ;;  %5956 = vmatmul.msk.bf16.gmra.mxu0 %vm865_vm0, %v1986_v49  ;;  %9063 = vst [vmem:[#allocation90_spill] sm:$0xff] %v7422_v30  ;;  %v7429_v49 = vld [vmem:[#allocation2 + $0x109] sm:$0xff] }
 0x186   : > { %v1652_v47 = vadd.f32 %v1587_v55, %v7143_v60 }
 0x188   : > { %v1918_v57 = vadd.f32 %v1853_v35, %v1652_v47  ;;  %v2237_v35 = vmul.f32 %v7422_v30, %v7417_v23 }
 0x189   : > { %v1855_v10 = vpop.f32.mrf.mxu3  ;;  %v7415_v38 = vpop.f32.mrf.mxu1 }
 0x18a   : > { %v2152_v29 = vadd.f32 %v2087_v25, %v1918_v57  ;;  %9062 = vst [vmem:[#allocation89_spill] sm:$0xff] %v7415_v38  ;;  %v2094_v60 = vpop.f32.mrf.mxu0  ;;  %v1486_v25 = vpack.c.bf16 %v1469_v5, %v7365_v27  ;;  %v2253_v8 = vpack.c.bf16 %v2237_v35, %v7429_v49  ;;  %v1471_v35 = vmul.f32 %v7422_v30, %v7390_v58 }
 0x18c   : > { %v7419_v55 = vadd.f32 %v2353_v26, %v2152_v29  ;;  %v1971_v26 = vld [vmem:[#allocation2 + $0x110] sm:$0xff] }
 0x18d   : > { %v1589_v19 = vpop.f32.mrf.mxu2 }
 0x18e   : > { %v1653_v16 = vadd.f32 %v1589_v19, %v7160_v40  ;;  %5928 = vmatmul.msk.bf16.gmra.mxu3 %vm865_vm0, %v1752_v36  ;;  %v1987_v40 = vpack.c.bf16 %v1971_v26, %v1970_v41  ;;  %v1704_v19 = vld [vmem:[#allocation2 + $0x107] sm:$0xff] }
 0x190   : > { %v1919_v47 = vadd.f32 %v1855_v10, %v1653_v16  ;;  %v1736_v10 = vmul.f32 %v6973_v32, %v1704_v19  ;;  %v1705_v16 = vld [vmem:[#allocation2 + $0x10f] sm:$0xff]  ;;  %v6342_v19 = vld [vmem:[%s8836_s3] sm:$0xff] }
 0x191   : > { %v1858_v45 = vpop.f32.mrf.mxu3  ;;  %v2363_v29 = vpop.f32.mrf.mxu1  ;;  %3431 = vmatpush.bf16.msra.mxu1 %v6342_v19  ;;  %v2943_v19 = vld [vmem:[#allocation2 + $0x41] sm:$0xff] }
 0x192   : > { %5900 = vmatmul.msk.bf16.gmra.mxu2 %vm865_vm0, %v1486_v25  ;;  %v7432_v57 = vadd.f32 %v2089_v39, %v1919_v47  ;;  %v2097_v5 = vpop.f32.mrf.mxu0  ;;  %v1753_v47 = vpack.c.bf16 %v1705_v16, %v1736_v10 }
 0x194   : > { %9064 = vst [vmem:[#allocation91_spill] sm:$0xff] %v7432_v57  ;;  %5985 = vmatmul.msk.bf16.gmra.mxu1 %vm865_vm0, %v2253_v8 }
 0x195   : > { %v1592_v38 = vpop.f32.mrf.mxu2  ;;  %5957 = vmatmul.msk.bf16.gmra.mxu0 %vm865_vm0, %v1987_v40  ;;  %v1487_v40 = vpack.c.bf16 %v1471_v35, %v7402_v31 }
 0x196   : > { %v1654_v3 = vadd.f32 %v1592_v38, %v7176_v59  ;;  %v2941_v59 = vld [vmem:[#allocation2 + $0x31] sm:$0xff] }
 0x198   : > { %v1920_v36 = vadd.f32 %v1858_v45, %v1654_v3  ;;  %v2973_v3 = vmul.f32 %v6983_v28, %v2941_v59  ;;  %v2940_v45 = vld [vmem:[#allocation2 + $0x29] sm:$0xff] }
 0x199   : > { %v1860_v25 = vpop.f32.mrf.mxu3  ;;  %v7441_v41 = vpop.f32.mrf.mxu1  ;;  %v2706_v59 = vld [vmem:[#allocation2 + $0x28] sm:$0xff] }
 0x19a   : > { %v2154_v39 = vadd.f32 %v2092_v22, %v1920_v36  ;;  %9065 = vst [vmem:[#allocation92_spill] sm:$0xff] %v7441_v41  ;;  %v2099_v57 = vpop.f32.mrf.mxu0  ;;  %v3004_v36 = vpack.c.bf16 %v2973_v3, %v2940_v45 }
 0x19c   : > { %v7443_v26 = vadd.f32 %v2358_v62, %v2154_v39 }
 0x19d   : > { %v1594_v38 = vpop.f32.mrf.mxu2 }
 0x19e   : > { %v1655_v8 = vadd.f32 %v1594_v38, %v7193_v7  ;;  %5929 = vmatmul.msk.bf16.gmra.mxu3 %vm865_vm0, %v1753_v47  ;;  %v2707_v38 = vld [vmem:[#allocation2 + $0x30] sm:$0xff] }
 0x19f   : > { %v2738_v32 = vpack.c.bf16 %v2707_v38, %v2706_v59 }
 0x1a0   : > { %v1921_v22 = vadd.f32 %v1860_v25, %v1655_v8  ;;  %v2440_v25 = vld [vmem:[#allocation2 + $0x27] sm:$0xff] }
 0x1a1   : > { %v1863_v62 = vpop.f32.mrf.mxu3  ;;  %v2368_v7 = vpop.f32.mrf.mxu1 }
 0x1a2   : > { %5901 = vmatmul.msk.bf16.gmra.mxu2 %vm865_vm0, %v1487_v40  ;;  %v7453_v10 = vadd.f32 %v2094_v60, %v1921_v22  ;;  %v2102_v16 = vpop.f32.mrf.mxu0  ;;  %v2472_v40 = vmul.f32 %v6628_v11, %v2440_v25  ;;  %v2441_v60 = vld [vmem:[#allocation2 + $0x2f] sm:$0xff] }
 0x1a4   : > { %9066 = vst [vmem:[#allocation93_spill] sm:$0xff] %v7453_v10 }
 0x1a5   : > { %v1597_v39 = vpop.f32.mrf.mxu2  ;;  %6054 = vmatmul.msk.bf16.vlgmr.msra.gmra.mxu0 %vm865_vm0, %v3004_v36  ;;  %v2504_v36 = vpack.c.bf16 %v2441_v60, %v2472_v40  ;;  %v2709_v40 = vld [vmem:[#allocation2 + $0x40] sm:$0xff] }
 0x1a6   : > { %v1656_v35 = vadd.f32 %v1597_v39, %v7213_v14 }
 0x1a8   : > { %v1922_v47 = vadd.f32 %v1863_v62, %v1656_v35  ;;  %v2975_v62 = vmul.f32 %v7006_v4, %v2943_v19 }
 0x1a9   : > { %v1865_v8 = vpop.f32.mrf.mxu3  ;;  %v7458_v22 = vpop.f32.mrf.mxu1 }
 0x1aa   : > { %v2156_v41 = vadd.f32 %v2097_v5, %v1922_v47  ;;  %9067 = vst [vmem:[#allocation94_spill] sm:$0xff] %v7458_v22  ;;  %v2104_v45 = vpop.f32.mrf.mxu0  ;;  %v2942_v5 = vld [vmem:[#allocation2 + $0x39] sm:$0xff] }
 0x1ab   : > { %v3005_v47 = vpack.c.bf16 %v2975_v62, %v2942_v5  ;;  %v2945_v5 = vld [vmem:[#allocation2 + $0x51] sm:$0xff] }
 0x1ac   : > { %v7460_v3 = vadd.f32 %v2363_v29, %v2156_v41 }
 0x1ad   : > { %v1599_v10 = vpop.f32.mrf.mxu2 }
 0x1ae   : > { %v1657_v14 = vadd.f32 %v1599_v10, %v7233_v54  ;;  %6026 = vmatmul.msk.bf16.vlgmr.msra.gmra.mxu3 %vm865_vm0, %v2738_v32  ;;  %v2442_v54 = vld [vmem:[#allocation2 + $0x37] sm:$0xff] }
 0x1af   : > { %v2708_v32 = vld [vmem:[#allocation2 + $0x38] sm:$0xff]  ;;  %v2474_v19 = vmul.f32 %v6696_v37, %v2442_v54 }
 0x1b0   : > { %v1923_v39 = vadd.f32 %v1865_v8, %v1657_v14  ;;  %v2739_v14 = vpack.c.bf16 %v2709_v40, %v2708_v32 }
 0x1b1   : > { %v1868_v35 = vpop.f32.mrf.mxu3  ;;  %v2373_v29 = vpop.f32.mrf.mxu1 }
 0x1b2   : > { %5998 = vmatmul.msk.bf16.vlgmr.msra.gmra.mxu2 %vm865_vm0, %v2504_v36  ;;  %v7466_v25 = vadd.f32 %v2099_v57, %v1923_v39  ;;  %v2107_v41 = vpop.f32.mrf.mxu0  ;;  %v2443_v36 = vld [vmem:[#allocation2 + $0x3f] sm:$0xff] }
 0x1b4   : > { %9068 = vst [vmem:[#allocation95_spill] sm:$0xff] %v7466_v25  ;;  %v2950_v25 = vld [vmem:[#allocation2 + $0x79] sm:$0xff] }
 0x1b5   : > { %v1602_v59 = vpop.f32.mrf.mxu2  ;;  %6055 = vmatmul.msk.bf16.gmra.mxu0 %vm865_vm0, %v3005_v47  ;;  %v2505_v47 = vpack.c.bf16 %v2443_v36, %v2474_v19  ;;  %v2710_v19 = vld [vmem:[#allocation2 + $0x48] sm:$0xff] }
 0x1b6   : > { %v1658_v38 = vadd.f32 %v1602_v59, %v7026_v53 }
 0x1b8   : > { %v1924_v10 = vadd.f32 %v1868_v35, %v1658_v38  ;;  %v2977_v35 = vmul.f32 %v7032_v18, %v2945_v5 }
 0x1b9   : > { %v1870_v60 = vpop.f32.mrf.mxu3  ;;  %v7471_v57 = vpop.f32.mrf.mxu1 }
 0x1ba   : > { %v2158_v8 = vadd.f32 %v2102_v16, %v1924_v10  ;;  %9069 = vst [vmem:[#allocation96_spill] sm:$0xff] %v7471_v57  ;;  %v2109_v39 = vpop.f32.mrf.mxu0  ;;  %v2944_v16 = vld [vmem:[#allocation2 + $0x49] sm:$0xff] }
 0x1bb   : > { %v3006_v10 = vpack.c.bf16 %v2977_v35, %v2944_v16  ;;  %v9073_v57 = vld [vmem:[#allocation57_spill] sm:$0xff] }
 0x1bc   : > { %v7473_v62 = vadd.f32 %v2368_v7, %v2158_v8 }
 0x1bd   : > { %v1604_v22 = vpop.f32.mrf.mxu2 }
 0x1be   : > { %9070 = vst [vmem:[#allocation97_spill] sm:$0xff] %v7473_v62  ;;  %v1659_v53 = vadd.f32 %v1604_v22, %v7041_v12  ;;  %6027 = vmatmul.msk.bf16.gmra.mxu3 %vm865_vm0, %v2739_v14  ;;  %v2444_v12 = vld [vmem:[#allocation2 + $0x47] sm:$0xff]  ;;  %v2711_v14 = vld [vmem:[#allocation2 + $0x50] sm:$0xff]  ;;  %v9085_v62 = vld [vmem:[#allocation62_spill] sm:$0xff] }
 0x1bf   : > { %v2476_v5 = vmul.f32 %v6746_v1, %v2444_v12 }
 0x1c0   : > { %v1925_v59 = vadd.f32 %v1870_v60, %v1659_v53  ;;  %v2740_v53 = vpack.c.bf16 %v2711_v14, %v2710_v19 }
 0x1c1   : > { %v1873_v38 = vpop.f32.mrf.mxu3  ;;  %v2378_v40 = vpop.f32.mrf.mxu1 }
 0x1c2   : > { %5999 = vmatmul.msk.bf16.gmra.mxu2 %vm865_vm0, %v2505_v47  ;;  %v7479_v54 = vadd.f32 %v2104_v45, %v1925_v59  ;;  %v2112_v7 = vpop.f32.mrf.mxu0  ;;  %v2445_v47 = vld [vmem:[#allocation2 + $0x4f] sm:$0xff]  ;;  %v2947_v59 = vld [vmem:[#allocation2 + $0x61] sm:$0xff] }
 0x1c4   : > { %9071 = vst [vmem:[#allocation98_spill] sm:$0xff] %v7479_v54 }
 0x1c5   : > { %v1607_v32 = vpop.f32.mrf.mxu2  ;;  %6056 = vmatmul.msk.bf16.gmra.mxu0 %vm865_vm0, %v3006_v10 }
 0x1c6   : > { %v1660_v8 = vadd.f32 %v1607_v32, %v7055_v2  ;;  %v2506_v2 = vpack.c.bf16 %v2445_v47, %v2476_v5  ;;  %v2712_v5 = vld [vmem:[#allocation2 + $0x58] sm:$0xff] }
 0x1c8   : > { %v1926_v22 = vadd.f32 %v1873_v38, %v1660_v8  ;;  %v2979_v38 = vmul.f32 %v7061_v61, %v2947_v59 }
 0x1c9   : > { %v1875_v36 = vpop.f32.mrf.mxu3  ;;  %v7489_v10 = vpop.f32.mrf.mxu1 }
 0x1ca   : > { %v2160_v60 = vadd.f32 %v2107_v41, %v1926_v22  ;;  %v2114_v35 = vpop.f32.mrf.mxu0  ;;  %9074 = vst [vmem:[#allocation57_spill] sm:$0xff] %v7489_v10  ;;  %v2946_v41 = vld [vmem:[#allocation2 + $0x59] sm:$0xff] }
 0x1cb   : > { %v2447_v10 = vld [vmem:[#allocation2 + $0x5f] sm:$0xff] }
 0x1cc   : > { %v7484_v45 = vadd.f32 %v2373_v29, %v2160_v60  ;;  %v3007_v29 = vpack.c.bf16 %v2979_v38, %v2946_v41 }
 0x1cd   : > { %v1609_v16 = vpop.f32.mrf.mxu2 }
 0x1ce   : > { %9072 = vst [vmem:[#allocation99_spill] sm:$0xff] %v7484_v45  ;;  %v1661_v54 = vadd.f32 %v1609_v16, %v9073_v57  ;;  %6028 = vmatmul.msk.bf16.gmra.mxu3 %vm865_vm0, %v2740_v53  ;;  %v2446_v57 = vld [vmem:[#allocation2 + $0x57] sm:$0xff]  ;;  %v2713_v53 = vld [vmem:[#allocation2 + $0x60] sm:$0xff]  ;;  %v2948_v45 = vld [vmem:[#allocation2 + $0x69] sm:$0xff] }
 0x1d0   : > { %v1927_v32 = vadd.f32 %v1875_v36, %v1661_v54  ;;  %v9076_v36 = vld [vmem:[#allocation32_spill] sm:$0xff] }
 0x1d1   : > { %v1878_v8 = vpop.f32.mrf.mxu3  ;;  %v2383_v47 = vpop.f32.mrf.mxu1  ;;  %v2478_v16 = vmul.f32 %v9076_v36, %v2446_v57 }
 0x1d2   : > { %6000 = vmatmul.msk.bf16.gmra.mxu2 %vm865_vm0, %v2506_v2  ;;  %v7492_v12 = vadd.f32 %v2109_v39, %v1927_v32  ;;  %v2117_v22 = vpop.f32.mrf.mxu0  ;;  %v2741_v2 = vpack.c.bf16 %v2713_v53, %v2712_v5  ;;  %v2949_v32 = vld [vmem:[#allocation2 + $0x71] sm:$0xff] }
 0x1d4   : > { %9075 = vst [vmem:[#allocation100_spill] sm:$0xff] %v7492_v12  ;;  %v9078_v12 = vld [vmem:[#allocation59_spill] sm:$0xff] }
 0x1d5   : > { %v1612_v19 = vpop.f32.mrf.mxu2  ;;  %6057 = vmatmul.msk.bf16.gmra.mxu0 %vm865_vm0, %v3007_v29 }
 0x1d6   : > { %v1662_v14 = vadd.f32 %v1612_v19, %v7085_v42  ;;  %v2507_v19 = vpack.c.bf16 %v2447_v10, %v2478_v16  ;;  %v2448_v10 = vld [vmem:[#allocation2 + $0x67] sm:$0xff] }
 0x1d7   : > { %v2714_v16 = vld [vmem:[#allocation2 + $0x68] sm:$0xff] }
 0x1d8   : > { %v1928_v60 = vadd.f32 %v1878_v8, %v1662_v14  ;;  %v9079_v8 = vld [vmem:[#allocation58_spill] sm:$0xff] }
 0x1d9   : > { %v1880_v59 = vpop.f32.mrf.mxu3  ;;  %v2981_v29 = vmul.f32 %v9079_v8, %v2949_v32 }
 0x1da   : > { %v2162_v54 = vadd.f32 %v2112_v7, %v1928_v60  ;;  %v2119_v38 = vpop.f32.mrf.mxu0 }
 0x1db   : > { %v3008_v60 = vpack.c.bf16 %v2981_v29, %v2948_v45  ;;  %v2951_v29 = vld [vmem:[#allocation2 + $0x81] sm:$0xff] }
 0x1dc   : > { %v7497_v39 = vadd.f32 %v2378_v40, %v2162_v54  ;;  %v7505_v40 = vpop.f32.mrf.mxu1  ;;  %v9082_v54 = vld [vmem:[#allocation60_spill] sm:$0xff] }
 0x1dd   : > { %v1614_v41 = vpop.f32.mrf.mxu2  ;;  %9081 = vst [vmem:[#allocation102_spill] sm:$0xff] %v7505_v40 }
 0x1de   : > { %9077 = vst [vmem:[#allocation101_spill] sm:$0xff] %v7497_v39  ;;  %v1663_v42 = vadd.f32 %v1614_v41, %v9078_v12  ;;  %6029 = vmatmul.msk.bf16.gmra.mxu3 %vm865_vm0, %v2741_v2  ;;  %v2715_v2 = vld [vmem:[#allocation2 + $0x70] sm:$0xff]  ;;  %v9083_v41 = vld [vmem:[#allocation38_spill] sm:$0xff] }
 0x1e0   : > { %v1929_v14 = vadd.f32 %v1880_v59, %v1663_v42  ;;  %v2480_v42 = vmul.f32 %v9083_v41, %v2448_v10 }
 0x1e1   : > { %v1883_v7 = vpop.f32.mrf.mxu3 }
 0x1e2   : > { %6001 = vmatmul.msk.bf16.gmra.mxu2 %vm865_vm0, %v2507_v19  ;;  %v7503_v57 = vadd.f32 %v2114_v35, %v1929_v14  ;;  %v2122_v5 = vpop.f32.mrf.mxu0  ;;  %v2742_v19 = vpack.c.bf16 %v2715_v2, %v2714_v16  ;;  %v2449_v35 = vld [vmem:[#allocation2 + $0x6f] sm:$0xff]  ;;  %v9088_v2 = vld [vmem:[#allocation63_spill] sm:$0xff] }
 0x1e4   : > { %9080 = vst [vmem:[#allocation59_spill] sm:$0xff] %v7503_v57  ;;  %v2388_v57 = vpop.f32.mrf.mxu1 }
 0x1e5   : > { %v1617_v53 = vpop.f32.mrf.mxu2  ;;  %6058 = vmatmul.msk.bf16.gmra.mxu0 %vm865_vm0, %v3008_v60 }
 0x1e6   : > { %v1664_v39 = vadd.f32 %v1617_v53, %v9082_v54  ;;  %v2508_v54 = vpack.c.bf16 %v2449_v35, %v2480_v42  ;;  %v2717_v35 = vld [vmem:[#allocation2 + $0x80] sm:$0xff] }
 0x1e8   : > { %v1930_v12 = vadd.f32 %v1883_v7, %v1664_v39  ;;  %v9086_v39 = vld [vmem:[#allocation61_spill] sm:$0xff] }
 0x1e9   : > { %v1885_v59 = vpop.f32.mrf.mxu3  ;;  %v2983_v7 = vmul.f32 %v9086_v39, %v2951_v29  ;;  %v2952_v39 = vld [vmem:[#allocation2 + $0x89] sm:$0xff] }
 0x1ea   : > { %v2164_v32 = vadd.f32 %v2117_v22, %v1930_v12  ;;  %v2124_v45 = vpop.f32.mrf.mxu0 }
 0x1ec   : > { %v7510_v14 = vadd.f32 %v2383_v47, %v2164_v32  ;;  %v3009_v47 = vpack.c.bf16 %v2983_v7, %v2950_v25  ;;  %v2953_v7 = vld [vmem:[#allocation2 + $0x91] sm:$0xff] }
 0x1ed   : > { %v1619_v40 = vpop.f32.mrf.mxu2 }
 0x1ee   : > { %9084 = vst [vmem:[#allocation60_spill] sm:$0xff] %v7510_v14  ;;  %v1665_v53 = vadd.f32 %v1619_v40, %v9085_v62  ;;  %6030 = vmatmul.msk.bf16.gmra.mxu3 %vm865_vm0, %v2742_v19  ;;  %v2450_v62 = vld [vmem:[#allocation2 + $0x77] sm:$0xff]  ;;  %v7520_v40 = vpop.f32.mrf.mxu1 }
 0x1ef   : > { %9089 = vst [vmem:[#allocation63_spill] sm:$0xff] %v7520_v40  ;;  %v2716_v19 = vld [vmem:[#allocation2 + $0x78] sm:$0xff]  ;;  %v9093_v40 = vld [vmem:[#allocation64_spill] sm:$0xff] }
 0x1f0   : > { %v1931_v60 = vadd.f32 %v1885_v59, %v1665_v53  ;;  %v9090_v53 = vld [vmem:[#allocation44_spill] sm:$0xff]  ;;  %v2743_v14 = vpack.c.bf16 %v2717_v35, %v2716_v19  ;;  %v9095_v35 = vld [vmem:[#allocation66_spill] sm:$0xff] }
 0x1f1   : > { %v1888_v22 = vpop.f32.mrf.mxu3 }
 0x1f2   : > { %6002 = vmatmul.msk.bf16.gmra.mxu2 %vm865_vm0, %v2508_v54  ;;  %v7516_v10 = vadd.f32 %v2119_v38, %v1931_v60  ;;  %v2127_v12 = vpop.f32.mrf.mxu0  ;;  %v2482_v54 = vmul.f32 %v9090_v53, %v2450_v62  ;;  %v2451_v38 = vld [vmem:[#allocation2 + $0x7f] sm:$0xff] }
 0x1f4   : > { %9087 = vst [vmem:[#allocation62_spill] sm:$0xff] %v7516_v10 }
 0x1f5   : > { %v1622_v16 = vpop.f32.mrf.mxu2  ;;  %6059 = vmatmul.msk.bf16.gmra.mxu0 %vm865_vm0, %v3009_v47  ;;  %v2509_v47 = vpack.c.bf16 %v2451_v38, %v2482_v54  ;;  %v2719_v38 = vld [vmem:[#allocation2 + $0x90] sm:$0xff] }
 0x1f6   : > { %v1666_v32 = vadd.f32 %v1622_v16, %v9088_v2  ;;  %v9092_v16 = vld [vmem:[#allocation65_spill] sm:$0xff]  ;;  %v2393_v8 = vpop.f32.mrf.mxu1 }
 0x1f8   : > { %v1932_v42 = vadd.f32 %v1888_v22, %v1666_v32  ;;  %v2985_v22 = vmul.f32 %v9093_v40, %v2953_v7 }
 0x1f9   : > { %v1890_v59 = vpop.f32.mrf.mxu3 }
 0x1fa   : > { %v2166_v29 = vadd.f32 %v2122_v5, %v1932_v42  ;;  %v2129_v25 = vpop.f32.mrf.mxu0 }
 0x1fc   : > { %v7523_v60 = vadd.f32 %v2388_v57, %v2166_v29  ;;  %v3010_v57 = vpack.c.bf16 %v2985_v22, %v2952_v39 }
 0x1fd   : > { %v1624_v10 = vpop.f32.mrf.mxu2 }
 0x1fe   : > { %9091 = vst [vmem:[#allocation103_spill] sm:$0xff] %v7523_v60  ;;  %v1667_v2 = vadd.f32 %v1624_v10, %v9092_v16  ;;  %6031 = vmatmul.msk.bf16.gmra.mxu3 %vm865_vm0, %v2743_v14  ;;  %v2452_v10 = vld [vmem:[#allocation2 + $0x87] sm:$0xff]  ;;  %v9096_v16 = vld [vmem:[#allocation49_spill] sm:$0xff]  ;;  %v7534_v40 = vpop.f32.mrf.mxu1 }
 0x1ff   : > { %v2718_v14 = vld [vmem:[#allocation2 + $0x88] sm:$0xff]  ;;  %9097 = vst [vmem:[#allocation66_spill] sm:$0xff] %v7534_v40 }
 0x200   : > { %v1933_v32 = vadd.f32 %v1890_v59, %v1667_v2  ;;  %v2484_v2 = vmul.f32 %v9096_v16, %v2452_v10  ;;  %v2744_v60 = vpack.c.bf16 %v2719_v38, %v2718_v14  ;;  %v6345_v38 = vld [vmem:[%s8836_s3 + $0x18] sm:$0xff] }
 0x201   : > { %v1893_v5 = vpop.f32.mrf.mxu3  ;;  %3664 = vmatpush.bf16.msrb.mxu2 %v6345_v38  ;;  %v9104_v38 = vld [vmem:[#allocation71_spill] sm:$0xff] }
 0x202   : > { %6003 = vmatmul.msk.bf16.gmra.mxu2 %vm865_vm0, %v2509_v47  ;;  %v7529_v62 = vadd.f32 %v2124_v45, %v1933_v32  ;;  %v2132_v42 = vpop.f32.mrf.mxu0  ;;  %v2453_v47 = vld [vmem:[#allocation2 + $0x8f] sm:$0xff] }
 0x203   : > { %v9099_v32 = vld [vmem:[#allocation68_spill] sm:$0xff] }
 0x204   : > { %9094 = vst [vmem:[#allocation65_spill] sm:$0xff] %v7529_v62 }
 0x205   : > { %v1627_v19 = vpop.f32.mrf.mxu2  ;;  %6060 = vmatmul.msk.bf16.gmra.mxu0 %vm865_vm0, %v3010_v57 }
 0x206   : > { %v1668_v29 = vadd.f32 %v1627_v19, %v9095_v35  ;;  %v2510_v35 = vpack.c.bf16 %v2453_v47, %v2484_v2  ;;  %v2398_v2 = vpop.f32.mrf.mxu1  ;;  %v3281_v47 = vld [vmem:[#allocation3 + $0xf] sm:$0xff] }
 0x208   : > { %v1934_v54 = vadd.f32 %v1893_v5, %v1668_v29  ;;  %v9100_v5 = vld [vmem:[#allocation67_spill] sm:$0xff] }
 0x209   : > { %v1895_v7 = vpop.f32.mrf.mxu3  ;;  %v2987_v57 = vmul.f32 %v9100_v5, %v7219_v0  ;;  %v9102_v0 = vld [vmem:[#allocation69_spill] sm:$0xff] }
 0x20a   : > { %v2168_v59 = vadd.f32 %v2127_v12, %v1934_v54  ;;  %v2134_v39 = vpop.f32.mrf.mxu0 }
 0x20b   : > { %v3011_v54 = vpack.c.bf16 %v2987_v57, %v7235_v43  ;;  %v2720_v43 = vld [vmem:[#allocation2 + $0x98] sm:$0xff] }
 0x20c   : > { %v7536_v45 = vadd.f32 %v2393_v8, %v2168_v59  ;;  %v3280_v8 = vld [vmem:[#allocation3 + $0x7] sm:$0xff] }
 0x20d   : > { %v1629_v22 = vpop.f32.mrf.mxu2  ;;  %v3312_v59 = vmul.f32 %v6628_v11, %v3280_v8 }
 0x20e   : > { %9098 = vst [vmem:[#allocation104_spill] sm:$0xff] %v7536_v45  ;;  %v1669_v19 = vadd.f32 %v1629_v22, %v9099_v32  ;;  %6032 = vmatmul.msk.bf16.gmra.mxu3 %vm865_vm0, %v2744_v60 }
 0x20f   : > { %v3344_v22 = vpack.c.bf16 %v3281_v47, %v3312_v59 }
 0x210   : > { %v1935_v29 = vadd.f32 %v1895_v7, %v1669_v19  ;;  %v2721_v19 = vld [vmem:[#allocation2 + $0xa0] sm:$0xff] }
 0x211   : > { %v1898_v12 = vpop.f32.mrf.mxu3  ;;  %6078 = vmatmul.msk.bf16.vlgmr.msra.gmra.mxu1 %vm865_vm0, %v3344_v22  ;;  %v2745_v8 = vpack.c.bf16 %v2721_v19, %v2720_v43  ;;  %v6349_v19 = vld [vmem:[%s8836_s3 + $0x38] sm:$0xff] }
 0x212   : > { %6004 = vmatmul.msk.bf16.gmra.mxu2 %vm865_vm0, %v2510_v35  ;;  %v7543_v10 = vadd.f32 %v2129_v25, %v1935_v29  ;;  %v2137_v14 = vpop.f32.mrf.mxu0  ;;  %v2454_v25 = vld [vmem:[#allocation2 + $0x97] sm:$0xff]  ;;  %v9103_v29 = vld [vmem:[#allocation51_spill] sm:$0xff]  ;;  %4196 = vmatpush.bf16.msrb.mxu0 %v6349_v19 }
 0x213   : > { %v2486_v40 = vmul.f32 %v9103_v29, %v2454_v25 }
 0x214   : > { %9101 = vst [vmem:[#allocation68_spill] sm:$0xff] %v7543_v10  ;;  %v2455_v10 = vld [vmem:[#allocation2 + $0x9f] sm:$0xff] }
 0x215   : > { %v1632_v60 = vpop.f32.mrf.mxu2  ;;  %6061 = vmatmul.msk.bf16.gmra.mxu0 %vm865_vm0, %v3011_v54  ;;  %v2511_v47 = vpack.c.bf16 %v2455_v10, %v2486_v40  ;;  %v7561_v54 = vpop.f32.mrf.mxu1 }
 0x216   : > { %v1670_v7 = vadd.f32 %v1632_v60, %v9102_v0  ;;  %9105 = vst [vmem:[#allocation67_spill] sm:$0xff] %v7561_v54  ;;  %v9110_v54 = vld [vmem:[#allocation74_spill] sm:$0xff] }
 0x218   : > { %v1936_v32 = vadd.f32 %v1898_v12, %v1670_v7  ;;  %v6347_v12 = vld [vmem:[%s8836_s3 + $0x28] sm:$0xff] }
 0x219   : > { %v1900_v35 = vpop.f32.mrf.mxu3  ;;  %3930 = vmatpush.bf16.msrb.mxu3 %v6347_v12 }
 0x21a   : > { %v2170_v57 = vadd.f32 %v2132_v42, %v1936_v32  ;;  %v2139_v62 = vpop.f32.mrf.mxu0  ;;  %v9106_v42 = vld [vmem:[#allocation70_spill] sm:$0xff]  ;;  %v9108_v32 = vld [vmem:[#allocation72_spill] sm:$0xff] }
 0x21b   : > { %v2989_v0 = vmul.f32 %v9106_v42, %v7253_v9  ;;  %v6351_v9 = vld [vmem:[%s8836_s3 + $0x48] sm:$0xff] }
 0x21c   : > { %v7554_v45 = vadd.f32 %v2398_v2, %v2170_v57  ;;  %4430 = vmatpush.bf16.msrb.mxu1 %v6351_v9 }
 0x21d   : > { %v1634_v60 = vpop.f32.mrf.mxu2  ;;  %v3012_v40 = vpack.c.bf16 %v2989_v0, %v7263_v51  ;;  %v2403_v51 = vpop.f32.mrf.mxu1  ;;  %v2457_v0 = vld [vmem:[#allocation2 + $0xaf] sm:$0xff] }
 0x21e   : > { %v1671_v59 = vadd.f32 %v1634_v60, %v9104_v38  ;;  %6033 = vmatmul.msk.bf16.gmra.mxu3 %vm865_vm0, %v2745_v8  ;;  %v2723_v8 = vld [vmem:[#allocation2 + $0xb0] sm:$0xff] }
 0x220   : > { %v1937_v7 = vadd.f32 %v1900_v35, %v1671_v59  ;;  %v2456_v35 = vld [vmem:[#allocation2 + $0xa7] sm:$0xff]  ;;  %v9109_v59 = vld [vmem:[#allocation18_spill] sm:$0xff] }
 0x221   : > { %v1903_v2 = vpop.f32.mrf.mxu3 }
 0x222   : > { %6005 = vmatmul.msk.bf16.gmra.mxu2 %vm865_vm0, %v2511_v47  ;;  %v7566_v22 = vadd.f32 %v2134_v39, %v1937_v7  ;;  %v3094_v10 = vpop.f32.mrf.mxu0  ;;  %v2722_v39 = vld [vmem:[#allocation2 + $0xa8] sm:$0xff]  ;;  %v2488_v47 = vmul.f32 %v9109_v59, %v2456_v35 }
 0x223   : > { %v2746_v12 = vpack.c.bf16 %v2723_v8, %v2722_v39  ;;  %v9113_v8 = vld [vmem:[#allocation75_spill] sm:$0xff] }
 0x224   : > { %9107 = vst [vmem:[#allocation69_spill] sm:$0xff] %v7566_v22 }
 0x225   : > { %v1637_v25 = vpop.f32.mrf.mxu2  ;;  %6062 = vmatmul.msk.bf16.gmra.mxu0 %vm865_vm0, %v3012_v40  ;;  %v2512_v40 = vpack.c.bf16 %v2457_v0, %v2488_v47  ;;  %v2724_v47 = vld [vmem:[#allocation2 + $0xb8] sm:$0xff] }
 0x226   : > { %v1672_v43 = vadd.f32 %v1637_v25, %v9108_v32 }
 0x228   : > { %v1938_v57 = vadd.f32 %v1903_v2, %v1672_v43  ;;  %v9111_v2 = vld [vmem:[#allocation73_spill] sm:$0xff] }
 0x229   : > { %v1905_v60 = vpop.f32.mrf.mxu3  ;;  %v2991_v43 = vmul.f32 %v9111_v2, %v7276_v63 }
 0x22a   : > { %v2172_v38 = vadd.f32 %v2137_v14, %v1938_v57  ;;  %v3096_v25 = vpop.f32.mrf.mxu0 }
 0x22b   : > { %v3013_v35 = vpack.c.bf16 %v2991_v43, %v7288_v20 }
 0x22c   : > { %v7578_v7 = vadd.f32 %v2403_v51, %v2172_v38 }
 0x22d   : > { %v1639_v32 = vpop.f32.mrf.mxu2 }
 0x22e   : > { %v1673_v22 = vadd.f32 %v1639_v32, %v9110_v54  ;;  %6034 = vmatmul.msk.bf16.gmra.mxu3 %vm865_vm0, %v2746_v12  ;;  %v2458_v54 = vld [vmem:[#allocation2 + $0xb7] sm:$0xff]  ;;  %v2725_v12 = vld [vmem:[#allocation2 + $0xc0] sm:$0xff] }
 0x22f   : > { %v2747_v32 = vpack.c.bf16 %v2725_v12, %v2724_v47  ;;  %v9116_v12 = vld [vmem:[#allocation77_spill] sm:$0xff] }
 0x230   : > { %v1939_v19 = vadd.f32 %v1905_v60, %v1673_v22  ;;  %v9114_v22 = vld [vmem:[#allocation25_spill] sm:$0xff] }
 0x231   : > { %v2828_v9 = vpop.f32.mrf.mxu3  ;;  %v2490_v60 = vmul.f32 %v9114_v22, %v2458_v54 }
 0x232   : > { %6006 = vmatmul.msk.bf16.gmra.mxu2 %vm865_vm0, %v2512_v40  ;;  %v7585_v14 = vadd.f32 %v2139_v62, %v1939_v19  ;;  %v3099_v57 = vpop.f32.mrf.mxu0  ;;  %v2459_v62 = vld [vmem:[#allocation2 + $0xbf] sm:$0xff] }
 0x233   : > { %v2513_v43 = vpack.c.bf16 %v2459_v62, %v2490_v60  ;;  %v2726_v60 = vld [vmem:[#allocation2 + $0xc8] sm:$0xff]  ;;  %v9117_v62 = vld [vmem:[#allocation31_spill] sm:$0xff] }
 0x234   : > { %9112 = vst [vmem:[#allocation71_spill] sm:$0xff] %v7585_v14 }
 0x235   : > { %v2594_v39 = vpop.f32.mrf.mxu2  ;;  %6063 = vmatmul.msk.bf16.gmra.mxu0 %vm865_vm0, %v3013_v35 }
 0x236   : > { %v2674_v51 = vadd.f32 %v2594_v39, %v9113_v8 }
 0x238   : > { %v2908_v38 = vadd.f32 %v2828_v9, %v2674_v51  ;;  %v9115_v9 = vld [vmem:[#allocation76_spill] sm:$0xff] }
 0x239   : > { %v2830_v63 = vpop.f32.mrf.mxu3  ;;  %v2993_v35 = vmul.f32 %v9115_v9, %v7301_v50  ;;  %v2727_v50 = vld [vmem:[#allocation2 + $0xd0] sm:$0xff] }
 0x23a   : > { %v3174_v0 = vadd.f32 %v3094_v10, %v2908_v38  ;;  %v3101_v19 = vpop.f32.mrf.mxu0 }
 0x23b   : > { %v3014_v51 = vpack.c.bf16 %v2993_v35, %v7313_v6  ;;  %v2461_v6 = vld [vmem:[#allocation2 + $0xcf] sm:$0xff] }
 0x23c   : > { %v3206_v40 = vmax.f32 %v3174_v0, 0.0 }
 0x23d   : > { %v2596_v14 = vpop.f32.mrf.mxu2 }
 0x23e   : > { %3241 = vst.msk [vmem:[#allocation3 + $0x18] sm:$0xff] %vm865_vm0, %v3206_v40  ;;  %v2675_v20 = vadd.f32 %v2596_v14, %v7293_v48  ;;  %6035 = vmatmul.msk.bf16.gmra.mxu3 %vm865_vm0, %v2747_v32  ;;  %v2460_v14 = vld [vmem:[#allocation2 + $0xc7] sm:$0xff] }
 0x23f   : > { %v2492_v40 = vmul.f32 %v9117_v62, %v2460_v14 }
 0x240   : > { %v2909_v39 = vadd.f32 %v2830_v63, %v2675_v20  ;;  %v2748_v20 = vpack.c.bf16 %v2727_v50, %v2726_v60 }
 0x241   : > { %v2833_v8 = vpop.f32.mrf.mxu3 }
 0x242   : > { %v3175_v10 = vadd.f32 %v3096_v25, %v2909_v39  ;;  %6007 = vmatmul.msk.bf16.gmra.mxu2 %vm865_vm0, %v2513_v43  ;;  %v3104_v38 = vpop.f32.mrf.mxu0 }
 0x244   : > { %v3207_v54 = vmax.f32 %v3175_v10, 0.0 }
 0x245   : > { %v2599_v47 = vpop.f32.mrf.mxu2  ;;  %6064 = vmatmul.msk.bf16.gmra.mxu0 %vm865_vm0, %v3014_v51  ;;  %v3282_v63 = vld [vmem:[#allocation3 + $0x17] sm:$0xff] }
 0x246   : > { %3242 = vst.msk [vmem:[#allocation3 + $0x20] sm:$0xff] %vm865_vm0, %v3207_v54  ;;  %v2676_v48 = vadd.f32 %v2599_v47, %v9116_v12  ;;  %v3314_v35 = vmul.f32 %v6696_v37, %v3282_v63  ;;  %v7604_v10 = vmul.f32 %v6628_v11, %v3282_v63  ;;  %v2514_v47 = vpack.c.bf16 %v2461_v6, %v2492_v40  ;;  %v9119_v6 = vld [vmem:[#allocation79_spill] sm:$0xff] }
 0x248   : > { %v2910_v0 = vadd.f32 %v2833_v8, %v2676_v48  ;;  %v9118_v48 = vld [vmem:[#allocation78_spill] sm:$0xff] }
 0x249   : > { %v2835_v32 = vpop.f32.mrf.mxu3  ;;  %v2995_v14 = vmul.f32 %v9118_v48, %v7326_v34 }
 0x24a   : > { %v3176_v25 = vadd.f32 %v3099_v57, %v2910_v0  ;;  %v3106_v39 = vpop.f32.mrf.mxu0 }
 0x24c   : > { %v3208_v43 = vmax.f32 %v3176_v25, 0.0 }
 0x24d   : > { %v2601_v54 = vpop.f32.mrf.mxu2  ;;  %v7606_v51 = vld [vmem:[#allocation3 + $0x1f] sm:$0xff] }
 0x24e   : > { %3243 = vst.msk [vmem:[#allocation3 + $0x28] sm:$0xff] %vm865_vm0, %v3208_v43  ;;  %v2677_v8 = vadd.f32 %v2601_v54, %v7318_v56  ;;  %v3345_v57 = vpack.c.bf16 %v7606_v51, %v3314_v35  ;;  %6036 = vmatmul.msk.bf16.gmra.mxu3 %vm865_vm0, %v2748_v20  ;;  %v3015_v56 = vpack.c.bf16 %v2995_v14, %v7338_v17  ;;  %v2462_v20 = vld [vmem:[#allocation2 + $0xd7] sm:$0xff]  ;;  %v2729_v35 = vld [vmem:[#allocation2 + $0xe0] sm:$0xff] }
 0x24f   : > { %v2463_v17 = vld [vmem:[#allocation2 + $0xdf] sm:$0xff] }
 0x250   : > { %v2911_v0 = vadd.f32 %v2835_v32, %v2677_v8  ;;  %6079 = vmatmul.msk.bf16.gmra.mxu1 %vm865_vm0, %v3345_v57  ;;  %v2728_v32 = vld [vmem:[#allocation2 + $0xd8] sm:$0xff]  ;;  %v9120_v57 = vld [vmem:[#allocation37_spill] sm:$0xff] }
 0x251   : > { %v2838_v50 = vpop.f32.mrf.mxu3 }
 0x252   : > { %v3177_v60 = vadd.f32 %v3101_v19, %v2911_v0  ;;  %6008 = vmatmul.msk.bf16.gmra.mxu2 %vm865_vm0, %v2514_v47  ;;  %v3109_v25 = vpop.f32.mrf.mxu0  ;;  %v2494_v47 = vmul.f32 %v9120_v57, %v2462_v20  ;;  %v2749_v0 = vpack.c.bf16 %v2729_v35, %v2728_v32  ;;  %v2997_v20 = vmul.f32 %v7331_v33, %v7353_v52  ;;  %v2464_v52 = vld [vmem:[#allocation2 + $0xe7] sm:$0xff] }
 0x254   : > { %v3209_v63 = vmax.f32 %v3177_v60, 0.0 }
 0x255   : > { %v2604_v40 = vpop.f32.mrf.mxu2  ;;  %6065 = vmatmul.msk.bf16.gmra.mxu0 %vm865_vm0, %v3015_v56  ;;  %v3284_v54 = vld [vmem:[#allocation3 + $0x27] sm:$0xff] }
 0x256   : > { %3244 = vst.msk [vmem:[#allocation3 + $0x30] sm:$0xff] %vm865_vm0, %v3209_v63  ;;  %v2678_v43 = vadd.f32 %v2604_v40, %v9119_v6  ;;  %v3316_v60 = vmul.f32 %v6746_v1, %v3284_v54  ;;  %v7625_v63 = vmul.f32 %v6696_v37, %v3284_v54  ;;  %v2515_v6 = vpack.c.bf16 %v2463_v17, %v2494_v47 }
 0x258   : > { %v2912_v34 = vadd.f32 %v2838_v50, %v2678_v43  ;;  %v9124_v43 = vld [vmem:[#allocation85_spill] sm:$0xff] }
 0x259   : > { %v2840_v8 = vpop.f32.mrf.mxu3 }
 0x25a   : > { %v3178_v19 = vadd.f32 %v3104_v38, %v2912_v34  ;;  %v3111_v12 = vpop.f32.mrf.mxu0 }
 0x25c   : > { %v3210_v14 = vmax.f32 %v3178_v19, 0.0 }
 0x25d   : > { %v2606_v40 = vpop.f32.mrf.mxu2  ;;  %v7627_v56 = vld [vmem:[#allocation3 + $0x2f] sm:$0xff] }
 0x25e   : > { %3245 = vst.msk [vmem:[#allocation3 + $0x38] sm:$0xff] %vm865_vm0, %v3210_v14  ;;  %v2679_v50 = vadd.f32 %v2606_v40, %v7343_v13  ;;  %v3346_v38 = vpack.c.bf16 %v7627_v56, %v3316_v60  ;;  %6037 = vmatmul.msk.bf16.gmra.mxu3 %vm865_vm0, %v2749_v0  ;;  %v3016_v13 = vpack.c.bf16 %v2997_v20, %v7365_v27  ;;  %v2730_v14 = vld [vmem:[#allocation2 + $0xe8] sm:$0xff]  ;;  %v2731_v60 = vld [vmem:[#allocation2 + $0xf0] sm:$0xff]  ;;  %v7646_v40 = vld [vmem:[#allocation3 + $0x29] sm:$0xff] }
 0x25f   : > { %9122 = vst [vmem:[#allocation74_spill] sm:$0xff] %v7646_v40  ;;  %v9123_v20 = vld [vmem:[#allocation43_spill] sm:$0xff] }
 0x260   : > { %v2913_v34 = vadd.f32 %v2840_v8, %v2679_v50  ;;  %6080 = vmatmul.msk.bf16.gmra.mxu1 %vm865_vm0, %v3346_v38 }
 0x261   : > { %v2843_v35 = vpop.f32.mrf.mxu3 }
 0x262   : > { %v3179_v32 = vadd.f32 %v3106_v39, %v2913_v34  ;;  %6009 = vmatmul.msk.bf16.gmra.mxu2 %vm865_vm0, %v2515_v6  ;;  %v3114_v19 = vpop.f32.mrf.mxu0  ;;  %v2750_v34 = vpack.c.bf16 %v2731_v60, %v2730_v14  ;;  %v2999_v14 = vmul.f32 %v7358_v44, %v7390_v58 }
 0x264   : > { %v3211_v54 = vmax.f32 %v3179_v32, 0.0  ;;  %v2465_v32 = vld [vmem:[#allocation2 + $0xef] sm:$0xff] }
 0x265   : > { %v2609_v47 = vpop.f32.mrf.mxu2  ;;  %v4548_v0 = vld [vmem:[#allocation3 + $0x31] sm:$0xff]  ;;  %6066 = vmatmul.msk.bf16.gmra.mxu0 %vm865_vm0, %v3016_v13 }
 0x266   : > { %3246 = vst.msk [vmem:[#allocation3 + $0x40] sm:$0xff] %vm865_vm0, %v3211_v54  ;;  %v2680_v17 = vadd.f32 %v2609_v47, %v7355_v24  ;;  %v7644_v8 = vmul.f32 %v6983_v28, %v4548_v0  ;;  %v3286_v27 = vld [vmem:[#allocation3 + $0x37] sm:$0xff]  ;;  %v2496_v24 = vmul.f32 %v9123_v20, %v2464_v52 }
 0x267   : > { %v3318_v54 = vmul.f32 %v9076_v36, %v3286_v27 }
 0x268   : > { %9121 = vst [vmem:[#allocation72_spill] sm:$0xff] %v7644_v8  ;;  %v2914_v39 = vadd.f32 %v2843_v35, %v2680_v17  ;;  %v7653_v35 = vmul.f32 %v6746_v1, %v3286_v27 }
 0x269   : > { %v2845_v6 = vpop.f32.mrf.mxu3 }
 0x26a   : > { %v3180_v38 = vadd.f32 %v3109_v25, %v2914_v39  ;;  %v3116_v47 = vpop.f32.mrf.mxu0  ;;  %v2516_v39 = vpack.c.bf16 %v2465_v32, %v2496_v24 }
 0x26c   : > { %v3212_v13 = vmax.f32 %v3180_v38, 0.0  ;;  %v3017_v38 = vpack.c.bf16 %v2999_v14, %v7402_v31 }
 0x26d   : > { %v2611_v17 = vpop.f32.mrf.mxu2  ;;  %v7655_v0 = vld [vmem:[#allocation3 + $0x3f] sm:$0xff] }
 0x26e   : > { %3247 = vst.msk [vmem:[#allocation3 + $0x48] sm:$0xff] %vm865_vm0, %v3212_v13  ;;  %v2681_v50 = vadd.f32 %v2611_v17, %v9124_v43  ;;  %v3347_v25 = vpack.c.bf16 %v7655_v0, %v3318_v54  ;;  %6038 = vmatmul.msk.bf16.gmra.mxu3 %vm865_vm0, %v2750_v34  ;;  %v2733_v54 = vld [vmem:[#allocation2 + $0x100] sm:$0xff]  ;;  %v7676_v17 = vld [vmem:[#allocation3 + $0x39] sm:$0xff] }
 0x26f   : > { %9126 = vst [vmem:[#allocation77_spill] sm:$0xff] %v7676_v17  ;;  %v2971_v17 = vld [vmem:[#allocation2 + $0x121] sm:$0xff] }
 0x270   : > { %v2915_v60 = vadd.f32 %v2845_v6, %v2681_v50  ;;  %6081 = vmatmul.msk.bf16.gmra.mxu1 %vm865_vm0, %v3347_v25  ;;  %v2466_v6 = vld [vmem:[#allocation2 + $0xf7] sm:$0xff] }
 0x271   : > { %v2848_v27 = vpop.f32.mrf.mxu3 }
 0x272   : > { %v3181_v43 = vadd.f32 %v3111_v12, %v2915_v60  ;;  %6010 = vmatmul.msk.bf16.gmra.mxu2 %vm865_vm0, %v2516_v39  ;;  %v3119_v32 = vpop.f32.mrf.mxu0  ;;  %v2732_v12 = vld [vmem:[#allocation2 + $0xf8] sm:$0xff]  ;;  %v9127_v60 = vld [vmem:[#allocation48_spill] sm:$0xff] }
 0x274   : > { %v3213_v24 = vmax.f32 %v3181_v43, 0.0  ;;  %v2751_v43 = vpack.c.bf16 %v2733_v54, %v2732_v12  ;;  %v3001_v54 = vmul.f32 %v7395_v21, %v7417_v23  ;;  %v2468_v23 = vld [vmem:[#allocation2 + $0x107] sm:$0xff] }
 0x275   : > { %v2614_v34 = vpop.f32.mrf.mxu2  ;;  %v4550_v50 = vld [vmem:[#allocation3 + $0x41] sm:$0xff]  ;;  %6067 = vmatmul.msk.bf16.gmra.mxu0 %vm865_vm0, %v3017_v38  ;;  %v9128_v38 = vld [vmem:[#allocation88_spill] sm:$0xff] }
 0x276   : > { %3248 = vst.msk [vmem:[#allocation3 + $0x50] sm:$0xff] %vm865_vm0, %v3213_v24  ;;  %v2682_v58 = vadd.f32 %v2614_v34, %v7392_v15  ;;  %v7674_v13 = vmul.f32 %v7006_v4, %v4550_v50  ;;  %v3288_v31 = vld [vmem:[#allocation3 + $0x47] sm:$0xff]  ;;  %v2498_v15 = vmul.f32 %v9127_v60, %v2466_v6  ;;  %v2467_v24 = vld [vmem:[#allocation2 + $0xff] sm:$0xff] }
 0x277   : > { %v9129_v34 = vld [vmem:[#allocation81_spill] sm:$0xff]  ;;  %v7685_v40 = vmul.f32 %v9076_v36, %v3288_v31 }
 0x278   : > { %9125 = vst [vmem:[#allocation75_spill] sm:$0xff] %v7674_v13  ;;  %v2916_v46 = vadd.f32 %v2848_v27, %v2682_v58  ;;  %v2417_v52 = vadd.f32 %v9129_v34, %v9128_v38  ;;  %v3320_v27 = vmul.f32 %v9083_v41, %v3288_v31 }
 0x279   : > { %v2850_v14 = vpop.f32.mrf.mxu3 }
 0x27a   : > { %v3182_v39 = vadd.f32 %v3114_v19, %v2916_v46  ;;  %v3121_v58 = vpop.f32.mrf.mxu0  ;;  %v2517_v46 = vpack.c.bf16 %v2467_v24, %v2498_v15 }
 0x27c   : > { %v3214_v50 = vmax.f32 %v3182_v39, 0.0 }
 0x27d   : > { %v2616_v8 = vpop.f32.mrf.mxu2  ;;  %v7687_v1 = vld [vmem:[#allocation3 + $0x4f] sm:$0xff] }
 0x27e   : > { %3249 = vst.msk [vmem:[#allocation3 + $0x58] sm:$0xff] %vm865_vm0, %v3214_v50  ;;  %v2683_v19 = vadd.f32 %v2616_v8, %v2417_v52  ;;  %v3348_v6 = vpack.c.bf16 %v7687_v1, %v3320_v27  ;;  %6039 = vmatmul.msk.bf16.gmra.mxu3 %vm865_vm0, %v2751_v43  ;;  %v3018_v8 = vpack.c.bf16 %v3001_v54, %v7429_v49  ;;  %v2734_v49 = vld [vmem:[#allocation2 + $0x108] sm:$0xff]  ;;  %v2735_v27 = vld [vmem:[#allocation2 + $0x110] sm:$0xff] }
 0x280   : > { %v2917_v39 = vadd.f32 %v2850_v14, %v2683_v19  ;;  %6082 = vmatmul.msk.bf16.gmra.mxu1 %vm865_vm0, %v3348_v6  ;;  %v7708_v19 = vld [vmem:[#allocation3 + $0x49] sm:$0xff] }
 0x281   : > { %v2853_v38 = vpop.f32.mrf.mxu3  ;;  %9131 = vst [vmem:[#allocation85_spill] sm:$0xff] %v7708_v19 }
 0x282   : > { %v3183_v31 = vadd.f32 %v3116_v47, %v2917_v39  ;;  %6011 = vmatmul.msk.bf16.gmra.mxu2 %vm865_vm0, %v2517_v46  ;;  %v3124_v34 = vpop.f32.mrf.mxu0  ;;  %v6348_v47 = vld [vmem:[%s8836_s3 + $0x30] sm:$0xff]  ;;  %v9132_v39 = vld [vmem:[#allocation50_spill] sm:$0xff] }
 0x283   : > { %4197 = vmatpush.bf16.msrb.mxu0 %v6348_v47 }
 0x284   : > { %v3215_v52 = vmax.f32 %v3183_v31, 0.0  ;;  %v2500_v31 = vmul.f32 %v9132_v39, %v2468_v23  ;;  %v6344_v23 = vld [vmem:[%s8836_s3 + $0x10] sm:$0xff] }
 0x285   : > { %v2619_v15 = vpop.f32.mrf.mxu2  ;;  %v4552_v43 = vld [vmem:[#allocation3 + $0x51] sm:$0xff]  ;;  %6068 = vmatmul.msk.bf16.gmra.mxu0 %vm865_vm0, %v3018_v8  ;;  %v2752_v8 = vpack.c.bf16 %v2735_v27, %v2734_v49  ;;  %3665 = vmatpush.bf16.msrb.mxu2 %v6344_v23 }
 0x286   : > { %3250 = vst.msk [vmem:[#allocation3 + $0x60] sm:$0xff] %vm865_vm0, %v3215_v52  ;;  %v2684_v24 = vadd.f32 %v2619_v15, %v7419_v55  ;;  %v7706_v14 = vmul.f32 %v7032_v18, %v4552_v43  ;;  %v3290_v6 = vld [vmem:[#allocation3 + $0x57] sm:$0xff]  ;;  %v2469_v52 = vld [vmem:[#allocation2 + $0x10f] sm:$0xff] }
 0x287   : > { %v6346_v15 = vld [vmem:[%s8836_s3 + $0x20] sm:$0xff]  ;;  %v3322_v12 = vmul.f32 %v9090_v53, %v3290_v6  ;;  %v7720_v55 = vmul.f32 %v9083_v41, %v3290_v6  ;;  %v3003_v6 = vmul.f32 %v7422_v30, %v2971_v17  ;;  %v2470_v17 = vld [vmem:[#allocation2 + $0x117] sm:$0xff] }
 0x288   : > { %9130 = vst [vmem:[#allocation79_spill] sm:$0xff] %v7706_v14  ;;  %v2918_v50 = vadd.f32 %v2853_v38, %v2684_v24  ;;  %v9133_v38 = vld [vmem:[#allocation91_spill] sm:$0xff]  ;;  %v9134_v24 = vld [vmem:[#allocation86_spill] sm:$0xff]  ;;  %3931 = vmatpush.bf16.msrb.mxu3 %v6346_v15 }
 0x289   : > { %v2855_v54 = vpop.f32.mrf.mxu3  ;;  %v2419_v43 = vadd.f32 %v9134_v24, %v9133_v38  ;;  %v2970_v15 = vld [vmem:[#allocation2 + $0x119] sm:$0xff]  ;;  %v9139_v38 = vld [vmem:[#allocation89_spill] sm:$0xff] }
 0x28a   : > { %v3184_v46 = vadd.f32 %v3119_v32, %v2918_v50  ;;  %v3126_v47 = vpop.f32.mrf.mxu0 }
 0x28c   : > { %v3216_v25 = vmax.f32 %v3184_v46, 0.0  ;;  %v2518_v46 = vpack.c.bf16 %v2469_v52, %v2500_v31 }
 0x28d   : > { %v2621_v32 = vpop.f32.mrf.mxu2  ;;  %v7722_v50 = vld [vmem:[#allocation3 + $0x5f] sm:$0xff] }
 0x28e   : > { %3251 = vst.msk [vmem:[#allocation3 + $0x68] sm:$0xff] %vm865_vm0, %v3216_v25  ;;  %v2685_v49 = vadd.f32 %v2621_v32, %v2419_v43  ;;  %v3349_v27 = vpack.c.bf16 %v7722_v50, %v3322_v12  ;;  %6040 = vmatmul.msk.bf16.gmra.mxu3 %vm865_vm0, %v2752_v8  ;;  %v3019_v43 = vpack.c.bf16 %v3003_v6, %v2970_v15  ;;  %v9137_v15 = vld [vmem:[#allocation52_spill] sm:$0xff] }
 0x290   : > { %v2919_v24 = vadd.f32 %v2855_v54, %v2685_v49  ;;  %6083 = vmatmul.msk.bf16.gmra.mxu1 %vm865_vm0, %v3349_v27  ;;  %v2737_v49 = vld [vmem:[#allocation2 + $0x120] sm:$0xff]  ;;  %v7741_v27 = vld [vmem:[#allocation3 + $0x59] sm:$0xff] }
 0x291   : > { %v2858_v25 = vpop.f32.mrf.mxu3  ;;  %9136 = vst [vmem:[#allocation81_spill] sm:$0xff] %v7741_v27 }
 0x292   : > { %v3185_v19 = vadd.f32 %v3121_v58, %v2919_v24  ;;  %6012 = vmatmul.msk.bf16.gmra.mxu2 %vm865_vm0, %v2518_v46  ;;  %v3129_v12 = vpop.f32.mrf.mxu0  ;;  %v2736_v58 = vld [vmem:[#allocation2 + $0x118] sm:$0xff] }
 0x294   : > { %v3217_v32 = vmax.f32 %v3185_v19, 0.0 }
 0x295   : > { %v2624_v31 = vpop.f32.mrf.mxu2  ;;  %v4554_v8 = vld [vmem:[#allocation3 + $0x61] sm:$0xff]  ;;  %6069 = vmatmul.msk.bf16.gmra.mxu0 %vm865_vm0, %v3019_v43 }
 0x296   : > { %3252 = vst.msk [vmem:[#allocation3 + $0x70] sm:$0xff] %vm865_vm0, %v3217_v32  ;;  %v2686_v52 = vadd.f32 %v2624_v31, %v7443_v26  ;;  %v7739_v54 = vmul.f32 %v7061_v61, %v4554_v8  ;;  %v3292_v46 = vld [vmem:[#allocation3 + $0x67] sm:$0xff]  ;;  %v2502_v26 = vmul.f32 %v9137_v15, %v2470_v17  ;;  %v2753_v32 = vpack.c.bf16 %v2737_v49, %v2736_v58  ;;  %v2471_v31 = vld [vmem:[#allocation2 + $0x11f] sm:$0xff] }
 0x297   : > { %v9138_v43 = vld [vmem:[#allocation93_spill] sm:$0xff]  ;;  %v7752_v36 = vmul.f32 %v9090_v53, %v3292_v46 }
 0x298   : > { %9135 = vst [vmem:[#allocation88_spill] sm:$0xff] %v7739_v54  ;;  %v2920_v23 = vadd.f32 %v2858_v25, %v2686_v52  ;;  %v2421_v14 = vadd.f32 %v9139_v38, %v9138_v43  ;;  %v3324_v25 = vmul.f32 %v9096_v16, %v3292_v46 }
 0x299   : > { %v2860_v24 = vpop.f32.mrf.mxu3 }
 0x29a   : > { %v3186_v6 = vadd.f32 %v3124_v34, %v2920_v23  ;;  %v3131_v52 = vpop.f32.mrf.mxu0  ;;  %v2519_v23 = vpack.c.bf16 %v2471_v31, %v2502_v26  ;;  %v6350_v26 = vld [vmem:[%s8836_s3 + $0x40] sm:$0xff] }
 0x29b   : > { %4431 = vmatpush.bf16.msrb.mxu1 %v6350_v26 }
 0x29c   : > { %v3218_v8 = vmax.f32 %v3186_v6, 0.0 }
 0x29d   : > { %v2626_v13 = vpop.f32.mrf.mxu2  ;;  %v7749_v41 = vld [vmem:[#allocation3 + $0x6f] sm:$0xff] }
 0x29e   : > { %3253 = vst.msk [vmem:[#allocation3 + $0x78] sm:$0xff] %vm865_vm0, %v3218_v8  ;;  %v2687_v34 = vadd.f32 %v2626_v13, %v2421_v14  ;;  %v3350_v17 = vpack.c.bf16 %v7749_v41, %v3324_v25  ;;  %6041 = vmatmul.msk.bf16.gmra.mxu3 %vm865_vm0, %v2753_v32  ;;  %v3780_v14 = vld [vmem:[#allocation3 + $0x11] sm:$0xff]  ;;  %v7773_v25 = vld [vmem:[#allocation3 + $0x69] sm:$0xff] }
 0x29f   : > { %9143 = vst [vmem:[#allocation86_spill] sm:$0xff] %v7773_v25  ;;  %v7793_v25 = vpop.f32.mrf.mxu1 }
 0x2a0   : > { %v2921_v58 = vadd.f32 %v2860_v24, %v2687_v34  ;;  %6084 = vmatmul.msk.bf16.gmra.mxu1 %vm865_vm0, %v3350_v17  ;;  %v9140_v24 = vpack.c.bf16 %v7606_v51, %v7604_v10  ;;  %v3546_v10 = vld [vmem:[#allocation3 + $0x10] sm:$0xff] }
 0x2a1   : > { %v2863_v6 = vpop.f32.mrf.mxu3  ;;  %v9144_v51 = vld [vmem:[#allocation95_spill] sm:$0xff] }
 0x2a2   : > { %v3187_v49 = vadd.f32 %v3126_v47, %v2921_v58  ;;  %6013 = vmatmul.msk.bf16.gmra.mxu2 %vm865_vm0, %v2519_v23  ;;  %v3134_v43 = vpop.f32.mrf.mxu0  ;;  %v9141_v47 = vld [vmem:[#allocation58_spill] sm:$0xff] }
 0x2a3   : > { %v3779_v58 = vld [vmem:[#allocation3 + $0x9] sm:$0xff] }
 0x2a4   : > { %v3219_v46 = vmax.f32 %v3187_v49, 0.0  ;;  %v3545_v49 = vld [vmem:[#allocation3 + $0x8] sm:$0xff] }
 0x2a5   : > { %v2629_v19 = vpop.f32.mrf.mxu2  ;;  %v4556_v32 = vld [vmem:[#allocation3 + $0x71] sm:$0xff]  ;;  %6162 = vmatmul.msk.bf16.vlgmr.msrb.gmra.mxu0 %vm865_vm0, %v9140_v24 }
 0x2a6   : > { %3254 = vst.msk [vmem:[#allocation3 + $0x80] sm:$0xff] %vm865_vm0, %v3219_v46  ;;  %v2688_v13 = vadd.f32 %v2629_v19, %v7460_v3  ;;  %v7771_v31 = vmul.f32 %v9141_v47, %v4556_v32  ;;  %v3294_v34 = vld [vmem:[#allocation3 + $0x77] sm:$0xff]  ;;  %v3812_v3 = vmul.f32 %v6983_v28, %v3780_v14  ;;  %v3577_v19 = vpack.c.bf16 %v3546_v10, %v3545_v49  ;;  %v9146_v49 = vld [vmem:[#allocation97_spill] sm:$0xff] }
 0x2a7   : > { %v9145_v46 = vld [vmem:[#allocation92_spill] sm:$0xff]  ;;  %v7782_v26 = vmul.f32 %v9096_v16, %v3294_v34 }
 0x2a8   : > { %9142 = vst [vmem:[#allocation91_spill] sm:$0xff] %v7771_v31  ;;  %v2922_v8 = vadd.f32 %v2863_v6, %v2688_v13  ;;  %v2423_v24 = vadd.f32 %v9145_v46, %v9144_v51  ;;  %v3326_v6 = vmul.f32 %v9103_v29, %v3294_v34  ;;  %v3843_v27 = vpack.c.bf16 %v3812_v3, %v3779_v58  ;;  %v3781_v51 = vld [vmem:[#allocation3 + $0x19] sm:$0xff] }
 0x2a9   : > { %v2865_v23 = vpop.f32.mrf.mxu3 }
 0x2aa   : > { %v3188_v17 = vadd.f32 %v3129_v12, %v2922_v8  ;;  %v3136_v13 = vpop.f32.mrf.mxu0 }
 0x2ac   : > { %v3220_v32 = vmax.f32 %v3188_v17, 0.0 }
 0x2ad   : > { %v2631_v38 = vpop.f32.mrf.mxu2  ;;  %v7784_v14 = vld [vmem:[#allocation3 + $0x7f] sm:$0xff] }
 0x2ae   : > { %3255 = vst.msk [vmem:[#allocation3 + $0x88] sm:$0xff] %vm865_vm0, %v3220_v32  ;;  %v2689_v12 = vadd.f32 %v2631_v38, %v2423_v24  ;;  %v3351_v8 = vpack.c.bf16 %v7784_v14, %v3326_v6  ;;  %6134 = vmatmul.msk.bf16.vlgmr.msrb.gmra.mxu3 %vm865_vm0, %v3843_v27  ;;  %v3782_v24 = vld [vmem:[#allocation3 + $0x21] sm:$0xff]  ;;  %v9147_v27 = vpack.c.bf16 %v7627_v56, %v7625_v63  ;;  %v7804_v6 = vld [vmem:[#allocation3 + $0x79] sm:$0xff] }
 0x2af   : > { %9150 = vst [vmem:[#allocation89_spill] sm:$0xff] %v7804_v6  ;;  %v9152_v63 = vld [vmem:[#allocation94_spill] sm:$0xff] }
 0x2b0   : > { %v2923_v17 = vadd.f32 %v2865_v23, %v2689_v12  ;;  %6085 = vmatmul.msk.bf16.gmra.mxu1 %vm865_vm0, %v3351_v8  ;;  %v3814_v8 = vmul.f32 %v7006_v4, %v3782_v24 }
 0x2b1   : > { %v2868_v46 = vpop.f32.mrf.mxu3 }
 0x2b2   : > { %v3189_v34 = vadd.f32 %v3131_v52, %v2923_v17  ;;  %6106 = vmatmul.msk.bf16.vlgmr.msrb.gmra.mxu2 %vm865_vm0, %v3577_v19  ;;  %v3139_v58 = vpop.f32.mrf.mxu0  ;;  %v9148_v52 = vld [vmem:[#allocation61_spill] sm:$0xff]  ;;  %v3844_v54 = vpack.c.bf16 %v3814_v8, %v3781_v51 }
 0x2b3   : > { %v3548_v17 = vld [vmem:[#allocation3 + $0x20] sm:$0xff] }
 0x2b4   : > { %v3221_v3 = vmax.f32 %v3189_v34, 0.0 }
 0x2b5   : > { %v2634_v38 = vpop.f32.mrf.mxu2  ;;  %v4558_v32 = vld [vmem:[#allocation3 + $0x81] sm:$0xff]  ;;  %6163 = vmatmul.msk.bf16.gmra.mxu0 %vm865_vm0, %v9147_v27 }
 0x2b6   : > { %3256 = vst.msk [vmem:[#allocation3 + $0x90] sm:$0xff] %vm865_vm0, %v3221_v3  ;;  %v2690_v10 = vadd.f32 %v2634_v38, %v9146_v49  ;;  %v7802_v23 = vmul.f32 %v9148_v52, %v4558_v32  ;;  %v3296_v12 = vld [vmem:[#allocation3 + $0x87] sm:$0xff]  ;;  %v7809_v38 = vpop.f32.mrf.mxu1 }
 0x2b7   : > { %v9151_v49 = vld [vmem:[#allocation98_spill] sm:$0xff]  ;;  %v3328_v32 = vmul.f32 %v9109_v59, %v3296_v12 }
 0x2b8   : > { %9149 = vst [vmem:[#allocation93_spill] sm:$0xff] %v7802_v23  ;;  %v2924_v19 = vadd.f32 %v2868_v46, %v2690_v10  ;;  %v2425_v56 = vadd.f32 %v9152_v63, %v9151_v49  ;;  %v7815_v10 = vmul.f32 %v9103_v29, %v3296_v12  ;;  %v3547_v49 = vld [vmem:[#allocation3 + $0x18] sm:$0xff] }
 0x2b9   : > { %v2870_v3 = vpop.f32.mrf.mxu3  ;;  %v7825_v12 = vpack.c.bf16 %v3548_v17, %v3547_v49  ;;  %v9154_v17 = vpack.c.bf16 %v7655_v0, %v7653_v35  ;;  %v9158_v23 = vld [vmem:[#allocation100_spill] sm:$0xff] }
 0x2ba   : > { %v3190_v34 = vadd.f32 %v3134_v43, %v2924_v19  ;;  %v3141_v46 = vpop.f32.mrf.mxu0  ;;  %v9159_v29 = vld [vmem:[#allocation96_spill] sm:$0xff] }
 0x2bb   : > { %v2427_v16 = vadd.f32 %v9159_v29, %v9158_v23  ;;  %v3786_v23 = vld [vmem:[#allocation3 + $0x41] sm:$0xff] }
 0x2bc   : > { %v3222_v27 = vmax.f32 %v3190_v34, 0.0  ;;  %v3784_v34 = vld [vmem:[#allocation3 + $0x31] sm:$0xff] }
 0x2bd   : > { %v2636_v31 = vpop.f32.mrf.mxu2  ;;  %v7817_v24 = vld [vmem:[#allocation3 + $0x8f] sm:$0xff] }
 0x2be   : > { %3257 = vst.msk [vmem:[#allocation3 + $0x98] sm:$0xff] %vm865_vm0, %v3222_v27  ;;  %v2691_v43 = vadd.f32 %v2636_v31, %v2425_v56  ;;  %v3352_v19 = vpack.c.bf16 %v7817_v24, %v3328_v32  ;;  %6135 = vmatmul.msk.bf16.gmra.mxu3 %vm865_vm0, %v3844_v54  ;;  %v7829_v56 = vpop.f32.mrf.mxu1  ;;  %v9153_v32 = vld [vmem:[#allocation99_spill] sm:$0xff] }
 0x2c0   : > { %v2925_v63 = vadd.f32 %v2870_v3, %v2691_v43  ;;  %6086 = vmatmul.msk.bf16.gmra.mxu1 %vm865_vm0, %v3352_v19 }
 0x2c1   : > { %v2873_v51 = vpop.f32.mrf.mxu3 }
 0x2c2   : > { %v3191_v6 = vadd.f32 %v3136_v13, %v2925_v63  ;;  %6107 = vmatmul.msk.bf16.gmra.mxu2 %vm865_vm0, %v7825_v12  ;;  %v3144_v31 = vpop.f32.mrf.mxu0  ;;  %v9155_v13 = vld [vmem:[#allocation64_spill] sm:$0xff]  ;;  %v3816_v63 = vmul.f32 %v7032_v18, %v3784_v34 }
 0x2c4   : > { %v3223_v8 = vmax.f32 %v3191_v6, 0.0  ;;  %v7840_v6 = vld [vmem:[#allocation3 + $0x89] sm:$0xff] }
 0x2c5   : > { %v2639_v27 = vpop.f32.mrf.mxu2  ;;  %v4560_v3 = vld [vmem:[#allocation3 + $0x91] sm:$0xff]  ;;  %6164 = vmatmul.msk.bf16.gmra.mxu0 %vm865_vm0, %v9154_v17  ;;  %9157 = vst [vmem:[#allocation92_spill] sm:$0xff] %v7840_v6  ;;  %v3783_v17 = vld [vmem:[#allocation3 + $0x29] sm:$0xff] }
 0x2c6   : > { %3258 = vst.msk [vmem:[#allocation3 + $0xa0] sm:$0xff] %vm865_vm0, %v3223_v8  ;;  %v2692_v54 = vadd.f32 %v2639_v27, %v9153_v32  ;;  %v7838_v43 = vmul.f32 %v9155_v13, %v4560_v3  ;;  %v3298_v49 = vld [vmem:[#allocation3 + $0x97] sm:$0xff]  ;;  %v3845_v18 = vpack.c.bf16 %v3816_v63, %v3783_v17 }
 0x2c7   : > { %v3330_v0 = vmul.f32 %v9114_v22, %v3298_v49  ;;  %v3550_v8 = vld [vmem:[#allocation3 + $0x30] sm:$0xff] }
 0x2c8   : > { %9156 = vst [vmem:[#allocation95_spill] sm:$0xff] %v7838_v43  ;;  %v2926_v19 = vadd.f32 %v2873_v51, %v2692_v54  ;;  %v7849_v51 = vmul.f32 %v9109_v59, %v3298_v49  ;;  %v9165_v43 = vld [vmem:[#allocation57_spill] sm:$0xff] }
 0x2c9   : > { %v2875_v32 = vpop.f32.mrf.mxu3 }
 0x2ca   : > { %v3192_v27 = vadd.f32 %v3139_v58, %v2926_v19  ;;  %v3146_v3 = vpop.f32.mrf.mxu0  ;;  %v3549_v19 = vld [vmem:[#allocation3 + $0x28] sm:$0xff] }
 0x2cc   : > { %v3224_v35 = vmax.f32 %v3192_v27, 0.0  ;;  %v7861_v27 = vpack.c.bf16 %v3550_v8, %v3549_v19  ;;  %v9161_v8 = vpack.c.bf16 %v7687_v1, %v7685_v40  ;;  %v3818_v19 = vmul.f32 %v7061_v61, %v3786_v23 }
 0x2cd   : > { %v2641_v54 = vpop.f32.mrf.mxu2  ;;  %v7851_v53 = vpop.f32.mrf.mxu1  ;;  %v7853_v34 = vld [vmem:[#allocation3 + $0x9f] sm:$0xff] }
 0x2ce   : > { %3259 = vst.msk [vmem:[#allocation3 + $0xa8] sm:$0xff] %vm865_vm0, %v3224_v35  ;;  %v2693_v58 = vadd.f32 %v2641_v54, %v2427_v16  ;;  %v3353_v29 = vpack.c.bf16 %v7853_v34, %v3330_v0  ;;  %6136 = vmatmul.msk.bf16.gmra.mxu3 %vm865_vm0, %v3845_v18  ;;  %v9160_v54 = vld [vmem:[#allocation101_spill] sm:$0xff] }
 0x2d0   : > { %v2927_v49 = vadd.f32 %v2875_v32, %v2693_v58  ;;  %6087 = vmatmul.msk.bf16.gmra.mxu1 %vm865_vm0, %v3353_v29 }
 0x2d1   : > { %v2878_v63 = vpop.f32.mrf.mxu3 }
 0x2d2   : > { %v3193_v6 = vadd.f32 %v3141_v46, %v2927_v49  ;;  %6108 = vmatmul.msk.bf16.gmra.mxu2 %vm865_vm0, %v7861_v27  ;;  %v3149_v16 = vpop.f32.mrf.mxu0  ;;  %v3552_v49 = vld [vmem:[#allocation3 + $0x40] sm:$0xff] }
 0x2d4   : > { %v3225_v35 = vmax.f32 %v3193_v6, 0.0  ;;  %v7876_v6 = vld [vmem:[#allocation3 + $0x99] sm:$0xff] }
 0x2d5   : > { %v2644_v17 = vpop.f32.mrf.mxu2  ;;  %v7865_v0 = vpop.f32.mrf.mxu1  ;;  %v4562_v32 = vld [vmem:[#allocation3 + $0xa1] sm:$0xff]  ;;  %6165 = vmatmul.msk.bf16.gmra.mxu0 %vm865_vm0, %v9161_v8  ;;  %9163 = vst [vmem:[#allocation98_spill] sm:$0xff] %v7876_v6  ;;  %v3785_v8 = vld [vmem:[#allocation3 + $0x39] sm:$0xff] }
 0x2d6   : > { %3260 = vst.msk [vmem:[#allocation3 + $0xb0] sm:$0xff] %vm865_vm0, %v3225_v35  ;;  %v2694_v18 = vadd.f32 %v2644_v17, %v9160_v54  ;;  %v7874_v46 = vmul.f32 %v9100_v5, %v4562_v32  ;;  %v3300_v29 = vld [vmem:[#allocation3 + $0xa7] sm:$0xff]  ;;  %v9164_v54 = vld [vmem:[#allocation59_spill] sm:$0xff]  ;;  %v3846_v61 = vpack.c.bf16 %v3818_v19, %v3785_v8 }
 0x2d7   : > { %v2429_v59 = vadd.f32 %v9165_v43, %v9164_v54  ;;  %v3332_v40 = vmul.f32 %v9117_v62, %v3300_v29 }
 0x2d8   : > { %9162 = vst [vmem:[#allocation97_spill] sm:$0xff] %v7874_v46  ;;  %v2928_v58 = vadd.f32 %v2878_v63, %v2694_v18  ;;  %v7885_v63 = vmul.f32 %v9114_v22, %v3300_v29  ;;  %v9171_v46 = vld [vmem:[#allocation102_spill] sm:$0xff] }
 0x2d9   : > { %v2880_v17 = vpop.f32.mrf.mxu3 }
 0x2da   : > { %v3194_v35 = vadd.f32 %v3144_v31, %v2928_v58  ;;  %v3151_v32 = vpop.f32.mrf.mxu0  ;;  %v3788_v58 = vld [vmem:[#allocation3 + $0x51] sm:$0xff] }
 0x2dc   : > { %v3226_v1 = vmax.f32 %v3194_v35, 0.0  ;;  %v3551_v35 = vld [vmem:[#allocation3 + $0x38] sm:$0xff] }
 0x2dd   : > { %v2646_v18 = vpop.f32.mrf.mxu2  ;;  %v7887_v4 = vpop.f32.mrf.mxu1  ;;  %v7889_v23 = vld [vmem:[#allocation3 + $0xaf] sm:$0xff]  ;;  %v7897_v54 = vpack.c.bf16 %v3552_v49, %v3551_v35  ;;  %v9167_v49 = vpack.c.bf16 %v7722_v50, %v7720_v55  ;;  %v3820_v35 = vmul.f32 %v9141_v47, %v3788_v58 }
 0x2de   : > { %3261 = vst.msk [vmem:[#allocation3 + $0xb8] sm:$0xff] %vm865_vm0, %v3226_v1  ;;  %v2695_v31 = vadd.f32 %v2646_v18, %v2429_v59  ;;  %v3354_v43 = vpack.c.bf16 %v7889_v23, %v3332_v40  ;;  %6137 = vmatmul.msk.bf16.gmra.mxu3 %vm865_vm0, %v3846_v61  ;;  %v9166_v18 = vld [vmem:[#allocation60_spill] sm:$0xff] }
 0x2e0   : > { %v2929_v29 = vadd.f32 %v2880_v17, %v2695_v31  ;;  %6088 = vmatmul.msk.bf16.gmra.mxu1 %vm865_vm0, %v3354_v43 }
 0x2e1   : > { %v2883_v19 = vpop.f32.mrf.mxu3 }
 0x2e2   : > { %v3195_v6 = vadd.f32 %v3146_v3, %v2929_v29  ;;  %6109 = vmatmul.msk.bf16.gmra.mxu2 %vm865_vm0, %v7897_v54  ;;  %v3154_v59 = vpop.f32.mrf.mxu0  ;;  %v3554_v29 = vld [vmem:[#allocation3 + $0x50] sm:$0xff] }
 0x2e4   : > { %v3227_v1 = vmax.f32 %v3195_v6, 0.0  ;;  %v7912_v6 = vld [vmem:[#allocation3 + $0xa9] sm:$0xff] }
 0x2e5   : > { %v2649_v8 = vpop.f32.mrf.mxu2  ;;  %v7901_v40 = vpop.f32.mrf.mxu1  ;;  %v4564_v17 = vld [vmem:[#allocation3 + $0xb1] sm:$0xff]  ;;  %6166 = vmatmul.msk.bf16.gmra.mxu0 %vm865_vm0, %v9167_v49  ;;  %9169 = vst [vmem:[#allocation99_spill] sm:$0xff] %v7912_v6  ;;  %v3787_v49 = vld [vmem:[#allocation3 + $0x49] sm:$0xff] }
 0x2e6   : > { %3262 = vst.msk [vmem:[#allocation3 + $0xc0] sm:$0xff] %vm865_vm0, %v3227_v1  ;;  %v2696_v61 = vadd.f32 %v2649_v8, %v9166_v18  ;;  %v7910_v3 = vmul.f32 %v9106_v42, %v4564_v17  ;;  %v3302_v43 = vld [vmem:[#allocation3 + $0xb7] sm:$0xff]  ;;  %v9170_v18 = vld [vmem:[#allocation62_spill] sm:$0xff]  ;;  %v3847_v47 = vpack.c.bf16 %v3820_v35, %v3787_v49 }
 0x2e7   : > { %v2431_v22 = vadd.f32 %v9171_v46, %v9170_v18  ;;  %v3334_v50 = vmul.f32 %v9120_v57, %v3302_v43 }
 0x2e8   : > { %9168 = vst [vmem:[#allocation94_spill] sm:$0xff] %v7910_v3  ;;  %v2930_v31 = vadd.f32 %v2883_v19, %v2696_v61  ;;  %v7921_v19 = vmul.f32 %v9117_v62, %v3302_v43  ;;  %v9177_v3 = vld [vmem:[#allocation63_spill] sm:$0xff] }
 0x2e9   : > { %v2885_v8 = vpop.f32.mrf.mxu3 }
 0x2ea   : > { %v3196_v1 = vadd.f32 %v3149_v16, %v2930_v31  ;;  %v3156_v17 = vpop.f32.mrf.mxu0  ;;  %v3790_v31 = vld [vmem:[#allocation3 + $0x61] sm:$0xff] }
 0x2ec   : > { %v3228_v55 = vmax.f32 %v3196_v1, 0.0  ;;  %v3553_v1 = vld [vmem:[#allocation3 + $0x48] sm:$0xff] }
 0x2ed   : > { %v2651_v61 = vpop.f32.mrf.mxu2  ;;  %v7923_v37 = vpop.f32.mrf.mxu1  ;;  %v7925_v58 = vld [vmem:[#allocation3 + $0xbf] sm:$0xff]  ;;  %v7933_v18 = vpack.c.bf16 %v3554_v29, %v3553_v1  ;;  %v9173_v29 = vpack.c.bf16 %v7749_v41, %v7752_v36  ;;  %v3822_v1 = vmul.f32 %v9148_v52, %v3790_v31 }
 0x2ee   : > { %3263 = vst.msk [vmem:[#allocation3 + $0xc8] sm:$0xff] %vm865_vm0, %v3228_v55  ;;  %v2697_v16 = vadd.f32 %v2651_v61, %v2431_v22  ;;  %v3355_v46 = vpack.c.bf16 %v7925_v58, %v3334_v50  ;;  %6138 = vmatmul.msk.bf16.gmra.mxu3 %vm865_vm0, %v3847_v47  ;;  %v9172_v61 = vld [vmem:[#allocation103_spill] sm:$0xff] }
 0x2f0   : > { %v2931_v43 = vadd.f32 %v2885_v8, %v2697_v16  ;;  %6089 = vmatmul.msk.bf16.gmra.mxu1 %vm865_vm0, %v3355_v46 }
 0x2f1   : > { %v2888_v35 = vpop.f32.mrf.mxu3 }
 0x2f2   : > { %v3197_v6 = vadd.f32 %v3151_v32, %v2931_v43  ;;  %6110 = vmatmul.msk.bf16.gmra.mxu2 %vm865_vm0, %v7933_v18  ;;  %v3159_v22 = vpop.f32.mrf.mxu0  ;;  %v3556_v43 = vld [vmem:[#allocation3 + $0x60] sm:$0xff] }
 0x2f4   : > { %v3229_v55 = vmax.f32 %v3197_v6, 0.0  ;;  %v7948_v6 = vld [vmem:[#allocation3 + $0xb9] sm:$0xff] }
 0x2f5   : > { %v2654_v49 = vpop.f32.mrf.mxu2  ;;  %v7937_v50 = vpop.f32.mrf.mxu1  ;;  %v4566_v8 = vld [vmem:[#allocation3 + $0xc1] sm:$0xff]  ;;  %6167 = vmatmul.msk.bf16.gmra.mxu0 %vm865_vm0, %v9173_v29  ;;  %9175 = vst [vmem:[#allocation96_spill] sm:$0xff] %v7948_v6  ;;  %v3789_v29 = vld [vmem:[#allocation3 + $0x59] sm:$0xff] }
 0x2f6   : > { %3264 = vst.msk [vmem:[#allocation3 + $0xd0] sm:$0xff] %vm865_vm0, %v3229_v55  ;;  %v2698_v47 = vadd.f32 %v2654_v49, %v9172_v61  ;;  %v7946_v32 = vmul.f32 %v9111_v2, %v4566_v8  ;;  %v3304_v46 = vld [vmem:[#allocation3 + $0xc7] sm:$0xff]  ;;  %v3848_v52 = vpack.c.bf16 %v3822_v1, %v3789_v29 }
 0x2f7   : > { %v9176_v61 = vld [vmem:[#allocation65_spill] sm:$0xff]  ;;  %v3336_v41 = vmul.f32 %v9123_v20, %v3304_v46 }
 0x2f8   : > { %9174 = vst [vmem:[#allocation100_spill] sm:$0xff] %v7946_v32  ;;  %v2932_v16 = vadd.f32 %v2888_v35, %v2698_v47  ;;  %v2433_v62 = vadd.f32 %v9177_v3, %v9176_v61  ;;  %v7957_v35 = vmul.f32 %v9120_v57, %v3304_v46  ;;  %v9183_v32 = vld [vmem:[#allocation66_spill] sm:$0xff] }
 0x2f9   : > { %v2890_v49 = vpop.f32.mrf.mxu3 }
 0x2fa   : > { %v3198_v55 = vadd.f32 %v3154_v59, %v2932_v16  ;;  %v3161_v8 = vpop.f32.mrf.mxu0  ;;  %v3792_v16 = vld [vmem:[#allocation3 + $0x71] sm:$0xff] }
 0x2fc   : > { %v3230_v36 = vmax.f32 %v3198_v55, 0.0  ;;  %v3555_v55 = vld [vmem:[#allocation3 + $0x58] sm:$0xff] }
 0x2fd   : > { %v2656_v47 = vpop.f32.mrf.mxu2  ;;  %v7959_v28 = vpop.f32.mrf.mxu1  ;;  %v7961_v31 = vld [vmem:[#allocation3 + $0xcf] sm:$0xff]  ;;  %v7969_v61 = vpack.c.bf16 %v3556_v43, %v3555_v55  ;;  %v9179_v43 = vpack.c.bf16 %v7784_v14, %v7782_v26  ;;  %v3824_v55 = vmul.f32 %v9155_v13, %v3792_v16 }
 0x2fe   : > { %3265 = vst.msk [vmem:[#allocation3 + $0xd8] sm:$0xff] %vm865_vm0, %v3230_v36  ;;  %v2699_v59 = vadd.f32 %v2656_v47, %v2433_v62  ;;  %v3356_v3 = vpack.c.bf16 %v7961_v31, %v3336_v41  ;;  %6139 = vmatmul.msk.bf16.gmra.mxu3 %vm865_vm0, %v3848_v52  ;;  %v9178_v47 = vld [vmem:[#allocation104_spill] sm:$0xff] }
 0x300   : > { %v2933_v46 = vadd.f32 %v2890_v49, %v2699_v59  ;;  %6090 = vmatmul.msk.bf16.gmra.mxu1 %vm865_vm0, %v3356_v3 }
 0x301   : > { %v2893_v1 = vpop.f32.mrf.mxu3 }
 0x302   : > { %v3199_v6 = vadd.f32 %v3156_v17, %v2933_v46  ;;  %6111 = vmatmul.msk.bf16.gmra.mxu2 %vm865_vm0, %v7969_v61  ;;  %v3164_v62 = vpop.f32.mrf.mxu0  ;;  %v3558_v46 = vld [vmem:[#allocation3 + $0x70] sm:$0xff] }
 0x304   : > { %v3231_v36 = vmax.f32 %v3199_v6, 0.0  ;;  %v7984_v6 = vld [vmem:[#allocation3 + $0xc9] sm:$0xff] }
 0x305   : > { %v2659_v29 = vpop.f32.mrf.mxu2  ;;  %v7973_v41 = vpop.f32.mrf.mxu1  ;;  %v4568_v49 = vld [vmem:[#allocation3 + $0xd1] sm:$0xff]  ;;  %6168 = vmatmul.msk.bf16.gmra.mxu0 %vm865_vm0, %v9179_v43  ;;  %9181 = vst [vmem:[#allocation59_spill] sm:$0xff] %v7984_v6  ;;  %v3791_v43 = vld [vmem:[#allocation3 + $0x69] sm:$0xff] }
 0x306   : > { %3266 = vst.msk [vmem:[#allocation3 + $0xe0] sm:$0xff] %vm865_vm0, %v3231_v36  ;;  %v2700_v52 = vadd.f32 %v2659_v29, %v9178_v47  ;;  %v7982_v17 = vmul.f32 %v9115_v9, %v4568_v49  ;;  %v3306_v3 = vld [vmem:[#allocation3 + $0xd7] sm:$0xff]  ;;  %v3849_v13 = vpack.c.bf16 %v3824_v55, %v3791_v43 }
 0x307   : > { %v9182_v47 = vld [vmem:[#allocation68_spill] sm:$0xff]  ;;  %v3338_v14 = vmul.f32 %v9127_v60, %v3306_v3 }
 0x308   : > { %9180 = vst [vmem:[#allocation101_spill] sm:$0xff] %v7982_v17  ;;  %v2934_v59 = vadd.f32 %v2893_v1, %v2700_v52  ;;  %v2435_v57 = vadd.f32 %v9183_v32, %v9182_v47  ;;  %v7993_v1 = vmul.f32 %v9123_v20, %v3306_v3 }
 0x309   : > { %v2895_v29 = vpop.f32.mrf.mxu3 }
 0x30a   : > { %v3200_v36 = vadd.f32 %v3159_v22, %v2934_v59  ;;  %v3166_v49 = vpop.f32.mrf.mxu0 }
 0x30c   : > { %v3232_v26 = vmax.f32 %v3200_v36, 0.0  ;;  %v3557_v36 = vld [vmem:[#allocation3 + $0x68] sm:$0xff] }
 0x30d   : > { %v2661_v52 = vpop.f32.mrf.mxu2  ;;  %v7995_v11 = vpop.f32.mrf.mxu1  ;;  %v7997_v16 = vld [vmem:[#allocation3 + $0xdf] sm:$0xff]  ;;  %v8005_v47 = vpack.c.bf16 %v3558_v46, %v3557_v36  ;;  %v6353_v46 = vld [vmem:[%s8836_s3 + $0x58] sm:$0xff] }
 0x30e   : > { %3267 = vst.msk [vmem:[#allocation3 + $0xe8] sm:$0xff] %vm865_vm0, %v3232_v26  ;;  %v2701_v22 = vadd.f32 %v2661_v52, %v2435_v57  ;;  %v3357_v32 = vpack.c.bf16 %v7997_v16, %v3338_v14  ;;  %6140 = vmatmul.msk.bf16.gmra.mxu3 %vm865_vm0, %v3849_v13  ;;  %v3794_v52 = vld [vmem:[#allocation3 + $0x81] sm:$0xff]  ;;  %4696 = vmatpush.bf16.msra.mxu2 %v6353_v46  ;;  %v3793_v46 = vld [vmem:[#allocation3 + $0x79] sm:$0xff] }
 0x310   : > { %v2935_v3 = vadd.f32 %v2895_v29, %v2701_v22  ;;  %6091 = vmatmul.msk.bf16.gmra.mxu1 %vm865_vm0, %v3357_v32  ;;  %v8026_v32 = vld [vmem:[#allocation3 + $0xd9] sm:$0xff] }
 0x311   : > { %v2898_v55 = vpop.f32.mrf.mxu3  ;;  %9186 = vst [vmem:[#allocation60_spill] sm:$0xff] %v8026_v32 }
 0x312   : > { %v3201_v6 = vadd.f32 %v3161_v8, %v2935_v3  ;;  %6112 = vmatmul.msk.bf16.gmra.mxu2 %vm865_vm0, %v8005_v47  ;;  %v3169_v57 = vpop.f32.mrf.mxu0  ;;  %v9184_v8 = vpack.c.bf16 %v7817_v24, %v7815_v10  ;;  %v3826_v3 = vmul.f32 %v9100_v5, %v3794_v52 }
 0x314   : > { %v3233_v26 = vmax.f32 %v3201_v6, 0.0 }
 0x315   : > { %v2664_v43 = vpop.f32.mrf.mxu2  ;;  %v8009_v14 = vpop.f32.mrf.mxu1  ;;  %v4570_v29 = vld [vmem:[#allocation3 + $0xe1] sm:$0xff]  ;;  %6169 = vmatmul.msk.bf16.gmra.mxu0 %vm865_vm0, %v9184_v8 }
 0x316   : > { %3268 = vst.msk [vmem:[#allocation3 + $0xf0] sm:$0xff] %vm865_vm0, %v3233_v26  ;;  %v2702_v13 = vadd.f32 %v2664_v43, %v7554_v45  ;;  %v8021_v6 = vmul.f32 %v9118_v48, %v4570_v29  ;;  %v6355_v45 = vld [vmem:[%s8836_s3 + $0x68] sm:$0xff]  ;;  %v3308_v36 = vld [vmem:[#allocation3 + $0xe7] sm:$0xff]  ;;  %v9188_v29 = vld [vmem:[#allocation67_spill] sm:$0xff]  ;;  %v3850_v26 = vpack.c.bf16 %v3826_v3, %v3793_v46 }
 0x317   : > { %4962 = vmatpush.bf16.msra.mxu3 %v6355_v45  ;;  %v9187_v43 = vld [vmem:[#allocation69_spill] sm:$0xff]  ;;  %v8035_v17 = vmul.f32 %v9127_v60, %v3308_v36  ;;  %v6357_v3 = vld [vmem:[%s8836_s3 + $0x78] sm:$0xff] }
 0x318   : > { %9185 = vst [vmem:[#allocation57_spill] sm:$0xff] %v8021_v6  ;;  %v2936_v22 = vadd.f32 %v2898_v55, %v2702_v13  ;;  %v2437_v8 = vadd.f32 %v9188_v29, %v9187_v43  ;;  %v3340_v13 = vmul.f32 %v9132_v39, %v3308_v36  ;;  %v3559_v43 = vld [vmem:[#allocation3 + $0x78] sm:$0xff]  ;;  %5196 = vmatpush.bf16.msra.mxu0 %v6357_v3 }
 0x319   : > { %v2900_v24 = vpop.f32.mrf.mxu3 }
 0x31a   : > { %v3202_v10 = vadd.f32 %v3164_v62, %v2936_v22  ;;  %v3171_v59 = vpop.f32.mrf.mxu0  ;;  %v3560_v62 = vld [vmem:[#allocation3 + $0x80] sm:$0xff] }
 0x31b   : > { %v8047_v29 = vpack.c.bf16 %v3560_v62, %v3559_v43 }
 0x31c   : > { %v3234_v55 = vmax.f32 %v3202_v10, 0.0  ;;  %v9192_v10 = vld [vmem:[#allocation71_spill] sm:$0xff] }
 0x31d   : > { %v2666_v20 = vpop.f32.mrf.mxu2  ;;  %v8037_v30 = vpop.f32.mrf.mxu1  ;;  %v8039_v52 = vld [vmem:[#allocation3 + $0xef] sm:$0xff]  ;;  %v2439_v32 = vadd.f32 %v7793_v25, %v9192_v10 }
 0x31e   : > { %3269 = vst.msk [vmem:[#allocation3 + $0xf8] sm:$0xff] %vm865_vm0, %v3234_v55  ;;  %v2703_v22 = vadd.f32 %v2666_v20, %v2437_v8  ;;  %v3358_v45 = vpack.c.bf16 %v8039_v52, %v3340_v13  ;;  %6141 = vmatmul.msk.bf16.gmra.mxu3 %vm865_vm0, %v3850_v26  ;;  %v6359_v20 = vld [vmem:[%s8836_s3 + $0x88] sm:$0xff]  ;;  %v8068_v3 = vld [vmem:[#allocation3 + $0xe9] sm:$0xff] }
 0x31f   : > { %5462 = vmatpush.bf16.msra.mxu1 %v6359_v20  ;;  %9191 = vst [vmem:[#allocation102_spill] sm:$0xff] %v8068_v3 }
 0x320   : > { %v2937_v36 = vadd.f32 %v2900_v24, %v2703_v22  ;;  %6092 = vmatmul.msk.bf16.gmra.mxu1 %vm865_vm0, %v3358_v45  ;;  %v3796_v22 = vld [vmem:[#allocation3 + $0x91] sm:$0xff] }
 0x321   : > { %v2903_v55 = vpop.f32.mrf.mxu3 }
 0x322   : > { %v3203_v8 = vadd.f32 %v3166_v49, %v2937_v36  ;;  %6113 = vmatmul.msk.bf16.gmra.mxu2 %vm865_vm0, %v8047_v29  ;;  %v4199_v24 = vpop.f32.mrf.mxu0  ;;  %v9189_v49 = vpack.c.bf16 %v7853_v34, %v7849_v51 }
 0x324   : > { %v3235_v26 = vmax.f32 %v3203_v8, 0.0  ;;  %v3828_v8 = vmul.f32 %v9106_v42, %v3796_v22 }
 0x325   : > { %v2669_v13 = vpop.f32.mrf.mxu2  ;;  %v8057_v46 = vpop.f32.mrf.mxu1  ;;  %v4572_v45 = vld [vmem:[#allocation3 + $0xf1] sm:$0xff]  ;;  %6170 = vmatmul.msk.bf16.gmra.mxu0 %vm865_vm0, %v9189_v49  ;;  %v3795_v49 = vld [vmem:[#allocation3 + $0x89] sm:$0xff] }
 0x326   : > { %3270 = vst.msk [vmem:[#allocation3 + $0x100] sm:$0xff] %vm865_vm0, %v3235_v26  ;;  %v2704_v62 = vadd.f32 %v2669_v13, %v7578_v7  ;;  %v8066_v43 = vmul.f32 %v7331_v33, %v4572_v45  ;;  %v3310_v20 = vld [vmem:[#allocation3 + $0xf7] sm:$0xff]  ;;  %v3851_v60 = vpack.c.bf16 %v3828_v8, %v3795_v49 }
 0x327   : > { %v3342_v34 = vmul.f32 %v9137_v15, %v3310_v20  ;;  %v3562_v26 = vld [vmem:[#allocation3 + $0x90] sm:$0xff] }
 0x328   : > { %9190 = vst [vmem:[#allocation62_spill] sm:$0xff] %v8066_v43  ;;  %v2938_v36 = vadd.f32 %v2903_v55, %v2704_v62  ;;  %v8077_v55 = vmul.f32 %v9132_v39, %v3310_v20  ;;  %v8091_v20 = vld [vmem:[%s8837_s4] ss:$0 sm:$0xff] }
 0x329   : > { %v2905_v13 = vpop.f32.mrf.mxu3 }
 0x32a   : > { %v3204_v7 = vadd.f32 %v3169_v57, %v2938_v36  ;;  %v4201_v45 = vpop.f32.mrf.mxu0  ;;  %v3561_v36 = vld [vmem:[#allocation3 + $0x88] sm:$0xff] }
 0x32b   : > { %v8094_v8 = vpack.c.bf16 %v3562_v26, %v3561_v36 }
 0x32c   : > { %v3236_v51 = vmax.f32 %v3204_v7, 0.0 }
 0x32d   : > { %v2671_v62 = vpop.f32.mrf.mxu2  ;;  %v8079_v6 = vpop.f32.mrf.mxu1  ;;  %v8081_v22 = vld [vmem:[#allocation3 + $0xff] sm:$0xff] }
 0x32e   : > { %3271 = vst.msk [vmem:[#allocation3 + $0x108] sm:$0xff] %vm865_vm0, %v3236_v51  ;;  %v2705_v57 = vadd.f32 %v2671_v62, %v2439_v32  ;;  %v3359_v25 = vpack.c.bf16 %v8081_v22, %v3342_v34  ;;  %6142 = vmatmul.msk.bf16.gmra.mxu3 %vm865_vm0, %v3851_v60  ;;  %v3513_v34 = vadd.f32 %v8091_v20, %v7809_v38  ;;  %v8110_v38 = vld [vmem:[#allocation3 + $0xf9] sm:$0xff] }
 0x32f   : > { %9195 = vst [vmem:[#allocation65_spill] sm:$0xff] %v8110_v38 }
 0x330   : > { %v2939_v7 = vadd.f32 %v2905_v13, %v2705_v57  ;;  %6093 = vmatmul.msk.bf16.gmra.mxu1 %vm865_vm0, %v3359_v25  ;;  %v3798_v57 = vld [vmem:[#allocation3 + $0xa1] sm:$0xff] }
 0x331   : > { %v3933_v32 = vpop.f32.mrf.mxu3 }
 0x332   : > { %v3205_v51 = vadd.f32 %v3171_v59, %v2939_v7  ;;  %6114 = vmatmul.msk.bf16.gmra.mxu2 %vm865_vm0, %v8094_v8  ;;  %v4204_v49 = vpop.f32.mrf.mxu0  ;;  %v9193_v59 = vpack.c.bf16 %v7889_v23, %v7885_v63  ;;  %v3830_v7 = vmul.f32 %v9111_v2, %v3798_v57  ;;  %v3797_v63 = vld [vmem:[#allocation3 + $0x99] sm:$0xff] }
 0x333   : > { %v3563_v57 = vld [vmem:[#allocation3 + $0x98] sm:$0xff] }
 0x334   : > { %v3237_v60 = vmax.f32 %v3205_v51, 0.0  ;;  %v3852_v3 = vpack.c.bf16 %v3830_v7, %v3797_v63 }
 0x335   : > { %v8100_v62 = vpop.f32.mrf.mxu1  ;;  %v3667_v10 = vpop.f32.mrf.mxu2  ;;  %v4574_v25 = vld [vmem:[#allocation3 + $0x101] sm:$0xff]  ;;  %6171 = vmatmul.msk.bf16.gmra.mxu0 %vm865_vm0, %v9193_v59 }
 0x336   : > { %3272 = vst.msk [vmem:[#allocation3 + $0x110] sm:$0xff] %vm865_vm0, %v3237_v60  ;;  %v3747_v13 = vadd.f32 %v3667_v10, %v3513_v34  ;;  %v8108_v26 = vmul.f32 %v7358_v44, %v4574_v25  ;;  %v3514_v34 = vadd.f32 %v8091_v20, %v7829_v56 }
 0x338   : > { %9194 = vst [vmem:[#allocation103_spill] sm:$0xff] %v8108_v26  ;;  %v4013_v36 = vadd.f32 %v3933_v32, %v3747_v13  ;;  %v3564_v32 = vld [vmem:[#allocation3 + $0xa0] sm:$0xff]  ;;  %v3566_v26 = vld [vmem:[#allocation3 + $0xb0] sm:$0xff] }
 0x339   : > { %v3935_v60 = vpop.f32.mrf.mxu3  ;;  %v8127_v56 = vpack.c.bf16 %v3564_v32, %v3563_v57  ;;  %v3800_v32 = vld [vmem:[#allocation3 + $0xb1] sm:$0xff] }
 0x33a   : > { %v8115_v10 = vadd.f32 %v4199_v24, %v4013_v36  ;;  %v4206_v23 = vpop.f32.mrf.mxu0  ;;  %v3832_v7 = vmul.f32 %v9115_v9, %v3800_v32 }
 0x33d   : > { %v8119_v59 = vpop.f32.mrf.mxu1  ;;  %v3669_v25 = vpop.f32.mrf.mxu2  ;;  %v4576_v43 = vld [vmem:[#allocation3 + $0x111] sm:$0xff]  ;;  %v8129_v36 = vld [vmem:[#allocation3 + $0x109] sm:$0xff] }
 0x33e   : > { %v3748_v13 = vadd.f32 %v3669_v25, %v3514_v34  ;;  %6143 = vmatmul.msk.bf16.gmra.mxu3 %vm865_vm0, %v3852_v3  ;;  %v8123_v51 = vmul.f32 %v7395_v21, %v4576_v43  ;;  %9197 = vst [vmem:[#allocation104_spill] sm:$0xff] %v8129_v36  ;;  %v3515_v43 = vadd.f32 %v8091_v20, %v7851_v53 }
 0x33f   : > { %v3516_v53 = vadd.f32 %v8091_v20, %v7865_v0 }
 0x340   : > { %9196 = vst [vmem:[#allocation63_spill] sm:$0xff] %v8123_v51  ;;  %v4014_v24 = vadd.f32 %v3935_v60, %v3748_v13  ;;  %6190 = vmatmul.msk.bf16.vlgmr.msrb.gmra.mxu1 %vm865_vm0, %v7825_v12  ;;  %v9198_v13 = vpack.c.bf16 %v7925_v58, %v7921_v19  ;;  %v3565_v19 = vld [vmem:[#allocation3 + $0xa8] sm:$0xff] }
 0x341   : > { %v3938_v34 = vpop.f32.mrf.mxu3 }
 0x342   : > { %6115 = vmatmul.msk.bf16.gmra.mxu2 %vm865_vm0, %v8127_v56  ;;  %v8135_v3 = vadd.f32 %v4201_v45, %v4014_v24  ;;  %v4209_v60 = vpop.f32.mrf.mxu0  ;;  %v3799_v24 = vld [vmem:[#allocation3 + $0xa9] sm:$0xff] }
 0x345   : > { %v8139_v63 = vpop.f32.mrf.mxu1  ;;  %v3672_v12 = vpop.f32.mrf.mxu2  ;;  %6172 = vmatmul.msk.bf16.gmra.mxu0 %vm865_vm0, %v9198_v13 }
 0x346   : > { %v3749_v25 = vadd.f32 %v3672_v12, %v3515_v43  ;;  %v3853_v12 = vpack.c.bf16 %v3832_v7, %v3799_v24  ;;  %v3517_v7 = vadd.f32 %v8091_v20, %v7887_v4  ;;  %v3518_v4 = vadd.f32 %v8091_v20, %v7901_v40 }
 0x348   : > { %v4015_v57 = vadd.f32 %v3938_v34, %v3749_v25 }
 0x349   : > { %v3940_v36 = vpop.f32.mrf.mxu3 }
 0x34a   : > { %v8146_v45 = vadd.f32 %v4204_v49, %v4015_v57  ;;  %v4211_v51 = vpop.f32.mrf.mxu0  ;;  %v8155_v49 = vpack.c.bf16 %v3566_v26, %v3565_v19 }
 0x34d   : > { %v8150_v38 = vpop.f32.mrf.mxu1  ;;  %v3674_v43 = vpop.f32.mrf.mxu2 }
 0x34e   : > { %v3750_v39 = vadd.f32 %v3674_v43, %v3516_v53  ;;  %6144 = vmatmul.msk.bf16.gmra.mxu3 %vm865_vm0, %v3853_v12  ;;  %v3801_v43 = vld [vmem:[#allocation3 + $0xb9] sm:$0xff] }
 0x350   : > { %v4016_v58 = vadd.f32 %v3940_v36, %v3750_v39  ;;  %6191 = vmatmul.msk.bf16.gmra.mxu1 %vm865_vm0, %v7861_v27  ;;  %v3802_v39 = vld [vmem:[#allocation3 + $0xc1] sm:$0xff]  ;;  %v9199_v36 = vpack.c.bf16 %v7961_v31, %v7957_v35  ;;  %v3567_v35 = vld [vmem:[#allocation3 + $0xb8] sm:$0xff] }
 0x351   : > { %v3943_v0 = vpop.f32.mrf.mxu3  ;;  %v3834_v53 = vmul.f32 %v9118_v48, %v3802_v39 }
 0x352   : > { %6116 = vmatmul.msk.bf16.gmra.mxu2 %vm865_vm0, %v8155_v49  ;;  %v8159_v34 = vadd.f32 %v4206_v23, %v4016_v58  ;;  %v4214_v25 = vpop.f32.mrf.mxu0 }
 0x355   : > { %v8163_v32 = vpop.f32.mrf.mxu1  ;;  %v3677_v13 = vpop.f32.mrf.mxu2  ;;  %6173 = vmatmul.msk.bf16.gmra.mxu0 %vm865_vm0, %v9199_v36 }
 0x356   : > { %v3751_v57 = vadd.f32 %v3677_v13, %v3517_v7  ;;  %v3854_v7 = vpack.c.bf16 %v3834_v53, %v3801_v43  ;;  %v3568_v13 = vld [vmem:[#allocation3 + $0xc0] sm:$0xff] }
 0x358   : > { %v4017_v26 = vadd.f32 %v3943_v0, %v3751_v57  ;;  %v3519_v57 = vadd.f32 %v8091_v20, %v7923_v37  ;;  %v3520_v37 = vadd.f32 %v8091_v20, %v7937_v50 }
 0x359   : > { %v3945_v24 = vpop.f32.mrf.mxu3 }
 0x35a   : > { %v8170_v23 = vadd.f32 %v4209_v60, %v4017_v26  ;;  %v4216_v12 = vpop.f32.mrf.mxu0  ;;  %v8179_v60 = vpack.c.bf16 %v3568_v13, %v3567_v35 }
 0x35d   : > { %v8174_v19 = vpop.f32.mrf.mxu1  ;;  %v3679_v58 = vpop.f32.mrf.mxu2 }
 0x35e   : > { %v3752_v9 = vadd.f32 %v3679_v58, %v3518_v4  ;;  %6145 = vmatmul.msk.bf16.gmra.mxu3 %vm865_vm0, %v3854_v7  ;;  %v3803_v7 = vld [vmem:[#allocation3 + $0xc9] sm:$0xff] }
 0x360   : > { %v4018_v31 = vadd.f32 %v3945_v24, %v3752_v9  ;;  %6192 = vmatmul.msk.bf16.gmra.mxu1 %vm865_vm0, %v7897_v54  ;;  %v3804_v9 = vld [vmem:[#allocation3 + $0xd1] sm:$0xff]  ;;  %v9200_v24 = vpack.c.bf16 %v7997_v16, %v7993_v1  ;;  %v3569_v1 = vld [vmem:[#allocation3 + $0xc8] sm:$0xff] }
 0x361   : > { %v3948_v40 = vpop.f32.mrf.mxu3  ;;  %v3836_v43 = vmul.f32 %v7331_v33, %v3804_v9 }
 0x362   : > { %6117 = vmatmul.msk.bf16.gmra.mxu2 %vm865_vm0, %v8179_v60  ;;  %v8183_v0 = vadd.f32 %v4211_v51, %v4018_v31  ;;  %v4219_v39 = vpop.f32.mrf.mxu0 }
 0x365   : > { %v8187_v36 = vpop.f32.mrf.mxu1  ;;  %v3682_v26 = vpop.f32.mrf.mxu2  ;;  %6174 = vmatmul.msk.bf16.gmra.mxu0 %vm865_vm0, %v9200_v24 }
 0x366   : > { %v3753_v53 = vadd.f32 %v3682_v26, %v3519_v57  ;;  %v3855_v57 = vpack.c.bf16 %v3836_v43, %v3803_v7  ;;  %v3570_v26 = vld [vmem:[#allocation3 + $0xd0] sm:$0xff] }
 0x368   : > { %v4019_v4 = vadd.f32 %v3948_v40, %v3753_v53  ;;  %v3521_v53 = vadd.f32 %v8091_v20, %v7959_v28  ;;  %v3522_v28 = vadd.f32 %v8091_v20, %v7973_v41 }
 0x369   : > { %v3950_v58 = vpop.f32.mrf.mxu3 }
 0x36a   : > { %v8194_v51 = vadd.f32 %v4214_v25, %v4019_v4  ;;  %v4221_v13 = vpop.f32.mrf.mxu0  ;;  %v8203_v25 = vpack.c.bf16 %v3570_v26, %v3569_v1 }
 0x36d   : > { %v8198_v35 = vpop.f32.mrf.mxu1  ;;  %v3684_v31 = vpop.f32.mrf.mxu2 }
 0x36e   : > { %v3754_v48 = vadd.f32 %v3684_v31, %v3520_v37  ;;  %6146 = vmatmul.msk.bf16.gmra.mxu3 %vm865_vm0, %v3855_v57  ;;  %v3805_v57 = vld [vmem:[#allocation3 + $0xd9] sm:$0xff] }
 0x370   : > { %v4020_v16 = vadd.f32 %v3950_v58, %v3754_v48  ;;  %6193 = vmatmul.msk.bf16.gmra.mxu1 %vm865_vm0, %v7933_v18  ;;  %v3806_v48 = vld [vmem:[#allocation3 + $0xe1] sm:$0xff]  ;;  %v9201_v58 = vpack.c.bf16 %v8039_v52, %v8035_v17  ;;  %v3571_v17 = vld [vmem:[#allocation3 + $0xd8] sm:$0xff] }
 0x371   : > { %v3953_v50 = vpop.f32.mrf.mxu3  ;;  %v3838_v7 = vmul.f32 %v7358_v44, %v3806_v48 }
 0x372   : > { %6118 = vmatmul.msk.bf16.gmra.mxu2 %vm865_vm0, %v8203_v25  ;;  %v8207_v40 = vadd.f32 %v4216_v12, %v4020_v16  ;;  %v4224_v9 = vpop.f32.mrf.mxu0 }
 0x375   : > { %v8211_v24 = vpop.f32.mrf.mxu1  ;;  %v3687_v4 = vpop.f32.mrf.mxu2  ;;  %6175 = vmatmul.msk.bf16.gmra.mxu0 %vm865_vm0, %v9201_v58 }
 0x376   : > { %v3755_v43 = vadd.f32 %v3687_v4, %v3521_v53  ;;  %v3856_v53 = vpack.c.bf16 %v3838_v7, %v3805_v57  ;;  %v3572_v4 = vld [vmem:[#allocation3 + $0xe0] sm:$0xff] }
 0x378   : > { %v4021_v37 = vadd.f32 %v3953_v50, %v3755_v43  ;;  %v3523_v43 = vadd.f32 %v8091_v20, %v7995_v11 }
 0x379   : > { %v3955_v31 = vpop.f32.mrf.mxu3 }
 0x37a   : > { %v8218_v12 = vadd.f32 %v4219_v39, %v4021_v37  ;;  %v4226_v26 = vpop.f32.mrf.mxu0  ;;  %v8227_v39 = vpack.c.bf16 %v3572_v4, %v3571_v17  ;;  %v3807_v4 = vld [vmem:[#allocation3 + $0xe9] sm:$0xff] }
 0x37d   : > { %v8222_v1 = vpop.f32.mrf.mxu1  ;;  %v3689_v16 = vpop.f32.mrf.mxu2 }
 0x37e   : > { %v3756_v33 = vadd.f32 %v3689_v16, %v3522_v28  ;;  %6147 = vmatmul.msk.bf16.gmra.mxu3 %vm865_vm0, %v3856_v53  ;;  %v3524_v53 = vadd.f32 %v8091_v20, %v8009_v14  ;;  %v3573_v14 = vld [vmem:[#allocation3 + $0xe8] sm:$0xff] }
 0x380   : > { %v4022_v52 = vadd.f32 %v3955_v31, %v3756_v33  ;;  %6194 = vmatmul.msk.bf16.gmra.mxu1 %vm865_vm0, %v7969_v61  ;;  %v3808_v33 = vld [vmem:[#allocation3 + $0xf1] sm:$0xff]  ;;  %v9202_v31 = vpack.c.bf16 %v8081_v22, %v8077_v55 }
 0x381   : > { %v3958_v41 = vpop.f32.mrf.mxu3  ;;  %v3840_v57 = vmul.f32 %v7395_v21, %v3808_v33  ;;  %v6354_v55 = vld [vmem:[%s8836_s3 + $0x60] sm:$0xff] }
 0x382   : > { %6119 = vmatmul.msk.bf16.gmra.mxu2 %vm865_vm0, %v8227_v39  ;;  %v8231_v50 = vadd.f32 %v4221_v13, %v4022_v52  ;;  %v4229_v48 = vpop.f32.mrf.mxu0  ;;  %v6356_v13 = vld [vmem:[%s8836_s3 + $0x70] sm:$0xff]  ;;  %4963 = vmatpush.bf16.msra.mxu3 %v6354_v55 }
 0x383   : > { %5197 = vmatpush.bf16.msra.mxu0 %v6356_v13  ;;  %v4076_v13 = vld [vmem:[#allocation3 + $0x10f] sm:$0xff] }
 0x385   : > { %v8235_v58 = vpop.f32.mrf.mxu1  ;;  %v3692_v37 = vpop.f32.mrf.mxu2  ;;  %6176 = vmatmul.msk.bf16.gmra.mxu0 %vm865_vm0, %v9202_v31  ;;  %v4075_v31 = vld [vmem:[#allocation3 + $0x107] sm:$0xff] }
 0x386   : > { %v3757_v7 = vadd.f32 %v3692_v37, %v3523_v43  ;;  %v3574_v43 = vld [vmem:[#allocation3 + $0xf0] sm:$0xff] }
 0x387   : > { %v8260_v33 = vpack.c.bf16 %v3574_v43, %v3573_v14  ;;  %v9203_v14 = vld [vmem:[#allocation90_spill] sm:$0xff] }
 0x388   : > { %v4023_v28 = vadd.f32 %v3958_v41, %v3757_v7  ;;  %v3857_v41 = vpack.c.bf16 %v3840_v57, %v3807_v4  ;;  %v3525_v4 = vadd.f32 %v8091_v20, %v8037_v30 }
 0x389   : > { %v3960_v16 = vpop.f32.mrf.mxu3 }
 0x38a   : > { %v8245_v11 = vadd.f32 %v4224_v9, %v4023_v28  ;;  %v4231_v17 = vpop.f32.mrf.mxu0  ;;  %v6352_v9 = vld [vmem:[%s8836_s3 + $0x50] sm:$0xff] }
 0x38b   : > { %4697 = vmatpush.bf16.msra.mxu2 %v6352_v9 }
 0x38d   : > { %v8252_v22 = vpop.f32.mrf.mxu1  ;;  %v3694_v52 = vpop.f32.mrf.mxu2 }
 0x38e   : > { %v3758_v37 = vadd.f32 %v3694_v52, %v3524_v53  ;;  %6148 = vmatmul.msk.bf16.gmra.mxu3 %vm865_vm0, %v3857_v41  ;;  %v4107_v53 = vmul.f32 %v9137_v15, %v4075_v31  ;;  %v3809_v31 = vld [vmem:[#allocation3 + $0xf9] sm:$0xff] }
 0x390   : > { %v4024_v7 = vadd.f32 %v3960_v16, %v3758_v37  ;;  %6195 = vmatmul.msk.bf16.gmra.mxu1 %vm865_vm0, %v8005_v47  ;;  %v4124_v41 = vpack.c.bf16 %v4076_v13, %v4107_v53  ;;  %v3810_v37 = vld [vmem:[#allocation3 + $0x101] sm:$0xff] }
 0x391   : > { %v3963_v28 = vpop.f32.mrf.mxu3  ;;  %v3842_v21 = vmul.f32 %v9203_v14, %v3810_v37  ;;  %v3576_v13 = vld [vmem:[#allocation3 + $0x100] sm:$0xff] }
 0x392   : > { %6120 = vmatmul.msk.bf16.gmra.mxu2 %vm865_vm0, %v8260_v33  ;;  %v8264_v57 = vadd.f32 %v4226_v26, %v4024_v7  ;;  %v4234_v16 = vpop.f32.mrf.mxu0  ;;  %v3526_v7 = vadd.f32 %v8091_v20, %v8057_v46  ;;  %v6358_v46 = vld [vmem:[%s8836_s3 + $0x80] sm:$0xff] }
 0x393   : > { %v3858_v42 = vpack.c.bf16 %v3842_v21, %v3809_v31  ;;  %5463 = vmatpush.bf16.msra.mxu1 %v6358_v46  ;;  %v9207_v46 = vld [vmem:[#allocation53_spill] sm:$0xff] }
 0x395   : > { %v8269_v55 = vpop.f32.mrf.mxu1  ;;  %v3697_v52 = vpop.f32.mrf.mxu2  ;;  %6177 = vmatmul.msk.bf16.gmra.mxu0 %vm865_vm0, %v4124_v41 }
 0x396   : > { %v3759_v43 = vadd.f32 %v3697_v52, %v3525_v4  ;;  %v3575_v4 = vld [vmem:[#allocation3 + $0xf8] sm:$0xff] }
 0x398   : > { %v4025_v9 = vadd.f32 %v3963_v28, %v3759_v43 }
 0x399   : > { %v3965_v44 = vpop.f32.mrf.mxu3 }
 0x39a   : > { %v8273_v26 = vadd.f32 %v4229_v48, %v4025_v9  ;;  %v4236_v30 = vpop.f32.mrf.mxu0  ;;  %v8282_v48 = vpack.c.bf16 %v3576_v13, %v3575_v4  ;;  %v4811_v9 = vld [vmem:[#allocation3 + $0x27] sm:$0xff]  ;;  %v4812_v13 = vld [vmem:[#allocation3 + $0x2f] sm:$0xff] }
 0x39d   : > { %v8277_v15 = vpop.f32.mrf.mxu1  ;;  %v3699_v2 = vpop.f32.mrf.mxu2 }
 0x39e   : > { %v3760_v53 = vadd.f32 %v3699_v2, %v3526_v7  ;;  %6149 = vmatmul.msk.bf16.gmra.mxu3 %vm865_vm0, %v3858_v42  ;;  %v3527_v42 = vadd.f32 %v8091_v20, %v8079_v6  ;;  %v4546_v7 = vld [vmem:[#allocation3 + $0x21] sm:$0xff]  ;;  %v3528_v6 = vadd.f32 %v8091_v20, %v8100_v62 }
 0x39f   : > { %v4578_v14 = vmul.f32 %v9207_v46, %v4546_v7 }
 0x3a0   : > { %v4026_v28 = vadd.f32 %v3965_v44, %v3760_v53  ;;  %6196 = vmatmul.msk.bf16.gmra.mxu1 %vm865_vm0, %v8047_v29 }
 0x3a1   : > { %v3968_v52 = vpop.f32.mrf.mxu3 }
 0x3a2   : > { %6121 = vmatmul.msk.bf16.gmra.mxu2 %vm865_vm0, %v8282_v48  ;;  %v8289_v21 = vadd.f32 %v4231_v17, %v4026_v28  ;;  %v4239_v44 = vpop.f32.mrf.mxu0  ;;  %v9206_v17 = vld [vmem:[#allocation7_spill] sm:$0xff] }
 0x3a3   : > { %v4843_v4 = vmul.f32 %v9206_v17, %v4811_v9  ;;  %v3529_v9 = vadd.f32 %v8091_v20, %v8119_v59 }
 0x3a4   : > { %9204 = vst [vmem:[#allocation68_spill] sm:$0xff] %v8289_v21 }
 0x3a5   : > { %v8293_v2 = vpop.f32.mrf.mxu1  ;;  %v3702_v41 = vpop.f32.mrf.mxu2  ;;  %6274 = vmatmul.msk.bf16.vlgmr.msra.gmra.mxu0 %vm865_vm0, %v7861_v27 }
 0x3a6   : > { %v3761_v43 = vadd.f32 %v3702_v41, %v3527_v42  ;;  %v4875_v41 = vpack.c.bf16 %v4812_v13, %v4843_v4 }
 0x3a8   : > { %v4027_v37 = vadd.f32 %v3968_v52, %v3761_v43  ;;  %v4545_v52 = vld [vmem:[#allocation3 + $0x19] sm:$0xff] }
 0x3a9   : > { %v3970_v31 = vpop.f32.mrf.mxu3 }
 0x3aa   : > { %v8297_v53 = vadd.f32 %v4234_v16, %v4027_v37  ;;  %v4241_v28 = vpop.f32.mrf.mxu0  ;;  %v4609_v16 = vpack.c.bf16 %v4578_v14, %v4545_v52  ;;  %v4814_v14 = vld [vmem:[#allocation3 + $0x3f] sm:$0xff]  ;;  %v6409_v52 = vld [vmem:[#allocation3 + $0x31] sm:$0xff] }
 0x3ac   : > { %9205 = vst [vmem:[#allocation66_spill] sm:$0xff] %v8297_v53 }
 0x3ad   : > { %v8303_v21 = vpop.f32.mrf.mxu1  ;;  %v3704_v42 = vpop.f32.mrf.mxu2 }
 0x3ae   : > { %v3762_v27 = vadd.f32 %v3704_v42, %v3528_v6  ;;  %6246 = vmatmul.msk.bf16.vlgmr.msra.gmra.mxu3 %vm865_vm0, %v4875_v41  ;;  %v4813_v6 = vld [vmem:[#allocation3 + $0x37] sm:$0xff] }
 0x3af   : > { %v9209_v41 = vld [vmem:[#allocation20_spill] sm:$0xff] }
 0x3b0   : > { %v4028_v43 = vadd.f32 %v3970_v31, %v3762_v27  ;;  %6197 = vmatmul.msk.bf16.gmra.mxu1 %vm865_vm0, %v8094_v8  ;;  %v3530_v27 = vadd.f32 %v8091_v20, %v8139_v63 }
 0x3b1   : > { %v3973_v37 = vpop.f32.mrf.mxu3 }
 0x3b2   : > { %6218 = vmatmul.msk.bf16.vlgmr.msra.gmra.mxu2 %vm865_vm0, %v4609_v16  ;;  %v8309_v62 = vadd.f32 %v4236_v30, %v4028_v43  ;;  %v4244_v7 = vpop.f32.mrf.mxu0  ;;  %v4845_v30 = vmul.f32 %v9209_v41, %v4813_v6  ;;  %v9210_v43 = vld [vmem:[#allocation54_spill] sm:$0xff]  ;;  %v3531_v6 = vadd.f32 %v8091_v20, %v8150_v38  ;;  %v3532_v38 = vadd.f32 %v8091_v20, %v8163_v32 }
 0x3b3   : > { %v4580_v16 = vmul.f32 %v6409_v52, %v9210_v43  ;;  %v4816_v52 = vld [vmem:[#allocation3 + $0x4f] sm:$0xff] }
 0x3b4   : > { %9208 = vst [vmem:[#allocation69_spill] sm:$0xff] %v8309_v62 }
 0x3b5   : > { %v8313_v17 = vpop.f32.mrf.mxu1  ;;  %v3707_v13 = vpop.f32.mrf.mxu2  ;;  %6275 = vmatmul.msk.bf16.gmra.mxu0 %vm865_vm0, %v7897_v54 }
 0x3b6   : > { %v3763_v4 = vadd.f32 %v3707_v13, %v3529_v9  ;;  %v4876_v13 = vpack.c.bf16 %v4814_v14, %v4845_v30 }
 0x3b8   : > { %v4029_v31 = vadd.f32 %v3973_v37, %v3763_v4  ;;  %v6410_v37 = vld [vmem:[#allocation3 + $0x29] sm:$0xff] }
 0x3b9   : > { %v3975_v46 = vpop.f32.mrf.mxu3  ;;  %v4610_v4 = vpack.c.bf16 %v4580_v16, %v6410_v37 }
 0x3ba   : > { %v8317_v42 = vadd.f32 %v4239_v44, %v4029_v31  ;;  %v4246_v59 = vpop.f32.mrf.mxu0 }
 0x3bd   : > { %v3709_v62 = vpop.f32.mrf.mxu2  ;;  %v4433_v9 = vpop.f32.mrf.mxu1 }
 0x3be   : > { %v3764_v53 = vadd.f32 %v3709_v62, %v3530_v27  ;;  %v8324_v54 = vadd.f32 %v4433_v9, %v8115_v10  ;;  %6247 = vmatmul.msk.bf16.gmra.mxu3 %vm865_vm0, %v4876_v13  ;;  %v6411_v13 = vld [vmem:[#allocation3 + $0x41] sm:$0xff] }
 0x3c0   : > { %v4030_v44 = vadd.f32 %v3975_v46, %v3764_v53  ;;  %6198 = vmatmul.msk.bf16.gmra.mxu1 %vm865_vm0, %v8127_v56  ;;  %v4815_v46 = vld [vmem:[#allocation3 + $0x47] sm:$0xff] }
 0x3c1   : > { %v3978_v63 = vpop.f32.mrf.mxu3 }
 0x3c2   : > { %6219 = vmatmul.msk.bf16.gmra.mxu2 %vm865_vm0, %v4610_v4  ;;  %v8330_v31 = vadd.f32 %v4241_v28, %v4030_v44  ;;  %v4249_v62 = vpop.f32.mrf.mxu0  ;;  %v9211_v28 = vld [vmem:[#allocation26_spill] sm:$0xff]  ;;  %v9212_v44 = vld [vmem:[#allocation55_spill] sm:$0xff] }
 0x3c3   : > { %v4847_v16 = vmul.f32 %v9211_v28, %v4815_v46  ;;  %v4582_v37 = vmul.f32 %v6411_v13, %v9212_v44  ;;  %v4818_v44 = vld [vmem:[#allocation3 + $0x5f] sm:$0xff] }
 0x3c5   : > { %v3712_v14 = vpop.f32.mrf.mxu2  ;;  %v4435_v10 = vpop.f32.mrf.mxu1  ;;  %6276 = vmatmul.msk.bf16.gmra.mxu0 %vm865_vm0, %v7933_v18 }
 0x3c6   : > { %v3765_v41 = vadd.f32 %v3712_v14, %v3531_v6  ;;  %v8335_v30 = vadd.f32 %v4435_v10, %v8135_v3  ;;  %v4877_v6 = vpack.c.bf16 %v4816_v52, %v4847_v16 }
 0x3c8   : > { %v4031_v53 = vadd.f32 %v3978_v63, %v3765_v41  ;;  %v6412_v63 = vld [vmem:[#allocation3 + $0x39] sm:$0xff] }
 0x3c9   : > { %v3980_v27 = vpop.f32.mrf.mxu3  ;;  %v4611_v10 = vpack.c.bf16 %v4582_v37, %v6412_v63 }
 0x3ca   : > { %v8339_v43 = vadd.f32 %v4244_v7, %v4031_v53  ;;  %v4251_v9 = vpop.f32.mrf.mxu0  ;;  %v3533_v53 = vadd.f32 %v8091_v20, %v8174_v19  ;;  %v3534_v19 = vadd.f32 %v8091_v20, %v8187_v36 }
 0x3cd   : > { %v3714_v3 = vpop.f32.mrf.mxu2  ;;  %v4438_v4 = vpop.f32.mrf.mxu1 }
 0x3ce   : > { %v3766_v14 = vadd.f32 %v3714_v3, %v3532_v38  ;;  %v8346_v18 = vadd.f32 %v4438_v4, %v8146_v45  ;;  %6248 = vmatmul.msk.bf16.gmra.mxu3 %vm865_vm0, %v4877_v6  ;;  %v4817_v38 = vld [vmem:[#allocation3 + $0x57] sm:$0xff] }
 0x3cf   : > { %v6413_v6 = vld [vmem:[#allocation3 + $0x51] sm:$0xff] }
 0x3d0   : > { %v4032_v7 = vadd.f32 %v3980_v27, %v3766_v14  ;;  %6199 = vmatmul.msk.bf16.gmra.mxu1 %vm865_vm0, %v8155_v49  ;;  %v9214_v14 = vld [vmem:[#allocation56_spill] sm:$0xff] }
 0x3d1   : > { %v3983_v32 = vpop.f32.mrf.mxu3 }
 0x3d2   : > { %6220 = vmatmul.msk.bf16.gmra.mxu2 %vm865_vm0, %v4611_v10  ;;  %v8352_v41 = vadd.f32 %v4246_v59, %v4032_v7  ;;  %v4254_v46 = vpop.f32.mrf.mxu0  ;;  %v9213_v59 = vld [vmem:[#allocation32_spill] sm:$0xff]  ;;  %v4584_v7 = vmul.f32 %v6413_v6, %v9214_v14  ;;  %v4820_v6 = vld [vmem:[#allocation3 + $0x6f] sm:$0xff] }
 0x3d3   : > { %v4849_v3 = vmul.f32 %v9213_v59, %v4817_v38 }
 0x3d5   : > { %v3717_v52 = vpop.f32.mrf.mxu2  ;;  %v4440_v45 = vpop.f32.mrf.mxu1  ;;  %6277 = vmatmul.msk.bf16.gmra.mxu0 %vm865_vm0, %v7969_v61  ;;  %v4878_v10 = vpack.c.bf16 %v4818_v44, %v4849_v3  ;;  %v4819_v3 = vld [vmem:[#allocation3 + $0x67] sm:$0xff] }
 0x3d6   : > { %v3767_v28 = vadd.f32 %v3717_v52, %v3533_v53  ;;  %v8357_v16 = vadd.f32 %v4440_v45, %v8159_v34 }
 0x3d8   : > { %v4033_v27 = vadd.f32 %v3983_v32, %v3767_v28  ;;  %v6414_v32 = vld [vmem:[#allocation3 + $0x49] sm:$0xff]  ;;  %v3535_v28 = vadd.f32 %v8091_v20, %v8198_v35  ;;  %v3536_v35 = vadd.f32 %v8091_v20, %v8211_v24 }
 0x3d9   : > { %v3985_v13 = vpop.f32.mrf.mxu3  ;;  %v4612_v52 = vpack.c.bf16 %v4584_v7, %v6414_v32 }
 0x3da   : > { %v8361_v37 = vadd.f32 %v4249_v62, %v4033_v27  ;;  %v4256_v4 = vpop.f32.mrf.mxu0 }
 0x3dd   : > { %v3719_v34 = vpop.f32.mrf.mxu2  ;;  %v4443_v63 = vpop.f32.mrf.mxu1 }
 0x3de   : > { %v3768_v53 = vadd.f32 %v3719_v34, %v3534_v19  ;;  %v8368_v61 = vadd.f32 %v4443_v63, %v8170_v23  ;;  %6249 = vmatmul.msk.bf16.gmra.mxu3 %vm865_vm0, %v4878_v10  ;;  %v6415_v63 = vld [vmem:[#allocation3 + $0x61] sm:$0xff] }
 0x3df   : > { %v9216_v10 = vld [vmem:[#allocation58_spill] sm:$0xff] }
 0x3e0   : > { %v4034_v62 = vadd.f32 %v3985_v13, %v3768_v53  ;;  %6200 = vmatmul.msk.bf16.gmra.mxu1 %vm865_vm0, %v8179_v60  ;;  %v4586_v53 = vmul.f32 %v6415_v63, %v9216_v10 }
 0x3e1   : > { %v3988_v36 = vpop.f32.mrf.mxu3 }
 0x3e2   : > { %6221 = vmatmul.msk.bf16.gmra.mxu2 %vm865_vm0, %v4612_v52  ;;  %v8374_v45 = vadd.f32 %v4251_v9, %v4034_v62  ;;  %v4259_v27 = vpop.f32.mrf.mxu0  ;;  %v9215_v9 = vld [vmem:[#allocation38_spill] sm:$0xff] }
 0x3e3   : > { %v4851_v7 = vmul.f32 %v9215_v9, %v4819_v3  ;;  %v4821_v9 = vld [vmem:[#allocation3 + $0x77] sm:$0xff] }
 0x3e5   : > { %v3722_v38 = vpop.f32.mrf.mxu2  ;;  %v4445_v23 = vpop.f32.mrf.mxu1  ;;  %6278 = vmatmul.msk.bf16.gmra.mxu0 %vm865_vm0, %v8005_v47  ;;  %v4879_v32 = vpack.c.bf16 %v4820_v6, %v4851_v7 }
 0x3e6   : > { %v3769_v44 = vadd.f32 %v3722_v38, %v3535_v28  ;;  %v8379_v59 = vadd.f32 %v4445_v23, %v8183_v0  ;;  %v3537_v23 = vadd.f32 %v8091_v20, %v8222_v1  ;;  %v3538_v1 = vadd.f32 %v8091_v20, %v8235_v58 }
 0x3e8   : > { %v4035_v13 = vadd.f32 %v3988_v36, %v3769_v44  ;;  %v6416_v36 = vld [vmem:[#allocation3 + $0x59] sm:$0xff] }
 0x3e9   : > { %v3990_v19 = vpop.f32.mrf.mxu3  ;;  %v4613_v28 = vpack.c.bf16 %v4586_v53, %v6416_v36 }
 0x3ea   : > { %v8383_v14 = vadd.f32 %v4254_v46, %v4035_v13  ;;  %v4261_v34 = vpop.f32.mrf.mxu0 }
 0x3ed   : > { %v3724_v0 = vpop.f32.mrf.mxu2  ;;  %v4448_v62 = vpop.f32.mrf.mxu1 }
 0x3ee   : > { %v3770_v52 = vadd.f32 %v3724_v0, %v3536_v35  ;;  %v8390_v47 = vadd.f32 %v4448_v62, %v8194_v51  ;;  %6250 = vmatmul.msk.bf16.gmra.mxu3 %vm865_vm0, %v4879_v32  ;;  %v4822_v35 = vld [vmem:[#allocation3 + $0x7f] sm:$0xff]  ;;  %v6417_v0 = vld [vmem:[#allocation3 + $0x71] sm:$0xff] }
 0x3ef   : > { %v9218_v62 = vld [vmem:[#allocation61_spill] sm:$0xff] }
 0x3f0   : > { %v4036_v46 = vadd.f32 %v3990_v19, %v3770_v52  ;;  %6201 = vmatmul.msk.bf16.gmra.mxu1 %vm865_vm0, %v8203_v25  ;;  %v4588_v32 = vmul.f32 %v6417_v0, %v9218_v62 }
 0x3f1   : > { %v3993_v24 = vpop.f32.mrf.mxu3 }
 0x3f2   : > { %6222 = vmatmul.msk.bf16.gmra.mxu2 %vm865_vm0, %v4613_v28  ;;  %v8396_v38 = vadd.f32 %v4256_v4, %v4036_v46  ;;  %v4264_v44 = vpop.f32.mrf.mxu0  ;;  %v9217_v4 = vld [vmem:[#allocation44_spill] sm:$0xff]  ;;  %v6418_v28 = vld [vmem:[#allocation3 + $0x69] sm:$0xff] }
 0x3f3   : > { %v4853_v10 = vmul.f32 %v9217_v4, %v4821_v9 }
 0x3f5   : > { %v3727_v13 = vpop.f32.mrf.mxu2  ;;  %v4450_v51 = vpop.f32.mrf.mxu1  ;;  %6279 = vmatmul.msk.bf16.gmra.mxu0 %vm865_vm0, %v8047_v29  ;;  %v4880_v46 = vpack.c.bf16 %v4822_v35, %v4853_v10  ;;  %v4823_v35 = vld [vmem:[#allocation3 + $0x87] sm:$0xff]  ;;  %v4824_v10 = vld [vmem:[#allocation3 + $0x8f] sm:$0xff] }
 0x3f6   : > { %v3771_v3 = vadd.f32 %v3727_v13, %v3537_v23  ;;  %v8401_v6 = vadd.f32 %v4450_v51, %v8207_v40  ;;  %v3539_v13 = vadd.f32 %v8091_v20, %v8252_v22  ;;  %v3540_v22 = vadd.f32 %v8091_v20, %v8269_v55 }
 0x3f8   : > { %v4037_v19 = vadd.f32 %v3993_v24, %v3771_v3  ;;  %v4614_v24 = vpack.c.bf16 %v4588_v32, %v6418_v28  ;;  %v6419_v32 = vld [vmem:[#allocation3 + $0x81] sm:$0xff]  ;;  %v6420_v28 = vld [vmem:[#allocation3 + $0x79] sm:$0xff] }
 0x3f9   : > { %v3995_v7 = vpop.f32.mrf.mxu3 }
 0x3fa   : > { %v8405_v63 = vadd.f32 %v4259_v27, %v4037_v19  ;;  %v4266_v53 = vpop.f32.mrf.mxu0 }
 0x3fd   : > { %v3729_v40 = vpop.f32.mrf.mxu2  ;;  %v4453_v52 = vpop.f32.mrf.mxu1 }
 0x3fe   : > { %v3772_v36 = vadd.f32 %v3729_v40, %v3538_v1  ;;  %v8412_v29 = vadd.f32 %v4453_v52, %v8218_v12  ;;  %6251 = vmatmul.msk.bf16.gmra.mxu3 %vm865_vm0, %v4880_v46  ;;  %v9220_v40 = vld [vmem:[#allocation64_spill] sm:$0xff] }
 0x3ff   : > { %v4590_v52 = vmul.f32 %v6419_v32, %v9220_v40  ;;  %v6421_v32 = vld [vmem:[#allocation3 + $0x91] sm:$0xff] }
 0x400   : > { %v4038_v27 = vadd.f32 %v3995_v7, %v3772_v36  ;;  %6202 = vmatmul.msk.bf16.gmra.mxu1 %vm865_vm0, %v8227_v39  ;;  %v4592_v40 = vmul.f32 %v6421_v32, %v9100_v5  ;;  %v9224_v32 = vld [vmem:[#allocation70_spill] sm:$0xff] }
 0x401   : > { %v3998_v58 = vpop.f32.mrf.mxu3 }
 0x402   : > { %6223 = vmatmul.msk.bf16.gmra.mxu2 %vm865_vm0, %v4614_v24  ;;  %v8418_v23 = vadd.f32 %v4261_v34, %v4038_v27  ;;  %v4269_v51 = vpop.f32.mrf.mxu0  ;;  %v9219_v34 = vld [vmem:[#allocation49_spill] sm:$0xff]  ;;  %v4615_v24 = vpack.c.bf16 %v4590_v52, %v6420_v28  ;;  %v3543_v28 = vadd.f32 %v8091_v20, %v8303_v21  ;;  %v3544_v21 = vadd.f32 %v8091_v20, %v8313_v17 }
 0x403   : > { %v4855_v0 = vmul.f32 %v9219_v34, %v4823_v35  ;;  %v4826_v34 = vld [vmem:[#allocation3 + $0x9f] sm:$0xff] }
 0x405   : > { %v3732_v3 = vpop.f32.mrf.mxu2  ;;  %v4455_v12 = vpop.f32.mrf.mxu1  ;;  %6280 = vmatmul.msk.bf16.gmra.mxu0 %vm865_vm0, %v8094_v8  ;;  %v4881_v36 = vpack.c.bf16 %v4824_v10, %v4855_v0 }
 0x406   : > { %v3773_v19 = vadd.f32 %v3732_v3, %v3539_v13  ;;  %v8423_v9 = vadd.f32 %v4455_v12, %v8231_v50  ;;  %v3541_v13 = vadd.f32 %v8091_v20, %v8277_v15  ;;  %v3542_v15 = vadd.f32 %v8091_v20, %v8293_v2  ;;  %v6424_v20 = vld [vmem:[#allocation3 + $0x99] sm:$0xff] }
 0x408   : > { %v4039_v7 = vadd.f32 %v3998_v58, %v3773_v19 }
 0x409   : > { %v4000_v4 = vpop.f32.mrf.mxu3 }
 0x40a   : > { %v8427_v1 = vadd.f32 %v4264_v44, %v4039_v7  ;;  %v4271_v62 = vpop.f32.mrf.mxu0 }
 0x40d   : > { %v3734_v50 = vpop.f32.mrf.mxu2  ;;  %v4458_v46 = vpop.f32.mrf.mxu1 }
 0x40e   : > { %v3774_v27 = vadd.f32 %v3734_v50, %v3540_v22  ;;  %v8434_v8 = vadd.f32 %v4458_v46, %v8245_v11  ;;  %6252 = vmatmul.msk.bf16.gmra.mxu3 %vm865_vm0, %v4881_v36 }
 0x410   : > { %v4040_v44 = vadd.f32 %v4000_v4, %v3774_v27  ;;  %6203 = vmatmul.msk.bf16.gmra.mxu1 %vm865_vm0, %v8260_v33  ;;  %v4825_v4 = vld [vmem:[#allocation3 + $0x97] sm:$0xff]  ;;  %v6422_v27 = vld [vmem:[#allocation3 + $0x89] sm:$0xff] }
 0x411   : > { %v4003_v55 = vpop.f32.mrf.mxu3 }
 0x412   : > { %6224 = vmatmul.msk.bf16.gmra.mxu2 %vm865_vm0, %v4615_v24  ;;  %v8440_v58 = vadd.f32 %v4266_v53, %v4040_v44  ;;  %v4274_v7 = vpop.f32.mrf.mxu0  ;;  %v9221_v53 = vld [vmem:[#allocation51_spill] sm:$0xff]  ;;  %v4616_v44 = vpack.c.bf16 %v4592_v40, %v6422_v27 }
 0x413   : > { %v4857_v22 = vmul.f32 %v9221_v53, %v4825_v4  ;;  %v9223_v53 = vld [vmem:[#allocation18_spill] sm:$0xff] }
 0x415   : > { %v3737_v3 = vpop.f32.mrf.mxu2  ;;  %v4460_v12 = vpop.f32.mrf.mxu1  ;;  %6281 = vmatmul.msk.bf16.gmra.mxu0 %vm865_vm0, %v8127_v56  ;;  %v4882_v50 = vpack.c.bf16 %v4826_v34, %v4857_v22 }
 0x416   : > { %v3775_v11 = vadd.f32 %v3737_v3, %v3541_v13  ;;  %v8445_v19 = vadd.f32 %v4460_v12, %v8264_v57  ;;  %v9222_v13 = vld [vmem:[#allocation68_spill] sm:$0xff] }
 0x418   : > { %v4041_v35 = vadd.f32 %v4003_v55, %v3775_v11  ;;  %v4827_v11 = vld [vmem:[#allocation3 + $0xa7] sm:$0xff] }
 0x419   : > { %v4005_v10 = vpop.f32.mrf.mxu3  ;;  %v4859_v22 = vmul.f32 %v9223_v53, %v4827_v11  ;;  %v4830_v53 = vld [vmem:[#allocation3 + $0xbf] sm:$0xff] }
 0x41a   : > { %v8449_v0 = vadd.f32 %v4269_v51, %v4041_v35  ;;  %v4276_v51 = vpop.f32.mrf.mxu0 }
 0x41d   : > { %v3739_v57 = vpop.f32.mrf.mxu2  ;;  %v4463_v52 = vpop.f32.mrf.mxu1 }
 0x41e   : > { %v3776_v46 = vadd.f32 %v3739_v57, %v3542_v15  ;;  %v8456_v56 = vadd.f32 %v4463_v52, %v8273_v26  ;;  %6253 = vmatmul.msk.bf16.gmra.mxu3 %vm865_vm0, %v4882_v50  ;;  %v6423_v15 = vld [vmem:[#allocation3 + $0xa1] sm:$0xff] }
 0x41f   : > { %v4594_v40 = vmul.f32 %v6423_v15, %v9224_v32  ;;  %v4341_v50 = vld [vmem:[#allocation3 + $0x108] sm:$0xff]  ;;  %v6425_v15 = vld [vmem:[#allocation3 + $0xb1] sm:$0xff]  ;;  %v9228_v32 = vld [vmem:[#allocation73_spill] sm:$0xff] }
 0x420   : > { %v4042_v36 = vadd.f32 %v4005_v10, %v3776_v46  ;;  %6204 = vmatmul.msk.bf16.gmra.mxu1 %vm865_vm0, %v8282_v48  ;;  %v4828_v10 = vld [vmem:[#allocation3 + $0xaf] sm:$0xff] }
 0x421   : > { %v4008_v2 = vpop.f32.mrf.mxu3  ;;  %v4617_v17 = vpack.c.bf16 %v4594_v40, %v6424_v20  ;;  %v4596_v40 = vmul.f32 %v6425_v15, %v9228_v32  ;;  %v6426_v20 = vld [vmem:[#allocation3 + $0xa9] sm:$0xff]  ;;  %v6427_v15 = vld [vmem:[#allocation3 + $0xc1] sm:$0xff]  ;;  %v9233_v32 = vld [vmem:[#allocation76_spill] sm:$0xff] }
 0x422   : > { %6225 = vmatmul.msk.bf16.gmra.mxu2 %vm865_vm0, %v4616_v44  ;;  %v8462_v5 = vadd.f32 %v4271_v62, %v4042_v36  ;;  %v5199_v35 = vpop.f32.mrf.mxu0  ;;  %v4342_v62 = vld [vmem:[#allocation3 + $0x110] sm:$0xff]  ;;  %v9225_v36 = vld [vmem:[#allocation66_spill] sm:$0xff] }
 0x423   : > { %v8480_v44 = vpack.c.bf16 %v4342_v62, %v4341_v50 }
 0x425   : > { %v3742_v24 = vpop.f32.mrf.mxu2  ;;  %v4465_v26 = vpop.f32.mrf.mxu1  ;;  %6282 = vmatmul.msk.bf16.gmra.mxu0 %vm865_vm0, %v8155_v49  ;;  %v4883_v49 = vpack.c.bf16 %v4828_v10, %v4859_v22  ;;  %v4829_v10 = vld [vmem:[#allocation3 + $0xb7] sm:$0xff] }
 0x426   : > { %v3777_v55 = vadd.f32 %v3742_v24, %v3543_v28  ;;  %v8467_v3 = vadd.f32 %v4465_v26, %v9222_v13  ;;  %v9226_v13 = vld [vmem:[#allocation69_spill] sm:$0xff] }
 0x428   : > { %v4043_v12 = vadd.f32 %v4008_v2, %v3777_v55 }
 0x429   : > { %v4010_v4 = vpop.f32.mrf.mxu3 }
 0x42a   : > { %v8471_v34 = vadd.f32 %v4274_v7, %v4043_v12  ;;  %v5201_v24 = vpop.f32.mrf.mxu0 }
 0x42d   : > { %v3744_v57 = vpop.f32.mrf.mxu2  ;;  %v4468_v52 = vpop.f32.mrf.mxu1 }
 0x42e   : > { %v3778_v46 = vadd.f32 %v3744_v57, %v3544_v21  ;;  %v8478_v27 = vadd.f32 %v4468_v52, %v9225_v36  ;;  %6254 = vmatmul.msk.bf16.gmra.mxu3 %vm865_vm0, %v4883_v49  ;;  %v9227_v21 = vld [vmem:[#allocation25_spill] sm:$0xff]  ;;  %v9229_v36 = vld [vmem:[#allocation72_spill] sm:$0xff] }
 0x430   : > { %v4044_v7 = vadd.f32 %v4010_v4, %v3778_v46  ;;  %6205 = vmatmul.msk.bf16.gmra.mxu1 %vm865_vm0, %v8480_v44 }
 0x431   : > { %v4965_v2 = vpop.f32.mrf.mxu3 }
 0x432   : > { %6226 = vmatmul.msk.bf16.gmra.mxu2 %vm865_vm0, %v4617_v17  ;;  %v8486_v28 = vadd.f32 %v4276_v51, %v4044_v7  ;;  %v4861_v51 = vmul.f32 %v9227_v21, %v4829_v10  ;;  %v5204_v49 = vpop.f32.mrf.mxu0  ;;  %v4618_v17 = vpack.c.bf16 %v4596_v40, %v6426_v20  ;;  %v4831_v10 = vld [vmem:[#allocation3 + $0xc7] sm:$0xff]  ;;  %v4598_v40 = vmul.f32 %v6427_v15, %v9233_v32 }
 0x433   : > { %v9238_v15 = vld [vmem:[#allocation78_spill] sm:$0xff] }
 0x434   : > { %v4884_v50 = vpack.c.bf16 %v4830_v53, %v4861_v51  ;;  %v4832_v53 = vld [vmem:[#allocation3 + $0xcf] sm:$0xff] }
 0x435   : > { %v4470_v26 = vpop.f32.mrf.mxu1  ;;  %v4699_v55 = vpop.f32.mrf.mxu2  ;;  %6283 = vmatmul.msk.bf16.gmra.mxu0 %vm865_vm0, %v8179_v60  ;;  %v9232_v51 = vld [vmem:[#allocation31_spill] sm:$0xff] }
 0x436   : > { %v8489_v12 = vadd.f32 %v4470_v26, %v9226_v13  ;;  %v4779_v11 = vadd.f32 %v4699_v55, %v8324_v54 }
 0x438   : > { %v5045_v4 = vadd.f32 %v4965_v2, %v4779_v11 }
 0x439   : > { %v4967_v62 = vpop.f32.mrf.mxu3 }
 0x43a   : > { %v8494_v22 = vadd.f32 %v5199_v35, %v5045_v4  ;;  %v9230_v35 = vld [vmem:[#allocation74_spill] sm:$0xff]  ;;  %v5206_v11 = vpop.f32.mrf.mxu0 }
 0x43b   : > { %v9231_v7 = vpack.c.bf16 %v9229_v36, %v9230_v35  ;;  %v6428_v36 = vld [vmem:[#allocation3 + $0xb9] sm:$0xff] }
 0x43c   : > { %v4619_v35 = vpack.c.bf16 %v4598_v40, %v6428_v36 }
 0x43d   : > { %v4473_v57 = vpop.f32.mrf.mxu1  ;;  %v4701_v52 = vpop.f32.mrf.mxu2 }
 0x43e   : > { %v8499_v54 = vadd.f32 %v4473_v57, %v8317_v42  ;;  %v4780_v60 = vadd.f32 %v4701_v52, %v8335_v30  ;;  %6255 = vmatmul.msk.bf16.gmra.mxu3 %vm865_vm0, %v4884_v50 }
 0x440   : > { %v5046_v46 = vadd.f32 %v4967_v62, %v4780_v60  ;;  %6302 = vmatmul.msk.bf16.vlgmr.msra.gmra.mxu1 %vm865_vm0, %v9231_v7  ;;  %v9234_v60 = vld [vmem:[#allocation75_spill] sm:$0xff] }
 0x441   : > { %v4970_v2 = vpop.f32.mrf.mxu3 }
 0x442   : > { %6227 = vmatmul.msk.bf16.gmra.mxu2 %vm865_vm0, %v4618_v17  ;;  %v8508_v26 = vadd.f32 %v5201_v24, %v5046_v46  ;;  %v4863_v24 = vmul.f32 %v9232_v51, %v4831_v10  ;;  %v9235_v46 = vld [vmem:[#allocation77_spill] sm:$0xff]  ;;  %v5209_v7 = vpop.f32.mrf.mxu0 }
 0x443   : > { %v4834_v10 = vld [vmem:[#allocation3 + $0xdf] sm:$0xff] }
 0x444   : > { %v4885_v52 = vpack.c.bf16 %v4832_v53, %v4863_v24  ;;  %v9237_v53 = vld [vmem:[#allocation37_spill] sm:$0xff]  ;;  %v6429_v24 = vld [vmem:[#allocation3 + $0xd1] sm:$0xff] }
 0x445   : > { %v4475_v55 = vpop.f32.mrf.mxu1  ;;  %v4704_v42 = vpop.f32.mrf.mxu2  ;;  %6284 = vmatmul.msk.bf16.gmra.mxu0 %vm865_vm0, %v8203_v25  ;;  %v4600_v32 = vmul.f32 %v6429_v24, %v9238_v15 }
 0x446   : > { %v8511_v13 = vadd.f32 %v4475_v55, %v8330_v31  ;;  %v4781_v30 = vadd.f32 %v4704_v42, %v8346_v18 }
 0x448   : > { %v5047_v4 = vadd.f32 %v4970_v2, %v4781_v30  ;;  %v4833_v30 = vld [vmem:[#allocation3 + $0xd7] sm:$0xff] }
 0x449   : > { %v4972_v62 = vpop.f32.mrf.mxu3  ;;  %v4865_v51 = vmul.f32 %v9237_v53, %v4833_v30  ;;  %v9242_v30 = vld [vmem:[#allocation43_spill] sm:$0xff]  ;;  %v9243_v53 = vld [vmem:[#allocation80_spill] sm:$0xff] }
 0x44a   : > { %v8516_v21 = vadd.f32 %v5204_v49, %v5047_v4  ;;  %v9236_v49 = vpack.c.bf16 %v9234_v60, %v9235_v46  ;;  %v6430_v60 = vld [vmem:[#allocation3 + $0xc9] sm:$0xff] }
 0x44b   : > { %v4620_v46 = vpack.c.bf16 %v4600_v32, %v6430_v60  ;;  %v4838_v60 = vld [vmem:[#allocation3 + $0xff] sm:$0xff] }
 0x44d   : > { %v4478_v57 = vpop.f32.mrf.mxu1  ;;  %v4706_v31 = vpop.f32.mrf.mxu2 }
 0x44e   : > { %v8521_v18 = vadd.f32 %v4478_v57, %v8339_v43  ;;  %v4782_v25 = vadd.f32 %v4706_v31, %v8357_v16  ;;  %6256 = vmatmul.msk.bf16.gmra.mxu3 %vm865_vm0, %v4885_v52  ;;  %v4886_v57 = vpack.c.bf16 %v4834_v10, %v4865_v51  ;;  %v9239_v52 = vld [vmem:[#allocation79_spill] sm:$0xff]  ;;  %v6431_v10 = vld [vmem:[#allocation3 + $0xe1] sm:$0xff] }
 0x44f   : > { %v4602_v51 = vmul.f32 %v6431_v10, %v9243_v53 }
 0x450   : > { %v5048_v50 = vadd.f32 %v4972_v62, %v4782_v25  ;;  %6303 = vmatmul.msk.bf16.gmra.mxu1 %vm865_vm0, %v9236_v49  ;;  %v9240_v25 = vld [vmem:[#allocation85_spill] sm:$0xff] }
 0x451   : > { %v4975_v20 = vpop.f32.mrf.mxu3 }
 0x452   : > { %6228 = vmatmul.msk.bf16.gmra.mxu2 %vm865_vm0, %v4619_v35  ;;  %v8530_v17 = vadd.f32 %v5206_v11, %v5048_v50  ;;  %v5211_v11 = vpop.f32.mrf.mxu0  ;;  %v9241_v50 = vpack.c.bf16 %v9239_v52, %v9240_v25 }
 0x455   : > { %v4480_v43 = vpop.f32.mrf.mxu1  ;;  %v4709_v2 = vpop.f32.mrf.mxu2  ;;  %6285 = vmatmul.msk.bf16.gmra.mxu0 %vm865_vm0, %v8227_v39 }
 0x456   : > { %v8533_v16 = vadd.f32 %v4480_v43, %v8352_v41  ;;  %v4783_v55 = vadd.f32 %v4709_v2, %v8368_v61  ;;  %v4835_v2 = vld [vmem:[#allocation3 + $0xe7] sm:$0xff] }
 0x458   : > { %v5049_v42 = vadd.f32 %v4975_v20, %v4783_v55  ;;  %v4836_v55 = vld [vmem:[#allocation3 + $0xef] sm:$0xff] }
 0x459   : > { %v4977_v4 = vpop.f32.mrf.mxu3 }
 0x45a   : > { %v8538_v62 = vadd.f32 %v5209_v7, %v5049_v42  ;;  %v5214_v20 = vpop.f32.mrf.mxu0 }
 0x45d   : > { %v4483_v40 = vpop.f32.mrf.mxu1  ;;  %v4711_v41 = vpop.f32.mrf.mxu2 }
 0x45e   : > { %v8543_v61 = vadd.f32 %v4483_v40, %v8361_v37  ;;  %v4784_v39 = vadd.f32 %v4711_v41, %v8379_v59  ;;  %6257 = vmatmul.msk.bf16.gmra.mxu3 %vm865_vm0, %v4886_v57  ;;  %v9244_v40 = vld [vmem:[#allocation88_spill] sm:$0xff]  ;;  %v9245_v41 = vld [vmem:[#allocation81_spill] sm:$0xff] }
 0x45f   : > { %v9246_v57 = vpack.c.bf16 %v9244_v40, %v9245_v41 }
 0x460   : > { %v5050_v31 = vadd.f32 %v4977_v4, %v4784_v39  ;;  %6304 = vmatmul.msk.bf16.gmra.mxu1 %vm865_vm0, %v9241_v50  ;;  %v4867_v4 = vmul.f32 %v9242_v30, %v4835_v2  ;;  %v6432_v39 = vld [vmem:[#allocation3 + $0xd9] sm:$0xff] }
 0x461   : > { %v4980_v36 = vpop.f32.mrf.mxu3 }
 0x462   : > { %6229 = vmatmul.msk.bf16.gmra.mxu2 %vm865_vm0, %v4620_v46  ;;  %v8552_v49 = vadd.f32 %v5211_v11, %v5050_v31  ;;  %v4621_v31 = vpack.c.bf16 %v4602_v51, %v6432_v39  ;;  %v5216_v52 = vpop.f32.mrf.mxu0  ;;  %v9247_v46 = vld [vmem:[#allocation48_spill] sm:$0xff]  ;;  %v4840_v51 = vld [vmem:[#allocation3 + $0x10f] sm:$0xff] }
 0x465   : > { %v4485_v35 = vpop.f32.mrf.mxu1  ;;  %v4714_v37 = vpop.f32.mrf.mxu2  ;;  %6286 = vmatmul.msk.bf16.gmra.mxu0 %vm865_vm0, %v8260_v33 }
 0x466   : > { %v8555_v7 = vadd.f32 %v4485_v35, %v8374_v45  ;;  %v4785_v59 = vadd.f32 %v4714_v37, %v8390_v47  ;;  %v4887_v45 = vpack.c.bf16 %v4836_v55, %v4867_v4  ;;  %v6433_v35 = vld [vmem:[#allocation3 + $0xf1] sm:$0xff]  ;;  %v9248_v37 = vld [vmem:[#allocation82_spill] sm:$0xff] }
 0x467   : > { %v9249_v55 = vld [vmem:[#allocation91_spill] sm:$0xff] }
 0x468   : > { %v5051_v43 = vadd.f32 %v4980_v36, %v4785_v59  ;;  %v4604_v59 = vmul.f32 %v6433_v35, %v9248_v37  ;;  %v4842_v37 = vld [vmem:[#allocation3 + $0x11f] sm:$0xff] }
 0x469   : > { %v4982_v32 = vpop.f32.mrf.mxu3 }
 0x46a   : > { %v8560_v42 = vadd.f32 %v5214_v20, %v5051_v43 }
 0x46d   : > { %v4488_v11 = vpop.f32.mrf.mxu1  ;;  %v4716_v24 = vpop.f32.mrf.mxu2 }
 0x46e   : > { %v8565_v15 = vadd.f32 %v4488_v11, %v8383_v14  ;;  %v4786_v47 = vadd.f32 %v4716_v24, %v8401_v6  ;;  %6258 = vmatmul.msk.bf16.gmra.mxu3 %vm865_vm0, %v4887_v45  ;;  %v4837_v6 = vld [vmem:[#allocation3 + $0xf7] sm:$0xff]  ;;  %v9252_v11 = vld [vmem:[#allocation50_spill] sm:$0xff] }
 0x46f   : > { %v4869_v36 = vmul.f32 %v9247_v46, %v4837_v6  ;;  %v6435_v45 = vld [vmem:[#allocation3 + $0x101] sm:$0xff] }
 0x470   : > { %v5052_v33 = vadd.f32 %v4982_v32, %v4786_v47  ;;  %6305 = vmatmul.msk.bf16.gmra.mxu1 %vm865_vm0, %v9246_v57  ;;  %v9253_v47 = vld [vmem:[#allocation87_spill] sm:$0xff]  ;;  %v9254_v57 = vld [vmem:[#allocation93_spill] sm:$0xff] }
 0x471   : > { %v4888_v43 = vpack.c.bf16 %v4838_v60, %v4869_v36  ;;  %v4606_v32 = vmul.f32 %v6435_v45, %v9253_v47  ;;  %v9257_v36 = vld [vmem:[#allocation52_spill] sm:$0xff]  ;;  %v9262_v45 = vld [vmem:[#allocation97_spill] sm:$0xff]  ;;  %v9263_v47 = vld [vmem:[#allocation98_spill] sm:$0xff] }
 0x472   : > { %6230 = vmatmul.msk.bf16.gmra.mxu2 %vm865_vm0, %v4621_v31  ;;  %v8574_v25 = vadd.f32 %v5216_v52, %v5052_v33  ;;  %v5107_v52 = vld [vmem:[#allocation3 + $0x118] sm:$0xff] }
 0x475   : > { %v4490_v14 = vpop.f32.mrf.mxu1  ;;  %6287 = vmatmul.msk.bf16.gmra.mxu0 %vm865_vm0, %v8282_v48  ;;  %v6434_v48 = vld [vmem:[#allocation3 + $0xe9] sm:$0xff] }
 0x476   : > { %v8577_v50 = vadd.f32 %v4490_v14, %v8396_v38  ;;  %v9250_v38 = vld [vmem:[#allocation86_spill] sm:$0xff]  ;;  %v4622_v4 = vpack.c.bf16 %v4604_v59, %v6434_v48  ;;  %v5108_v14 = vld [vmem:[#allocation3 + $0x120] sm:$0xff]  ;;  %v6437_v59 = vld [vmem:[#allocation3 + $0x111] sm:$0xff] }
 0x477   : > { %v9251_v30 = vpack.c.bf16 %v9249_v55, %v9250_v38  ;;  %v5124_v6 = vpack.c.bf16 %v5108_v14, %v5107_v52  ;;  %v9260_v48 = vld [vmem:[#allocation92_spill] sm:$0xff] }
 0x47d   : > { %v4493_v20 = vpop.f32.mrf.mxu1 }
 0x47e   : > { %v8584_v2 = vadd.f32 %v4493_v20, %v8405_v63  ;;  %6259 = vmatmul.msk.bf16.gmra.mxu3 %vm865_vm0, %v4888_v43  ;;  %v4839_v63 = vld [vmem:[#allocation3 + $0x107] sm:$0xff] }
 0x47f   : > { %v4871_v24 = vmul.f32 %v9252_v11, %v4839_v63  ;;  %v9258_v20 = vld [vmem:[#allocation90_spill] sm:$0xff] }
 0x480   : > { %6306 = vmatmul.msk.bf16.gmra.mxu1 %vm865_vm0, %v9251_v30  ;;  %v4608_v43 = vmul.f32 %v6437_v59, %v9258_v20  ;;  %v5219_v59 = vpop.f32.mrf.mxu0 }
 0x481   : > { %v4889_v40 = vpack.c.bf16 %v4840_v51, %v4871_v24 }
 0x482   : > { %6231 = vmatmul.msk.bf16.gmra.mxu2 %vm865_vm0, %v4622_v4 }
 0x485   : > { %v4495_v10 = vpop.f32.mrf.mxu1  ;;  %6288 = vmatmul.msk.bf16.gmra.mxu0 %vm865_vm0, %v8480_v44  ;;  %v6436_v44 = vld [vmem:[#allocation3 + $0xf9] sm:$0xff] }
 0x486   : > { %v8593_v53 = vadd.f32 %v4495_v10, %v8418_v23  ;;  %v9255_v23 = vld [vmem:[#allocation89_spill] sm:$0xff]  ;;  %v4623_v31 = vpack.c.bf16 %v4606_v32, %v6436_v44  ;;  %v6438_v10 = vld [vmem:[#allocation3 + $0x109] sm:$0xff]  ;;  %v9264_v32 = vpack.c.bf16 %v9262_v45, %v9263_v47  ;;  %v9274_v47 = vld [vmem:[#allocation16_spill] sm:$0xff] }
 0x487   : > { %v9256_v39 = vpack.c.bf16 %v9254_v57, %v9255_v23  ;;  %v4624_v63 = vpack.c.bf16 %v4608_v43, %v6438_v10  ;;  %v9265_v23 = vld [vmem:[#allocation11_spill] sm:$0xff]  ;;  %v9266_v44 = vld [vmem:[#allocation94_spill] sm:$0xff]  ;;  %v9271_v10 = vld [vmem:[#allocation100_spill] sm:$0xff] }
 0x48d   : > { %v4498_v33 = vpop.f32.mrf.mxu1 }
 0x48e   : > { %v8600_v41 = vadd.f32 %v4498_v33, %v8427_v1  ;;  %6260 = vmatmul.msk.bf16.gmra.mxu3 %vm865_vm0, %v4889_v40  ;;  %v4841_v1 = vld [vmem:[#allocation3 + $0x117] sm:$0xff] }
 0x48f   : > { %v4873_v35 = vmul.f32 %v9257_v36, %v4841_v1 }
 0x490   : > { %6307 = vmatmul.msk.bf16.gmra.mxu1 %vm865_vm0, %v9256_v39  ;;  %v5577_v39 = vsel %vm865_vm0, %v9265_v23, 0.0 }
 0x491   : > { %v4890_v38 = vpack.c.bf16 %v4842_v37, %v4873_v35  ;;  %v4985_v35 = vpop.f32.mrf.mxu3 }
 0x492   : > { %6232 = vmatmul.msk.bf16.gmra.mxu2 %vm865_vm0, %v4623_v31  ;;  %v9267_v31 = vld [vmem:[#allocation99_spill] sm:$0xff] }
 0x493   : > { %v9268_v52 = vpack.c.bf16 %v9266_v44, %v9267_v31  ;;  %v9275_v44 = vld [vmem:[#allocation21_spill] sm:$0xff] }
 0x494   : > { %v5581_v31 = vsel %vm865_vm0, %v9275_v44, 0.0 }
 0x495   : > { %v4500_v60 = vpop.f32.mrf.mxu1  ;;  %6289 = vmatmul.msk.bf16.gmra.mxu0 %vm865_vm0, %v5124_v6  ;;  %v4719_v6 = vpop.f32.mrf.mxu2 }
 0x496   : > { %v8609_v46 = vadd.f32 %v4500_v60, %v8440_v58  ;;  %v9259_v58 = vld [vmem:[#allocation95_spill] sm:$0xff]  ;;  %v9269_v60 = vld [vmem:[#allocation12_spill] sm:$0xff]  ;;  %v4787_v44 = vadd.f32 %v4719_v6, %v8412_v29  ;;  %v9285_v29 = vld [vmem:[#allocation33_spill] sm:$0xff] }
 0x497   : > { %v9261_v4 = vpack.c.bf16 %v9259_v58, %v9260_v48  ;;  %v5578_v1 = vsel %vm865_vm0, %v9269_v60, 0.0  ;;  %v9276_v60 = vld [vmem:[#allocation101_spill] sm:$0xff]  ;;  %v5585_v6 = vsel %vm865_vm0, %v9285_v29, 0.0  ;;  %v9291_v29 = vld [vmem:[#allocation103_spill] sm:$0xff] }
 0x49d   : > { %v4503_v55 = vpop.f32.mrf.mxu1  ;;  %v4721_v43 = vpop.f32.mrf.mxu2 }
 0x49e   : > { %v8615_v30 = vadd.f32 %v4503_v55, %v8449_v0  ;;  %6261 = vmatmul.msk.bf16.gmra.mxu3 %vm865_vm0, %v4890_v38  ;;  %v9270_v38 = vld [vmem:[#allocation15_spill] sm:$0xff] }
 0x49f   : > { %v5579_v58 = vsel %vm865_vm0, %v9270_v38, 0.0 }
 0x4a0   : > { %6308 = vmatmul.msk.bf16.gmra.mxu1 %vm865_vm0, %v9261_v4 }
 0x4a2   : > { %6233 = vmatmul.msk.bf16.gmra.mxu2 %vm865_vm0, %v4624_v63  ;;  %v9272_v63 = vld [vmem:[#allocation96_spill] sm:$0xff] }
 0x4a5   : > { %v4505_v51 = vpop.f32.mrf.mxu1  ;;  %v4724_v23 = vpop.f32.mrf.mxu2 }
 0x4a6   : > { %v8624_v11 = vadd.f32 %v4505_v51, %v8462_v5  ;;  %v9273_v51 = vpack.c.bf16 %v9271_v10, %v9272_v63 }
 0x4ad   : > { %v4508_v24 = vpop.f32.mrf.mxu1 }
 0x4ae   : > { %v8627_v0 = vadd.f32 %v4508_v24, %v8471_v34  ;;  %v4987_v24 = vpop.f32.mrf.mxu3 }
 0x4b0   : > { %6309 = vmatmul.msk.bf16.gmra.mxu1 %vm865_vm0, %v9264_v32  ;;  %v5580_v32 = vsel %vm865_vm0, %v9274_v47, 0.0 }
 0x4b5   : > { %v4510_v33 = vpop.f32.mrf.mxu1 }
 0x4b6   : > { %v8634_v40 = vadd.f32 %v4510_v33, %v8486_v28  ;;  %v5221_v33 = vpop.f32.mrf.mxu0 }
 0x4bd   : > { %v5465_v57 = vpop.f32.mrf.mxu1 }
 0x4be   : > { %v5545_v5 = vadd.f32 %v5465_v57, %v8494_v22 }
 0x4c0   : > { %v5609_v34 = vadd.f32 %v5577_v39, %v5545_v5  ;;  %6310 = vmatmul.msk.bf16.gmra.mxu1 %vm865_vm0, %v9268_v52  ;;  %v4990_v5 = vpop.f32.mrf.mxu3 }
 0x4c2   : > { %v5641_v14 = vmax.f32 %v5609_v34, 0.0 }
 0x4c4   : > { %5673 = vst [vmem:[%s8646_s9] sm:$0xff] %v5641_v14  ;;  %v5224_v14 = vpop.f32.mrf.mxu0 }
 0x4c5   : > { %v5467_v28 = vpop.f32.mrf.mxu1 }
 0x4c6   : > { %v5546_v22 = vadd.f32 %v5467_v28, %v8508_v26 }
 0x4c8   : > { %v5610_v36 = vadd.f32 %v5578_v1, %v5546_v22  ;;  %v9277_v1 = vld [vmem:[#allocation59_spill] sm:$0xff] }
 0x4c9   : > { %v9278_v22 = vpack.c.bf16 %v9276_v60, %v9277_v1  ;;  %v9284_v60 = vld [vmem:[#allocation28_spill] sm:$0xff] }
 0x4ca   : > { %v5642_v37 = vmax.f32 %v5610_v36, 0.0  ;;  %v5584_v1 = vsel %vm865_vm0, %v9284_v60, 0.0 }
 0x4cc   : > { %5674 = vst [vmem:[%s8646_s9 + $0x8] sm:$0xff] %v5642_v37 }
 0x4cd   : > { %v5470_v55 = vpop.f32.mrf.mxu1 }
 0x4ce   : > { %v5547_v48 = vadd.f32 %v5470_v55, %v8516_v21  ;;  %v9279_v55 = vld [vmem:[#allocation22_spill] sm:$0xff] }
 0x4cf   : > { %v5582_v38 = vsel %vm865_vm0, %v9279_v55, 0.0 }
 0x4d0   : > { %v5611_v4 = vadd.f32 %v5579_v58, %v5547_v48  ;;  %6311 = vmatmul.msk.bf16.gmra.mxu1 %vm865_vm0, %v9273_v51  ;;  %v4992_v48 = vpop.f32.mrf.mxu3 }
 0x4d2   : > { %v5643_v26 = vmax.f32 %v5611_v4, 0.0 }
 0x4d4   : > { %5675 = vst [vmem:[%s8646_s9 + $0x10] sm:$0xff] %v5643_v26  ;;  %v9280_v26 = vld [vmem:[#allocation27_spill] sm:$0xff] }
 0x4d5   : > { %v5472_v45 = vpop.f32.mrf.mxu1 }
 0x4d6   : > { %v5548_v57 = vadd.f32 %v5472_v45, %v8530_v17  ;;  %v4726_v17 = vpop.f32.mrf.mxu2  ;;  %v5583_v45 = vsel %vm865_vm0, %v9280_v26, 0.0 }
 0x4d8   : > { %v5612_v39 = vadd.f32 %v5580_v32, %v5548_v57  ;;  %v9281_v57 = vld [vmem:[#allocation57_spill] sm:$0xff] }
 0x4da   : > { %v5644_v21 = vmax.f32 %v5612_v39, 0.0  ;;  %v9282_v39 = vld [vmem:[#allocation60_spill] sm:$0xff] }
 0x4dc   : > { %5676 = vst [vmem:[%s8646_s9 + $0x18] sm:$0xff] %v5644_v21  ;;  %v9283_v21 = vpack.c.bf16 %v9281_v57, %v9282_v39 }
 0x4dd   : > { %v5475_v34 = vpop.f32.mrf.mxu1 }
 0x4de   : > { %v5549_v52 = vadd.f32 %v5475_v34, %v8538_v62  ;;  %v5226_v62 = vpop.f32.mrf.mxu0  ;;  %v4729_v63 = vpop.f32.mrf.mxu2 }
 0x4e0   : > { %v5613_v28 = vadd.f32 %v5581_v31, %v5549_v52  ;;  %6312 = vmatmul.msk.bf16.gmra.mxu1 %vm865_vm0, %v9278_v22  ;;  %v5053_v22 = vadd.f32 %v4985_v35, %v4787_v44 }
 0x4e2   : > { %v5645_v36 = vmax.f32 %v5613_v28, 0.0 }
 0x4e4   : > { %5677 = vst [vmem:[%s8646_s9 + $0x20] sm:$0xff] %v5645_v36 }
 0x4e5   : > { %v5477_v37 = vpop.f32.mrf.mxu1 }
 0x4e6   : > { %v5550_v58 = vadd.f32 %v5477_v37, %v8552_v49  ;;  %v4995_v49 = vpop.f32.mrf.mxu3  ;;  %v5229_v31 = vpop.f32.mrf.mxu0 }
 0x4e7   : > { %v4731_v52 = vpop.f32.mrf.mxu2 }
 0x4e8   : > { %v5614_v4 = vadd.f32 %v5582_v38, %v5550_v58  ;;  %v4788_v38 = vadd.f32 %v4721_v43, %v8423_v9  ;;  %v5287_v58 = vadd.f32 %v5219_v59, %v5053_v22  ;;  %v4789_v9 = vadd.f32 %v4724_v23, %v8434_v8  ;;  %v9290_v8 = vld [vmem:[#allocation39_spill] sm:$0xff] }
 0x4e9   : > { %v4790_v22 = vadd.f32 %v4726_v17, %v8445_v19  ;;  %v4791_v19 = vadd.f32 %v4729_v63, %v8456_v56  ;;  %v9295_v56 = vld [vmem:[#allocation45_spill] sm:$0xff] }
 0x4ea   : > { %v5646_v10 = vmax.f32 %v5614_v4, 0.0 }
 0x4ec   : > { %5678 = vst [vmem:[%s8646_s9 + $0x28] sm:$0xff] %v5646_v10 }
 0x4ed   : > { %v5480_v51 = vpop.f32.mrf.mxu1 }
 0x4ee   : > { %v5551_v47 = vadd.f32 %v5480_v51, %v8560_v42  ;;  %v4997_v55 = vpop.f32.mrf.mxu3  ;;  %v5231_v10 = vpop.f32.mrf.mxu0 }
 0x4ef   : > { %v4734_v26 = vpop.f32.mrf.mxu2 }
 0x4f0   : > { %v5615_v32 = vadd.f32 %v5583_v45, %v5551_v47  ;;  %6313 = vmatmul.msk.bf16.gmra.mxu1 %vm865_vm0, %v9283_v21  ;;  %v5054_v45 = vadd.f32 %v4987_v24, %v4788_v38  ;;  %v9289_v21 = vld [vmem:[#allocation34_spill] sm:$0xff] }
 0x4f2   : > { %v5647_v34 = vmax.f32 %v5615_v32, 0.0  ;;  %v9286_v32 = vld [vmem:[#allocation62_spill] sm:$0xff]  ;;  %v5288_v59 = vadd.f32 %v5221_v33, %v5054_v45  ;;  %v5587_v33 = vsel %vm865_vm0, %v9290_v8, 0.0 }
 0x4f4   : > { %5679 = vst [vmem:[%s8646_s9 + $0x30] sm:$0xff] %v5647_v34  ;;  %v5586_v34 = vsel %vm865_vm0, %v9289_v21, 0.0 }
 0x4f5   : > { %v5482_v28 = vpop.f32.mrf.mxu1 }
 0x4f6   : > { %v5552_v42 = vadd.f32 %v5482_v28, %v8574_v25  ;;  %v9287_v25 = vld [vmem:[#allocation102_spill] sm:$0xff]  ;;  %v5000_v43 = vpop.f32.mrf.mxu3  ;;  %v5055_v28 = vadd.f32 %v4990_v5, %v4789_v9  ;;  %v5234_v24 = vpop.f32.mrf.mxu0 }
 0x4f7   : > { %v9288_v35 = vpack.c.bf16 %v9286_v32, %v9287_v25  ;;  %v9294_v32 = vld [vmem:[#allocation40_spill] sm:$0xff] }
 0x4f8   : > { %v5616_v36 = vadd.f32 %v5584_v1, %v5552_v42  ;;  %v4736_v1 = vpop.f32.mrf.mxu2  ;;  %v5588_v25 = vsel %vm865_vm0, %v9294_v32, 0.0 }
 0x4fa   : > { %v5648_v37 = vmax.f32 %v5616_v36, 0.0  ;;  %v5289_v36 = vadd.f32 %v5224_v14, %v5055_v28 }
 0x4fc   : > { %5680 = vst [vmem:[%s8646_s9 + $0x38] sm:$0xff] %v5648_v37 }
 0x4fd   : > { %v5485_v4 = vpop.f32.mrf.mxu1 }
 0x4fe   : > { %v5553_v51 = vadd.f32 %v5485_v4, %v5287_v58  ;;  %v5002_v38 = vpop.f32.mrf.mxu3  ;;  %v5056_v58 = vadd.f32 %v4992_v48, %v4790_v22  ;;  %v5057_v48 = vadd.f32 %v4995_v49, %v4791_v19  ;;  %v9296_v22 = vld [vmem:[#allocation63_spill] sm:$0xff]  ;;  %v5341_v19 = vld [vmem:[#allocation3 + $0x119] sm:$0xff] }
 0x500   : > { %v5617_v47 = vadd.f32 %v5585_v6, %v5553_v51  ;;  %6314 = vmatmul.msk.bf16.gmra.mxu1 %vm865_vm0, %v9288_v35  ;;  %v9292_v6 = vld [vmem:[#allocation65_spill] sm:$0xff]  ;;  %v5236_v51 = vpop.f32.mrf.mxu0  ;;  %v5290_v14 = vadd.f32 %v5226_v62, %v5056_v58  ;;  %v5589_v62 = vsel %vm865_vm0, %v9295_v56, 0.0 }
 0x501   : > { %v9293_v5 = vpack.c.bf16 %v9291_v29, %v9292_v6  ;;  %v5342_v58 = vld [vmem:[#allocation3 + $0x121] sm:$0xff] }
 0x502   : > { %v5649_v57 = vmax.f32 %v5617_v47, 0.0  ;;  %v4739_v47 = vpop.f32.mrf.mxu2 }
 0x504   : > { %5681 = vst [vmem:[%s8646_s9 + $0x40] sm:$0xff] %v5649_v57 }
 0x505   : > { %v5487_v39 = vpop.f32.mrf.mxu1 }
 0x506   : > { %v5554_v44 = vadd.f32 %v5487_v39, %v5288_v59  ;;  %v5005_v9 = vpop.f32.mrf.mxu3  ;;  %v4792_v39 = vadd.f32 %v4731_v52, %v8467_v3  ;;  %v4793_v3 = vadd.f32 %v4734_v26, %v8478_v27 }
 0x508   : > { %v5618_v60 = vadd.f32 %v5586_v34, %v5554_v44  ;;  %v5239_v21 = vpop.f32.mrf.mxu0  ;;  %v5291_v34 = vadd.f32 %v5229_v31, %v5057_v48  ;;  %v5059_v6 = vadd.f32 %v5000_v43, %v4793_v3 }
 0x50a   : > { %v5650_v42 = vmax.f32 %v5618_v60, 0.0  ;;  %v4741_v44 = vpop.f32.mrf.mxu2  ;;  %v5058_v60 = vadd.f32 %v4997_v55, %v4792_v39  ;;  %v5293_v27 = vadd.f32 %v5234_v24, %v5059_v6 }
 0x50c   : > { %5682 = vst [vmem:[%s8646_s9 + $0x48] sm:$0xff] %v5650_v42  ;;  %v5292_v31 = vadd.f32 %v5231_v10, %v5058_v60 }
 0x50d   : > { %v5490_v37 = vpop.f32.mrf.mxu1 }
 0x50e   : > { %v5555_v23 = vadd.f32 %v5490_v37, %v5289_v36  ;;  %v9297_v36 = vld [vmem:[#allocation104_spill] sm:$0xff]  ;;  %v5007_v8 = vpop.f32.mrf.mxu3 }
 0x50f   : > { %v9298_v49 = vpack.c.bf16 %v9296_v22, %v9297_v36  ;;  %v4796_v36 = vadd.f32 %v4741_v44, %v8511_v13  ;;  %v9303_v13 = vld [vmem:[#allocation14_spill] sm:$0xff] }
 0x510   : > { %v5619_v4 = vadd.f32 %v5587_v33, %v5555_v23  ;;  %6315 = vmatmul.msk.bf16.gmra.mxu1 %vm865_vm0, %v9293_v5  ;;  %v9299_v33 = vld [vmem:[#allocation10_spill] sm:$0xff] }
 0x511   : > { %v5590_v23 = vsel %vm865_vm0, %v9299_v33, 0.0  ;;  %v5062_v3 = vadd.f32 %v5007_v8, %v4796_v36 }
 0x512   : > { %v5651_v45 = vmax.f32 %v5619_v4, 0.0  ;;  %v5241_v4 = vpop.f32.mrf.mxu0  ;;  %v4744_v29 = vpop.f32.mrf.mxu2 }
 0x514   : > { %5683 = vst [vmem:[%s8646_s9 + $0x50] sm:$0xff] %v5651_v45  ;;  %v5374_v45 = vmul.f32 %v9258_v20, %v5342_v58  ;;  %v5296_v58 = vadd.f32 %v5241_v4, %v5062_v3 }
 0x515   : > { %v5492_v17 = vpop.f32.mrf.mxu1 }
 0x516   : > { %v5556_v35 = vadd.f32 %v5492_v17, %v5290_v14  ;;  %v4794_v17 = vadd.f32 %v4736_v1, %v8489_v12  ;;  %v5390_v10 = vpack.c.bf16 %v5374_v45, %v5341_v19  ;;  %v5010_v26 = vpop.f32.mrf.mxu3  ;;  %v9301_v1 = vld [vmem:[#allocation9_spill] sm:$0xff] }
 0x518   : > { %v5620_v57 = vadd.f32 %v5588_v25, %v5556_v35  ;;  %v9300_v25 = vld [vmem:[#allocation8_spill] sm:$0xff] }
 0x519   : > { %v5591_v35 = vsel %vm865_vm0, %v9300_v25, 0.0 }
 0x51a   : > { %v5652_v59 = vmax.f32 %v5620_v57, 0.0  ;;  %v5060_v57 = vadd.f32 %v5002_v38, %v4794_v17  ;;  %v4746_v20 = vpop.f32.mrf.mxu2 }
 0x51c   : > { %5684 = vst [vmem:[%s8646_s9 + $0x58] sm:$0xff] %v5652_v59  ;;  %v5244_v59 = vpop.f32.mrf.mxu0  ;;  %v5294_v12 = vadd.f32 %v5236_v51, %v5060_v57 }
 0x51d   : > { %v5495_v28 = vpop.f32.mrf.mxu1 }
 0x51e   : > { %v5557_v63 = vadd.f32 %v5495_v28, %v5291_v34  ;;  %v4795_v34 = vadd.f32 %v4739_v47, %v8499_v54  ;;  %v5592_v28 = vsel %vm865_vm0, %v9301_v1, 0.0  ;;  %v9302_v54 = vld [vmem:[#allocation13_spill] sm:$0xff] }
 0x51f   : > { %v5593_v51 = vsel %vm865_vm0, %v9302_v54, 0.0 }
 0x520   : > { %v5621_v42 = vadd.f32 %v5589_v62, %v5557_v63  ;;  %6316 = vmatmul.msk.bf16.gmra.mxu1 %vm865_vm0, %v9298_v49  ;;  %v5012_v62 = vpop.f32.mrf.mxu3  ;;  %v5061_v63 = vadd.f32 %v5005_v9, %v4795_v34  ;;  %v4797_v9 = vadd.f32 %v4744_v29, %v8521_v18  ;;  %v9304_v18 = vld [vmem:[#allocation17_spill] sm:$0xff] }
 0x521   : > { %v5595_v29 = vsel %vm865_vm0, %v9304_v18, 0.0 }
 0x522   : > { %v5653_v37 = vmax.f32 %v5621_v42, 0.0  ;;  %v4749_v22 = vpop.f32.mrf.mxu2  ;;  %v5295_v49 = vadd.f32 %v5239_v21, %v5061_v63  ;;  %v5594_v21 = vsel %vm865_vm0, %v9303_v13, 0.0 }
 0x524   : > { %5685 = vst [vmem:[%s8646_s9 + $0x60] sm:$0xff] %v5653_v37  ;;  %v5246_v38 = vpop.f32.mrf.mxu0 }
 0x525   : > { %v5497_v52 = vpop.f32.mrf.mxu1 }
 0x526   : > { %v5558_v55 = vadd.f32 %v5497_v52, %v5292_v31 }
 0x528   : > { %v5622_v5 = vadd.f32 %v5590_v23, %v5558_v55  ;;  %v5015_v52 = vpop.f32.mrf.mxu3 }
 0x52a   : > { %v5654_v14 = vmax.f32 %v5622_v5, 0.0  ;;  %v4751_v55 = vpop.f32.mrf.mxu2  ;;  %v5063_v5 = vadd.f32 %v5010_v26, %v4797_v9  ;;  %v4799_v26 = vadd.f32 %v4749_v22, %v8543_v61  ;;  %v9306_v61 = vld [vmem:[#allocation23_spill] sm:$0xff] }
 0x52c   : > { %5686 = vst [vmem:[%s8646_s9 + $0x68] sm:$0xff] %v5654_v14  ;;  %v5249_v23 = vpop.f32.mrf.mxu0  ;;  %v4798_v14 = vadd.f32 %v4746_v20, %v8533_v16  ;;  %v5297_v17 = vadd.f32 %v5244_v59, %v5063_v5  ;;  %v9305_v16 = vld [vmem:[#allocation19_spill] sm:$0xff]  ;;  %v5065_v34 = vadd.f32 %v5015_v52, %v4799_v26 }
 0x52d   : > { %v5500_v32 = vpop.f32.mrf.mxu1  ;;  %v5596_v59 = vsel %vm865_vm0, %v9305_v16, 0.0 }
 0x52e   : > { %v5559_v48 = vadd.f32 %v5500_v32, %v5293_v27  ;;  %v5064_v25 = vadd.f32 %v5012_v62, %v4798_v14  ;;  %v5299_v62 = vadd.f32 %v5249_v23, %v5065_v34 }
 0x530   : > { %v5623_v43 = vadd.f32 %v5591_v35, %v5559_v48  ;;  %6317 = vmatmul.msk.bf16.gmra.mxu1 %vm865_vm0, %v5390_v10  ;;  %v5017_v8 = vpop.f32.mrf.mxu3  ;;  %v5298_v57 = vadd.f32 %v5246_v38, %v5064_v25 }
 0x532   : > { %v5655_v39 = vmax.f32 %v5623_v43, 0.0  ;;  %v4754_v32 = vpop.f32.mrf.mxu2 }
 0x534   : > { %5687 = vst [vmem:[%s8646_s9 + $0x70] sm:$0xff] %v5655_v39  ;;  %v5251_v4 = vpop.f32.mrf.mxu0 }
 0x535   : > { %v5502_v24 = vpop.f32.mrf.mxu1 }
 0x536   : > { %v5560_v56 = vadd.f32 %v5502_v24, %v5294_v12 }
 0x538   : > { %v5624_v60 = vadd.f32 %v5592_v28, %v5560_v56  ;;  %v5020_v43 = vpop.f32.mrf.mxu3  ;;  %v4800_v56 = vadd.f32 %v4751_v55, %v8555_v7  ;;  %v9307_v7 = vld [vmem:[#allocation24_spill] sm:$0xff] }
 0x53a   : > { %v5656_v42 = vmax.f32 %v5624_v60, 0.0  ;;  %v4756_v1 = vpop.f32.mrf.mxu2  ;;  %v5597_v60 = vsel %vm865_vm0, %v9306_v61, 0.0  ;;  %v5066_v22 = vadd.f32 %v5017_v8, %v4800_v56 }
 0x53c   : > { %5688 = vst [vmem:[%s8646_s9 + $0x78] sm:$0xff] %v5656_v42  ;;  %v5254_v12 = vpop.f32.mrf.mxu0 }
 0x53d   : > { %v5505_v37 = vpop.f32.mrf.mxu1 }
 0x53e   : > { %v5561_v47 = vadd.f32 %v5505_v37, %v5295_v49 }
 0x540   : > { %v5625_v31 = vadd.f32 %v5593_v51, %v5561_v47  ;;  %v5022_v42 = vpop.f32.mrf.mxu3  ;;  %v4801_v51 = vadd.f32 %v4754_v32, %v8565_v15  ;;  %v5300_v47 = vadd.f32 %v5251_v4, %v5066_v22  ;;  %v9308_v15 = vld [vmem:[#allocation29_spill] sm:$0xff]  ;;  %v9309_v4 = vld [vmem:[#allocation30_spill] sm:$0xff] }
 0x541   : > { %v5599_v5 = vsel %vm865_vm0, %v9308_v15, 0.0 }
 0x542   : > { %v5657_v33 = vmax.f32 %v5625_v31, 0.0  ;;  %v4759_v54 = vpop.f32.mrf.mxu2  ;;  %v5598_v31 = vsel %vm865_vm0, %v9307_v7, 0.0 }
 0x544   : > { %5689 = vst [vmem:[%s8646_s9 + $0x80] sm:$0xff] %v5657_v33  ;;  %v5256_v49 = vpop.f32.mrf.mxu0  ;;  %v5067_v33 = vadd.f32 %v5020_v43, %v4801_v51 }
 0x545   : > { %v5507_v6 = vpop.f32.mrf.mxu1 }
 0x546   : > { %v5562_v44 = vadd.f32 %v5507_v6, %v5296_v58  ;;  %v4802_v6 = vadd.f32 %v4756_v1, %v8577_v50  ;;  %v5301_v13 = vadd.f32 %v5254_v12, %v5067_v33  ;;  %v5600_v50 = vsel %vm865_vm0, %v9309_v4, 0.0 }
 0x548   : > { %v5626_v45 = vadd.f32 %v5594_v21, %v5562_v44  ;;  %v5025_v23 = vpop.f32.mrf.mxu3 }
 0x54a   : > { %v5658_v19 = vmax.f32 %v5626_v45, 0.0  ;;  %v4761_v21 = vpop.f32.mrf.mxu2 }
 0x54c   : > { %5690 = vst [vmem:[%s8646_s9 + $0x88] sm:$0xff] %v5658_v19  ;;  %v5259_v55 = vpop.f32.mrf.mxu0  ;;  %v5068_v19 = vadd.f32 %v5022_v42, %v4802_v6 }
 0x54d   : > { %v5510_v27 = vpop.f32.mrf.mxu1 }
 0x54e   : > { %v5563_v10 = vadd.f32 %v5510_v27, %v5297_v17  ;;  %v4803_v27 = vadd.f32 %v4759_v54, %v8584_v2  ;;  %v5302_v18 = vadd.f32 %v5256_v49, %v5068_v19  ;;  %v9310_v2 = vld [vmem:[#allocation35_spill] sm:$0xff] }
 0x550   : > { %v5627_v35 = vadd.f32 %v5595_v29, %v5563_v10  ;;  %v5027_v17 = vpop.f32.mrf.mxu3 }
 0x552   : > { %v5659_v48 = vmax.f32 %v5627_v35, 0.0  ;;  %v4764_v25 = vpop.f32.mrf.mxu2  ;;  %v5069_v35 = vadd.f32 %v5025_v23, %v4803_v27  ;;  %v9314_v27 = vld [vmem:[#allocation46_spill] sm:$0xff] }
 0x553   : > { %v4805_v56 = vadd.f32 %v4764_v25, %v8600_v41  ;;  %v9312_v41 = vld [vmem:[#allocation41_spill] sm:$0xff] }
 0x554   : > { %5691 = vst [vmem:[%s8646_s9 + $0x90] sm:$0xff] %v5659_v48  ;;  %v5261_v10 = vpop.f32.mrf.mxu0  ;;  %v5303_v43 = vadd.f32 %v5259_v55, %v5069_v35 }
 0x555   : > { %v5512_v39 = vpop.f32.mrf.mxu1 }
 0x556   : > { %v5564_v20 = vadd.f32 %v5512_v39, %v5298_v57  ;;  %v4804_v57 = vadd.f32 %v4761_v21, %v8593_v53  ;;  %v9311_v53 = vld [vmem:[#allocation36_spill] sm:$0xff] }
 0x557   : > { %v5602_v61 = vsel %vm865_vm0, %v9311_v53, 0.0 }
 0x558   : > { %v5628_v24 = vadd.f32 %v5596_v59, %v5564_v20  ;;  %v5030_v39 = vpop.f32.mrf.mxu3  ;;  %v5601_v59 = vsel %vm865_vm0, %v9310_v2, 0.0  ;;  %v5070_v12 = vadd.f32 %v5027_v17, %v4804_v57 }
 0x559   : > { %v5071_v42 = vadd.f32 %v5030_v39, %v4805_v56 }
 0x55a   : > { %v5660_v28 = vmax.f32 %v5628_v24, 0.0  ;;  %v4766_v1 = vpop.f32.mrf.mxu2 }
 0x55b   : > { %v4806_v54 = vadd.f32 %v4766_v1, %v8609_v46  ;;  %v9313_v46 = vld [vmem:[#allocation42_spill] sm:$0xff] }
 0x55c   : > { %5692 = vst [vmem:[%s8646_s9 + $0x98] sm:$0xff] %v5660_v28  ;;  %v5264_v34 = vpop.f32.mrf.mxu0  ;;  %v5604_v21 = vsel %vm865_vm0, %v9313_v46, 0.0 }
 0x55d   : > { %v5515_v63 = vpop.f32.mrf.mxu1  ;;  %v5305_v51 = vadd.f32 %v5264_v34, %v5071_v42 }
 0x55e   : > { %v5565_v38 = vadd.f32 %v5515_v63, %v5299_v62  ;;  %v5304_v62 = vadd.f32 %v5261_v10, %v5070_v12 }
 0x560   : > { %v5629_v36 = vadd.f32 %v5597_v60, %v5565_v38  ;;  %v5032_v38 = vpop.f32.mrf.mxu3 }
 0x562   : > { %v5661_v37 = vmax.f32 %v5629_v36, 0.0 }
 0x564   : > { %5693 = vst [vmem:[%s8646_s9 + $0xa0] sm:$0xff] %v5661_v37  ;;  %v5266_v36 = vpop.f32.mrf.mxu0  ;;  %v4769_v37 = vpop.f32.mrf.mxu2 }
 0x565   : > { %v5517_v3 = vpop.f32.mrf.mxu1 }
 0x566   : > { %v5566_v52 = vadd.f32 %v5517_v3, %v5300_v47  ;;  %v5603_v3 = vsel %vm865_vm0, %v9312_v41, 0.0 }
 0x568   : > { %v5630_v9 = vadd.f32 %v5598_v31, %v5566_v52  ;;  %v5072_v31 = vadd.f32 %v5032_v38, %v4806_v54  ;;  %v5035_v33 = vpop.f32.mrf.mxu3  ;;  %v9317_v38 = vld [vmem:[#allocation84_spill] sm:$0xff] }
 0x569   : > { %v5608_v42 = vsel %vm865_vm0, %v9317_v38, 0.0 }
 0x56a   : > { %v5662_v58 = vmax.f32 %v5630_v9, 0.0  ;;  %v5306_v55 = vadd.f32 %v5266_v36, %v5072_v31 }
 0x56c   : > { %5694 = vst [vmem:[%s8646_s9 + $0xa8] sm:$0xff] %v5662_v58  ;;  %v5269_v23 = vpop.f32.mrf.mxu0  ;;  %v4807_v58 = vadd.f32 %v4769_v37, %v8615_v30  ;;  %v4771_v6 = vpop.f32.mrf.mxu2  ;;  %v5605_v30 = vsel %vm865_vm0, %v9314_v27, 0.0 }
 0x56d   : > { %v5520_v44 = vpop.f32.mrf.mxu1 }
 0x56e   : > { %v5567_v45 = vadd.f32 %v5520_v44, %v5301_v13  ;;  %v5073_v15 = vadd.f32 %v5035_v33, %v4807_v58 }
 0x570   : > { %v5631_v8 = vadd.f32 %v5599_v5, %v5567_v45  ;;  %v5037_v19 = vpop.f32.mrf.mxu3 }
 0x572   : > { %v5663_v14 = vmax.f32 %v5631_v8, 0.0  ;;  %v4808_v8 = vadd.f32 %v4771_v6, %v8624_v11  ;;  %v9315_v11 = vld [vmem:[#allocation47_spill] sm:$0xff] }
 0x573   : > { %v5606_v57 = vsel %vm865_vm0, %v9315_v11, 0.0 }
 0x574   : > { %5695 = vst [vmem:[%s8646_s9 + $0xb0] sm:$0xff] %v5663_v14  ;;  %v5307_v14 = vadd.f32 %v5269_v23, %v5073_v15  ;;  %v4774_v4 = vpop.f32.mrf.mxu2 }
 0x575   : > { %v5522_v29 = vpop.f32.mrf.mxu1  ;;  %v4809_v25 = vadd.f32 %v4774_v4, %v8627_v0 }
 0x576   : > { %v5568_v32 = vadd.f32 %v5522_v29, %v5302_v18  ;;  %v5271_v29 = vpop.f32.mrf.mxu0 }
 0x578   : > { %v5632_v48 = vadd.f32 %v5600_v50, %v5568_v32  ;;  %v5074_v50 = vadd.f32 %v5037_v19, %v4808_v8 }
 0x57a   : > { %v5664_v26 = vmax.f32 %v5632_v48, 0.0  ;;  %v5308_v35 = vadd.f32 %v5271_v29, %v5074_v50  ;;  %v5040_v48 = vpop.f32.mrf.mxu3 }
 0x57c   : > { %5696 = vst [vmem:[%s8646_s9 + $0xb8] sm:$0xff] %v5664_v26 }
 0x57d   : > { %v5525_v16 = vpop.f32.mrf.mxu1 }
 0x57e   : > { %v5569_v20 = vadd.f32 %v5525_v16, %v5303_v43  ;;  %v5274_v39 = vpop.f32.mrf.mxu0  ;;  %v5075_v16 = vadd.f32 %v5040_v48, %v4809_v25 }
 0x580   : > { %v5633_v24 = vadd.f32 %v5601_v59, %v5569_v20  ;;  %v4776_v59 = vpop.f32.mrf.mxu2  ;;  %v5309_v34 = vadd.f32 %v5274_v39, %v5075_v16 }
 0x581   : > { %v4810_v12 = vadd.f32 %v4776_v59, %v8634_v40 }
 0x582   : > { %v5665_v28 = vmax.f32 %v5633_v24, 0.0  ;;  %v9316_v24 = vld [vmem:[#allocation83_spill] sm:$0xff]  ;;  %v5042_v56 = vpop.f32.mrf.mxu3 }
 0x583   : > { %v5607_v1 = vsel %vm865_vm0, %v9316_v24, 0.0 }
 0x584   : > { %5697 = vst [vmem:[%s8646_s9 + $0xc0] sm:$0xff] %v5665_v28 }
 0x585   : > { %v5527_v63 = vpop.f32.mrf.mxu1 }
 0x586   : > { %v5570_v60 = vadd.f32 %v5527_v63, %v5304_v62  ;;  %v5076_v62 = vadd.f32 %v5042_v56, %v4810_v12  ;;  %v5276_v53 = vpop.f32.mrf.mxu0 }
 0x588   : > { %v5634_v22 = vadd.f32 %v5602_v61, %v5570_v60  ;;  %v5310_v40 = vadd.f32 %v5276_v53, %v5076_v62 }
 0x58a   : > { %v5666_v49 = vmax.f32 %v5634_v22, 0.0 }
 0x58c   : > { %5698 = vst [vmem:[%s8646_s9 + $0xc8] sm:$0xff] %v5666_v49 }
 0x58d   : > { %v5530_v47 = vpop.f32.mrf.mxu1 }
 0x58e   : > { %v5571_v7 = vadd.f32 %v5530_v47, %v5305_v51 }
 0x590   : > { %v5635_v52 = vadd.f32 %v5603_v3, %v5571_v7 }
 0x592   : > { %v5667_v9 = vmax.f32 %v5635_v52, 0.0 }
 0x594   : > { %5699 = vst [vmem:[%s8646_s9 + $0xd0] sm:$0xff] %v5667_v9 }
 0x595   : > { %v5532_v13 = vpop.f32.mrf.mxu1 }
 0x596   : > { %v5572_v44 = vadd.f32 %v5532_v13, %v5306_v55 }
 0x598   : > { %v5636_v5 = vadd.f32 %v5604_v21, %v5572_v44 }
 0x59a   : > { %v5668_v45 = vmax.f32 %v5636_v5, 0.0 }
 0x59c   : > { %5700 = vst [vmem:[%s8646_s9 + $0xd8] sm:$0xff] %v5668_v45 }
 0x59d   : > { %v5535_v17 = vpop.f32.mrf.mxu1 }
 0x59e   : > { %v5573_v18 = vadd.f32 %v5535_v17, %v5307_v14 }
 0x5a0   : > { %v5637_v10 = vadd.f32 %v5605_v30, %v5573_v18 }
 0x5a2   : > { %v5669_v32 = vmax.f32 %v5637_v10, 0.0 }
 0x5a4   : > { %5701 = vst [vmem:[%s8646_s9 + $0xe0] sm:$0xff] %v5669_v32 }
 0x5a5   : > { %v5537_v26 = vpop.f32.mrf.mxu1 }
 0x5a6   : > { %v5574_v43 = vadd.f32 %v5537_v26, %v5308_v35 }
 0x5a8   : > { %v5638_v2 = vadd.f32 %v5606_v57, %v5574_v43 }
 0x5aa   : > { %v5670_v20 = vmax.f32 %v5638_v2, 0.0 }
 0x5ac   : > { %5702 = vst [vmem:[%s8646_s9 + $0xe8] sm:$0xff] %v5670_v20 }
 0x5ad   : > { %v5540_v0 = vpop.f32.mrf.mxu1 }
 0x5ae   : > { %v5575_v28 = vadd.f32 %v5540_v0, %v5309_v34 }
 0x5b0   : > { %v5639_v63 = vadd.f32 %v5607_v1, %v5575_v28 }
 0x5b2   : > { %v5671_v61 = vmax.f32 %v5639_v63, 0.0 }
 0x5b4   : > { %5703 = vst [vmem:[%s8646_s9 + $0xf0] sm:$0xff] %v5671_v61 }
 0x5b5   : > { %v5542_v60 = vpop.f32.mrf.mxu1 }
 0x5b6   : > { %v5576_v22 = vadd.f32 %v5542_v60, %v5310_v40 }
 0x5b8   : > { %v5640_v36 = vadd.f32 %v5608_v42, %v5576_v22 }
 0x5ba   : > { %v5672_v49 = vmax.f32 %v5640_v36, 0.0 }
 0x5bc   : > { %5704 = vst [vmem:[%s8646_s9 + $0xf8] sm:$0xff] %v5672_v49 }
 0x5bd   : > { %6466 = shalt.err (!%p6463_p3)
}
 0x5be   : > { %s6504_s7 = smov 128   ;;  %s6505_s8 = smov 8  }
 0x5bf   : > { %6365 = dma.vmem_to_hbm [thread:$0]  (%p6574_p5), %s5719_s14, 4096, %s5721_s15, %s5706_s22, %s6504_s7, %s6504_s7, %s6505_s8  }
 0x5c0 PF: > { %p6371_p4 = scmp.ge.s32.totalorder %s6501_s21, 2  ;;  %s5735_s9 = sand.u32 1, %s6489_s18  }
 0x5c1   : > { %s5736_s10 = scalar_lea.sflag [#allocation5], %s5735_s9 }
 0x5c2   : > { %p6368_p7 = pnand %p6371_p4, %p6578_p6 }
 0x5c4   : > { %p6369_p8 = pneg %p6368_p7 }
 0x5c6   : > { %6484 = dma.done.wait (%p6369_p8), %s5736_s10, 4096  }
 0x5c7   : > { %6486 = vsyncadd (%p6369_p8), %s5736_s10, 4294963200  ;;  %p15_p9 = scmp.ge.s32.totalorder %s6561_s24, 4   ;;  %s9318_s18 = smov %s6493_s19 }
 0x5c8   : > { %s9319_s19 = smov %s6497_s20  ;;  %s9320_s20 = smov %s6572_s27 }
 0x5c9   : > { %s9321_s21 = smov %s6561_s24  ;;  %17 = sbr.rel (!%p15_p9) target bundleno = 3 (0x3), region = 91 }
 0x5ce   :  { %5742 = vsyncpa [#allocation5], 1 }
 0x5cf   :  { %5744 = vsyncpa [#allocation5 + $0x1], 1 }

</bundles_post_ra>
